<compile_context>
chip_gen: v7x
topology: tpu7x:2x2x1
jax: 0.10.0
libtpu: 0.0.40
codegen_flags: <defaults>
</compile_context>

<pallas_src>
import jax
import jax.numpy as jnp
from jax.experimental import pallas as pl
from jax.experimental.pallas import tpu as pltpu


LATENT = 50          # real latent size (torch chunk(2) of the 100-dim head)
LATENT_PAD = 128     # lane-aligned padding for mu / sigma / z
OUT = 784            # 28 * 28
OUT_PAD = 896        # 7 * 128, lane-dense decoder output

N_LAYERS = 9         # enc1, enc2, enc3, mu-head, sigma-head, dec1..dec4
LAYER_WIDTHS = (512, 256, 128, LATENT_PAD, LATENT_PAD, 128, 256, 512, OUT_PAD)


# ----------------------------- Pallas kernel -------------------------------


def vae_kernel(x_ref, eps_ref, bias_ref, *rest):
  w_hbm = rest[:N_LAYERS]                       # bf16 weights, HBM (pl.ANY)
  xhat_ref = rest[N_LAYERS]                     # [b, OUT_PAD] f32, VMEM
  kld_ref = rest[N_LAYERS + 1]                  # [1, 1] f32, SMEM
  w_buf = rest[N_LAYERS + 2: N_LAYERS + 2 + N_LAYERS]   # VMEM scratch
  sem = rest[-1]                                # DMA semaphores (N_LAYERS,)

  # Kick off all weight fetches immediately; wait per-layer so decoder-weight
  # DMA overlaps with encoder compute.
  copies = []
  for i in range(N_LAYERS):
    cp = pltpu.make_async_copy(w_hbm[i], w_buf[i], sem.at[i])
    cp.start()
    copies.append(cp)

  x = x_ref[...]                                # [b, 784] f32
  batch = x.shape[0]

  def layer(h, i, relu=True):
    width = LAYER_WIDTHS[i]
    copies[i].wait()
    acc = jnp.dot(h.astype(jnp.bfloat16), w_buf[i][...],
                  preferred_element_type=jnp.float32)
    acc = acc + bias_ref[i:i + 1, :width]       # f32 bias add
    return jnp.maximum(acc, 0.0) if relu else acc

  # ----- encoder: 784 -> 512 -> 256 -> 128 -> (mu, sigma) heads -------------
  h = layer(x, 0)
  h = layer(h, 1)
  h = layer(h, 2)
  mu = layer(h, 3)        # [b, 128]; columns >= 50 are exactly 0
  sigma = layer(h, 4)     # [b, 128]; columns >= 50 are exactly 0

  # ----- reparameterization --------------------------------------------------
  z = mu + sigma * eps_ref[...]                 # padded cols stay 0

  # ----- decoder: 50(pad 128) -> 128 -> 256 -> 512 -> 784(pad 896) ----------
  h = layer(z, 5)
  h = layer(h, 6)
  h = layer(h, 7)
  logits = layer(h, 8, relu=False)
  xhat_ref[...] = jax.nn.sigmoid(logits)

  # ----- KLD over the real 50 latent columns --------------------------------
  lane = jax.lax.broadcasted_iota(jnp.int32, mu.shape, 1)
  valid = lane < LATENT
  s2 = sigma * sigma
  terms = mu * mu + s2 - jnp.log(1e-8 + s2) - 1.0
  kld = 0.5 * jnp.sum(jnp.where(valid, terms, 0.0))
  kld_ref[0, 0] = kld / (batch * 28 * 28)


# ------------------------------ params --------------------------------------


def init_params(key):
  """Torch-style nn.Linear init: U(-k, k) with k = 1/sqrt(fan_in).

  Returns (weights, bias_pack):
    weights  : list of 9 bf16 [in, out] matrices (mu/sigma heads and decoder
               layers zero-padded to lane-aligned shapes).
    bias_pack: [9, OUT_PAD] f32; row i holds layer i's bias (zero padded).
  """
  ks = iter(jax.random.split(key, 20))

  def lin(fan_in, fan_out):
    bound = 1.0 / (fan_in ** 0.5)
    w = jax.random.uniform(next(ks), (fan_in, fan_out), jnp.float32, -bound, bound)
    b = jax.random.uniform(next(ks), (fan_out,), jnp.float32, -bound, bound)
    return w, b

  ew1, eb1 = lin(784, 512)
  ew2, eb2 = lin(512, 256)
  ew3, eb3 = lin(256, 128)
  ew4, eb4 = lin(128, 100)     # split into mu / sigma heads below
  dw1, db1 = lin(50, 128)
  dw2, db2 = lin(128, 256)
  dw3, db3 = lin(256, 512)
  dw4, db4 = lin(512, 784)

  def pad_w(w, rows, cols):
    out = jnp.zeros((rows, cols), jnp.float32)
    return out.at[: w.shape[0], : w.shape[1]].set(w)

  w_mu, b_mu = ew4[:, :LATENT], eb4[:LATENT]
  w_sg, b_sg = ew4[:, LATENT:], eb4[LATENT:]

  weights = [
      ew1,                               # [784, 512]
      ew2,                               # [512, 256]
      ew3,                               # [256, 128]
      pad_w(w_mu, 128, LATENT_PAD),      # [128, 128]
      pad_w(w_sg, 128, LATENT_PAD),      # [128, 128]
      pad_w(dw1, LATENT_PAD, 128),       # [128, 128]  (rows 50.. are zero)
      dw2,                               # [128, 256]
      dw3,                               # [256, 512]
      pad_w(dw4, 512, OUT_PAD),          # [512, 896]  (cols 784.. are zero)
  ]
  weights = [w.astype(jnp.bfloat16) for w in weights]

  biases = [eb1, eb2, eb3, b_mu, b_sg, db1, db2, db3, db4]
  bias_pack = jnp.zeros((N_LAYERS, OUT_PAD), jnp.float32)
  for i, b in enumerate(biases):
    bias_pack = bias_pack.at[i, : b.shape[0]].set(b)

  return weights, bias_pack


# ------------------------------ wrapper --------------------------------------


@jax.jit
def vae_forward(x, eps, bias_pack, *weights):
  b = x.shape[0]
  x_flat = x.reshape(b, OUT).astype(jnp.float32)
  eps_pad = jnp.zeros((b, LATENT_PAD), jnp.float32).at[:, :LATENT].set(
      eps.astype(jnp.float32))

  vmem = pl.BlockSpec(memory_space=pltpu.MemorySpace.VMEM)
  smem = pl.BlockSpec(memory_space=pltpu.MemorySpace.SMEM)
  hbm = pl.BlockSpec(memory_space=pl.ANY)

  weight_bytes = sum(w.size * w.dtype.itemsize for w in weights)
  macs = sum(w.shape[0] * w.shape[1] for w in weights)
  cost = pl.CostEstimate(
      flops=2 * b * macs,
      transcendentals=b * (OUT_PAD + LATENT_PAD),     # sigmoid + log
      bytes_accessed=(weight_bytes + bias_pack.size * 4
                      + (x_flat.size + eps_pad.size) * 4 + b * OUT_PAD * 4),
  )

  # NOTE: ungridded (single TensorCore) — fine at this tiny batch.  For real
  # workloads with batch >= 128, add a parallel batch grid so both v7x cores
  # are used; the weight-resident design already supports it.
  xhat_pad, kld = pl.pallas_call(
      vae_kernel,
      out_shape=(
          jax.ShapeDtypeStruct((b, OUT_PAD), jnp.float32),
          jax.ShapeDtypeStruct((1, 1), jnp.float32),
      ),
      in_specs=[vmem, vmem, vmem] + [hbm] * N_LAYERS,
      out_specs=(vmem, smem),
      scratch_shapes=(
          [pltpu.VMEM(w.shape, jnp.bfloat16) for w in weights]
          + [pltpu.SemaphoreType.DMA((N_LAYERS,))]
      ),
      compiler_params=pltpu.CompilerParams(vmem_limit_bytes=16 << 20),
      cost_estimate=cost,
  )(x_flat, eps_pad, bias_pack, *weights)

  x_hat = xhat_pad[:, :OUT].reshape(b, 1, 28, 28)
  return x_hat, kld[0, 0]


# --------------------------- pure-JAX reference ------------------------------


def vae_reference(x, eps, bias_pack, weights):
  b = x.shape[0]
  h = x.reshape(b, OUT).astype(jnp.float32)
  eps_pad = jnp.zeros((b, LATENT_PAD), jnp.float32).at[:, :LATENT].set(eps)

  def lin(h, i, relu=True):
    acc = jnp.dot(h.astype(jnp.bfloat16), weights[i],
                  preferred_element_type=jnp.float32)
    acc = acc + bias_pack[i:i + 1, :LAYER_WIDTHS[i]]
    return jnp.maximum(acc, 0.0) if relu else acc

  h1 = lin(h, 0)
  h2 = lin(h1, 1)
  h3 = lin(h2, 2)
  mu = lin(h3, 3)
  sigma = lin(h3, 4)
  z = mu + sigma * eps_pad
  d1 = lin(z, 5)
  d2 = lin(d1, 6)
  d3 = lin(d2, 7)
  logits = lin(d3, 8, relu=False)
  x_hat = jax.nn.sigmoid(logits)[:, :OUT].reshape(b, 1, 28, 28)

  mu_r, sg_r = mu[:, :LATENT], sigma[:, :LATENT]
  s2 = sg_r * sg_r
  kld = 0.5 * jnp.sum(mu_r * mu_r + s2 - jnp.log(1e-8 + s2) - 1.0) / (b * 28 * 28)
  return x_hat, kld


# ------------------------------ driver ---------------------------------------


if __name__ == "__main__":
  key = jax.random.PRNGKey(0)
  k_x, k_eps, k_params = jax.random.split(key, 3)

  batch = 8
  x = jax.random.uniform(k_x, (batch, 1, 28, 28), jnp.float32)   # MNIST-like
  eps = jax.random.normal(k_eps, (batch, LATENT), jnp.float32)   # randn_like(sigma)
  weights, bias_pack = init_params(k_params)

  x_hat, kld = vae_forward(x, eps, bias_pack, *weights)
  jax.block_until_ready((x_hat, kld))

  assert x_hat.shape == (batch, 1, 28, 28)
  assert x_hat.dtype == jnp.float32
  assert kld.shape == ()
  assert bool(jnp.all(jnp.isfinite(x_hat)))
  assert bool(jnp.isfinite(kld))
  # Sigmoid output must lie in (0, 1).
  assert bool(jnp.all(x_hat >= 0.0)) and bool(jnp.all(x_hat <= 1.0))

  # Numerical check against a pure-JAX reference using the same bf16 params.
  x_hat_ref, kld_ref_val = vae_reference(x, eps, bias_pack, weights)
  assert bool(jnp.allclose(x_hat, x_hat_ref, atol=5e-3, rtol=5e-3))
  assert bool(jnp.allclose(kld, kld_ref_val, atol=5e-3, rtol=5e-3))

  print("KERNEL_OK")
</pallas_src>

<mosaic_0001>
module attributes {stable_mosaic.version = 11 : i64} {
  func.func @vae_kernel(%arg0: memref<8x784xf32, #tpu.memory_space<vmem>>, %arg1: memref<8x128xf32, #tpu.memory_space<vmem>>, %arg2: memref<9x896xf32, #tpu.memory_space<vmem>>, %arg3: memref<784x512xbf16, #tpu.memory_space<any>>, %arg4: memref<512x256xbf16, #tpu.memory_space<any>>, %arg5: memref<256x128xbf16, #tpu.memory_space<any>>, %arg6: memref<128x128xbf16, #tpu.memory_space<any>>, %arg7: memref<128x128xbf16, #tpu.memory_space<any>>, %arg8: memref<128x128xbf16, #tpu.memory_space<any>>, %arg9: memref<128x256xbf16, #tpu.memory_space<any>>, %arg10: memref<256x512xbf16, #tpu.memory_space<any>>, %arg11: memref<512x896xbf16, #tpu.memory_space<any>>, %arg12: memref<8x896xf32, #tpu.memory_space<vmem>>, %arg13: memref<1x1xf32, #tpu.memory_space<smem>>, %arg14: memref<784x512xbf16, #tpu.memory_space<vmem>>, %arg15: memref<512x256xbf16, #tpu.memory_space<vmem>>, %arg16: memref<256x128xbf16, #tpu.memory_space<vmem>>, %arg17: memref<128x128xbf16, #tpu.memory_space<vmem>>, %arg18: memref<128x128xbf16, #tpu.memory_space<vmem>>, %arg19: memref<128x128xbf16, #tpu.memory_space<vmem>>, %arg20: memref<128x256xbf16, #tpu.memory_space<vmem>>, %arg21: memref<256x512xbf16, #tpu.memory_space<vmem>>, %arg22: memref<512x896xbf16, #tpu.memory_space<vmem>>, %arg23: memref<9x!tpu.dma_semaphore, #tpu.memory_space<semaphore_mem>>) attributes {dimension_semantics = [], scalar_prefetch = 0 : i64, scratch_operands = 10 : i64, tpu.core_type = #tpu.core_type<tc>} {
    %c0_i32 = arith.constant 0 : i32
    %0 = tpu.memref_slice %arg23[%c0_i32] : memref<9x!tpu.dma_semaphore, #tpu.memory_space<semaphore_mem>> -> memref<1x!tpu.dma_semaphore, #tpu.memory_space<semaphore_mem>>
    %1 = tpu.memref_squeeze %0 : memref<1x!tpu.dma_semaphore, #tpu.memory_space<semaphore_mem>> -> memref<!tpu.dma_semaphore, #tpu.memory_space<semaphore_mem>>
    tpu.enqueue_dma source(%arg3 : memref<784x512xbf16, #tpu.memory_space<any>>) target(%arg14 : memref<784x512xbf16, #tpu.memory_space<vmem>>) target_semaphore(%1 : memref<!tpu.dma_semaphore, #tpu.memory_space<semaphore_mem>>)
    %c1_i32 = arith.constant 1 : i32
    %2 = tpu.memref_slice %arg23[%c1_i32] : memref<9x!tpu.dma_semaphore, #tpu.memory_space<semaphore_mem>> -> memref<1x!tpu.dma_semaphore, #tpu.memory_space<semaphore_mem>>
    %3 = tpu.memref_squeeze %2 : memref<1x!tpu.dma_semaphore, #tpu.memory_space<semaphore_mem>> -> memref<!tpu.dma_semaphore, #tpu.memory_space<semaphore_mem>>
    tpu.enqueue_dma source(%arg4 : memref<512x256xbf16, #tpu.memory_space<any>>) target(%arg15 : memref<512x256xbf16, #tpu.memory_space<vmem>>) target_semaphore(%3 : memref<!tpu.dma_semaphore, #tpu.memory_space<semaphore_mem>>)
    %c2_i32 = arith.constant 2 : i32
    %4 = tpu.memref_slice %arg23[%c2_i32] : memref<9x!tpu.dma_semaphore, #tpu.memory_space<semaphore_mem>> -> memref<1x!tpu.dma_semaphore, #tpu.memory_space<semaphore_mem>>
    %5 = tpu.memref_squeeze %4 : memref<1x!tpu.dma_semaphore, #tpu.memory_space<semaphore_mem>> -> memref<!tpu.dma_semaphore, #tpu.memory_space<semaphore_mem>>
    tpu.enqueue_dma source(%arg5 : memref<256x128xbf16, #tpu.memory_space<any>>) target(%arg16 : memref<256x128xbf16, #tpu.memory_space<vmem>>) target_semaphore(%5 : memref<!tpu.dma_semaphore, #tpu.memory_space<semaphore_mem>>)
    %c3_i32 = arith.constant 3 : i32
    %6 = tpu.memref_slice %arg23[%c3_i32] : memref<9x!tpu.dma_semaphore, #tpu.memory_space<semaphore_mem>> -> memref<1x!tpu.dma_semaphore, #tpu.memory_space<semaphore_mem>>
    %7 = tpu.memref_squeeze %6 : memref<1x!tpu.dma_semaphore, #tpu.memory_space<semaphore_mem>> -> memref<!tpu.dma_semaphore, #tpu.memory_space<semaphore_mem>>
    tpu.enqueue_dma source(%arg6 : memref<128x128xbf16, #tpu.memory_space<any>>) target(%arg17 : memref<128x128xbf16, #tpu.memory_space<vmem>>) target_semaphore(%7 : memref<!tpu.dma_semaphore, #tpu.memory_space<semaphore_mem>>)
    %c4_i32 = arith.constant 4 : i32
    %8 = tpu.memref_slice %arg23[%c4_i32] : memref<9x!tpu.dma_semaphore, #tpu.memory_space<semaphore_mem>> -> memref<1x!tpu.dma_semaphore, #tpu.memory_space<semaphore_mem>>
    %9 = tpu.memref_squeeze %8 : memref<1x!tpu.dma_semaphore, #tpu.memory_space<semaphore_mem>> -> memref<!tpu.dma_semaphore, #tpu.memory_space<semaphore_mem>>
    tpu.enqueue_dma source(%arg7 : memref<128x128xbf16, #tpu.memory_space<any>>) target(%arg18 : memref<128x128xbf16, #tpu.memory_space<vmem>>) target_semaphore(%9 : memref<!tpu.dma_semaphore, #tpu.memory_space<semaphore_mem>>)
    %c5_i32 = arith.constant 5 : i32
    %10 = tpu.memref_slice %arg23[%c5_i32] : memref<9x!tpu.dma_semaphore, #tpu.memory_space<semaphore_mem>> -> memref<1x!tpu.dma_semaphore, #tpu.memory_space<semaphore_mem>>
    %11 = tpu.memref_squeeze %10 : memref<1x!tpu.dma_semaphore, #tpu.memory_space<semaphore_mem>> -> memref<!tpu.dma_semaphore, #tpu.memory_space<semaphore_mem>>
    tpu.enqueue_dma source(%arg8 : memref<128x128xbf16, #tpu.memory_space<any>>) target(%arg19 : memref<128x128xbf16, #tpu.memory_space<vmem>>) target_semaphore(%11 : memref<!tpu.dma_semaphore, #tpu.memory_space<semaphore_mem>>)
    %c6_i32 = arith.constant 6 : i32
    %12 = tpu.memref_slice %arg23[%c6_i32] : memref<9x!tpu.dma_semaphore, #tpu.memory_space<semaphore_mem>> -> memref<1x!tpu.dma_semaphore, #tpu.memory_space<semaphore_mem>>
    %13 = tpu.memref_squeeze %12 : memref<1x!tpu.dma_semaphore, #tpu.memory_space<semaphore_mem>> -> memref<!tpu.dma_semaphore, #tpu.memory_space<semaphore_mem>>
    tpu.enqueue_dma source(%arg9 : memref<128x256xbf16, #tpu.memory_space<any>>) target(%arg20 : memref<128x256xbf16, #tpu.memory_space<vmem>>) target_semaphore(%13 : memref<!tpu.dma_semaphore, #tpu.memory_space<semaphore_mem>>)
    %c7_i32 = arith.constant 7 : i32
    %14 = tpu.memref_slice %arg23[%c7_i32] : memref<9x!tpu.dma_semaphore, #tpu.memory_space<semaphore_mem>> -> memref<1x!tpu.dma_semaphore, #tpu.memory_space<semaphore_mem>>
    %15 = tpu.memref_squeeze %14 : memref<1x!tpu.dma_semaphore, #tpu.memory_space<semaphore_mem>> -> memref<!tpu.dma_semaphore, #tpu.memory_space<semaphore_mem>>
    tpu.enqueue_dma source(%arg10 : memref<256x512xbf16, #tpu.memory_space<any>>) target(%arg21 : memref<256x512xbf16, #tpu.memory_space<vmem>>) target_semaphore(%15 : memref<!tpu.dma_semaphore, #tpu.memory_space<semaphore_mem>>)
    %c8_i32 = arith.constant 8 : i32
    %16 = tpu.memref_slice %arg23[%c8_i32] : memref<9x!tpu.dma_semaphore, #tpu.memory_space<semaphore_mem>> -> memref<1x!tpu.dma_semaphore, #tpu.memory_space<semaphore_mem>>
    %17 = tpu.memref_squeeze %16 : memref<1x!tpu.dma_semaphore, #tpu.memory_space<semaphore_mem>> -> memref<!tpu.dma_semaphore, #tpu.memory_space<semaphore_mem>>
    tpu.enqueue_dma source(%arg11 : memref<512x896xbf16, #tpu.memory_space<any>>) target(%arg22 : memref<512x896xbf16, #tpu.memory_space<vmem>>) target_semaphore(%17 : memref<!tpu.dma_semaphore, #tpu.memory_space<semaphore_mem>>)
    %c0 = arith.constant 0 : index
    %c0_0 = arith.constant 0 : index
    %18 = vector.load %arg0[%c0, %c0_0] : memref<8x784xf32, #tpu.memory_space<vmem>>, vector<8x784xf32>
    %c0_i32_1 = arith.constant 0 : i32
    %19 = tpu.memref_slice %arg23[%c0_i32_1] : memref<9x!tpu.dma_semaphore, #tpu.memory_space<semaphore_mem>> -> memref<1x!tpu.dma_semaphore, #tpu.memory_space<semaphore_mem>>
    %20 = tpu.memref_squeeze %19 : memref<1x!tpu.dma_semaphore, #tpu.memory_space<semaphore_mem>> -> memref<!tpu.dma_semaphore, #tpu.memory_space<semaphore_mem>>
    tpu.wait_dma2 semaphore(%20 : memref<!tpu.dma_semaphore, #tpu.memory_space<semaphore_mem>>) src(%arg3 : memref<784x512xbf16, #tpu.memory_space<any>>) dst(%arg14 : memref<784x512xbf16, #tpu.memory_space<vmem>>)
    %21 = arith.truncf %18 : vector<8x784xf32> to vector<8x784xbf16>
    %c0_2 = arith.constant 0 : index
    %c0_3 = arith.constant 0 : index
    %22 = vector.load %arg14[%c0_2, %c0_3] : memref<784x512xbf16, #tpu.memory_space<vmem>>, vector<784x512xbf16>
    %cst = arith.constant dense<0.000000e+00> : vector<8x512xf32>
    %23 = tpu.matmul %21, %22, %cst {dimension_numbers = #tpu.dot_dimension_numbers<[1], [0], [0], [1], [0, 0, 1, 1], [], []>} : vector<8x784xbf16>, vector<784x512xbf16>, vector<8x512xf32> -> vector<8x512xf32>
    %c0_4 = arith.constant 0 : index
    %c0_5 = arith.constant 0 : index
    %24 = vector.load %arg2[%c0_4, %c0_5] : memref<9x896xf32, #tpu.memory_space<vmem>>, vector<1x512xf32>
    %25 = vector.broadcast %24 : vector<1x512xf32> to vector<8x512xf32>
    %26 = arith.addf %23, %25 : vector<8x512xf32>
    %cst_6 = arith.constant 0.000000e+00 : f32
    %27 = vector.broadcast %cst_6 : f32 to vector<8x512xf32>
    %28 = arith.maximumf %26, %27 : vector<8x512xf32>
    %c1_i32_7 = arith.constant 1 : i32
    %29 = tpu.memref_slice %arg23[%c1_i32_7] : memref<9x!tpu.dma_semaphore, #tpu.memory_space<semaphore_mem>> -> memref<1x!tpu.dma_semaphore, #tpu.memory_space<semaphore_mem>>
    %30 = tpu.memref_squeeze %29 : memref<1x!tpu.dma_semaphore, #tpu.memory_space<semaphore_mem>> -> memref<!tpu.dma_semaphore, #tpu.memory_space<semaphore_mem>>
    tpu.wait_dma2 semaphore(%30 : memref<!tpu.dma_semaphore, #tpu.memory_space<semaphore_mem>>) src(%arg4 : memref<512x256xbf16, #tpu.memory_space<any>>) dst(%arg15 : memref<512x256xbf16, #tpu.memory_space<vmem>>)
    %31 = arith.truncf %28 : vector<8x512xf32> to vector<8x512xbf16>
    %c0_8 = arith.constant 0 : index
    %c0_9 = arith.constant 0 : index
    %32 = vector.load %arg15[%c0_8, %c0_9] : memref<512x256xbf16, #tpu.memory_space<vmem>>, vector<512x256xbf16>
    %cst_10 = arith.constant dense<0.000000e+00> : vector<8x256xf32>
    %33 = tpu.matmul %31, %32, %cst_10 {dimension_numbers = #tpu.dot_dimension_numbers<[1], [0], [0], [1], [0, 0, 1, 1], [], []>} : vector<8x512xbf16>, vector<512x256xbf16>, vector<8x256xf32> -> vector<8x256xf32>
    %c1 = arith.constant 1 : index
    %c0_11 = arith.constant 0 : index
    %34 = vector.load %arg2[%c1, %c0_11] : memref<9x896xf32, #tpu.memory_space<vmem>>, vector<1x256xf32>
    %35 = vector.broadcast %34 : vector<1x256xf32> to vector<8x256xf32>
    %36 = arith.addf %33, %35 : vector<8x256xf32>
    %cst_12 = arith.constant 0.000000e+00 : f32
    %37 = vector.broadcast %cst_12 : f32 to vector<8x256xf32>
    %38 = arith.maximumf %36, %37 : vector<8x256xf32>
    %c2_i32_13 = arith.constant 2 : i32
    %39 = tpu.memref_slice %arg23[%c2_i32_13] : memref<9x!tpu.dma_semaphore, #tpu.memory_space<semaphore_mem>> -> memref<1x!tpu.dma_semaphore, #tpu.memory_space<semaphore_mem>>
    %40 = tpu.memref_squeeze %39 : memref<1x!tpu.dma_semaphore, #tpu.memory_space<semaphore_mem>> -> memref<!tpu.dma_semaphore, #tpu.memory_space<semaphore_mem>>
    tpu.wait_dma2 semaphore(%40 : memref<!tpu.dma_semaphore, #tpu.memory_space<semaphore_mem>>) src(%arg5 : memref<256x128xbf16, #tpu.memory_space<any>>) dst(%arg16 : memref<256x128xbf16, #tpu.memory_space<vmem>>)
    %41 = arith.truncf %38 : vector<8x256xf32> to vector<8x256xbf16>
    %c0_14 = arith.constant 0 : index
    %c0_15 = arith.constant 0 : index
    %42 = vector.load %arg16[%c0_14, %c0_15] : memref<256x128xbf16, #tpu.memory_space<vmem>>, vector<256x128xbf16>
    %cst_16 = arith.constant dense<0.000000e+00> : vector<8x128xf32>
    %43 = tpu.matmul %41, %42, %cst_16 {dimension_numbers = #tpu.dot_dimension_numbers<[1], [0], [0], [1], [0, 0, 1, 1], [], []>} : vector<8x256xbf16>, vector<256x128xbf16>, vector<8x128xf32> -> vector<8x128xf32>
    %c2 = arith.constant 2 : index
    %c0_17 = arith.constant 0 : index
    %44 = vector.load %arg2[%c2, %c0_17] : memref<9x896xf32, #tpu.memory_space<vmem>>, vector<1x128xf32>
    %45 = vector.broadcast %44 : vector<1x128xf32> to vector<8x128xf32>
    %46 = arith.addf %43, %45 : vector<8x128xf32>
    %cst_18 = arith.constant 0.000000e+00 : f32
    %47 = vector.broadcast %cst_18 : f32 to vector<8x128xf32>
    %48 = arith.maximumf %46, %47 : vector<8x128xf32>
    %c3_i32_19 = arith.constant 3 : i32
    %49 = tpu.memref_slice %arg23[%c3_i32_19] : memref<9x!tpu.dma_semaphore, #tpu.memory_space<semaphore_mem>> -> memref<1x!tpu.dma_semaphore, #tpu.memory_space<semaphore_mem>>
    %50 = tpu.memref_squeeze %49 : memref<1x!tpu.dma_semaphore, #tpu.memory_space<semaphore_mem>> -> memref<!tpu.dma_semaphore, #tpu.memory_space<semaphore_mem>>
    tpu.wait_dma2 semaphore(%50 : memref<!tpu.dma_semaphore, #tpu.memory_space<semaphore_mem>>) src(%arg6 : memref<128x128xbf16, #tpu.memory_space<any>>) dst(%arg17 : memref<128x128xbf16, #tpu.memory_space<vmem>>)
    %51 = arith.truncf %48 : vector<8x128xf32> to vector<8x128xbf16>
    %c0_20 = arith.constant 0 : index
    %c0_21 = arith.constant 0 : index
    %52 = vector.load %arg17[%c0_20, %c0_21] : memref<128x128xbf16, #tpu.memory_space<vmem>>, vector<128x128xbf16>
    %cst_22 = arith.constant dense<0.000000e+00> : vector<8x128xf32>
    %53 = tpu.matmul %51, %52, %cst_22 {dimension_numbers = #tpu.dot_dimension_numbers<[1], [0], [0], [1], [0, 0, 1, 1], [], []>} : vector<8x128xbf16>, vector<128x128xbf16>, vector<8x128xf32> -> vector<8x128xf32>
    %c3 = arith.constant 3 : index
    %c0_23 = arith.constant 0 : index
    %54 = vector.load %arg2[%c3, %c0_23] : memref<9x896xf32, #tpu.memory_space<vmem>>, vector<1x128xf32>
    %55 = vector.broadcast %54 : vector<1x128xf32> to vector<8x128xf32>
    %56 = arith.addf %53, %55 : vector<8x128xf32>
    %cst_24 = arith.constant 0.000000e+00 : f32
    %57 = vector.broadcast %cst_24 : f32 to vector<8x128xf32>
    %58 = arith.maximumf %56, %57 : vector<8x128xf32>
    %c4_i32_25 = arith.constant 4 : i32
    %59 = tpu.memref_slice %arg23[%c4_i32_25] : memref<9x!tpu.dma_semaphore, #tpu.memory_space<semaphore_mem>> -> memref<1x!tpu.dma_semaphore, #tpu.memory_space<semaphore_mem>>
    %60 = tpu.memref_squeeze %59 : memref<1x!tpu.dma_semaphore, #tpu.memory_space<semaphore_mem>> -> memref<!tpu.dma_semaphore, #tpu.memory_space<semaphore_mem>>
    tpu.wait_dma2 semaphore(%60 : memref<!tpu.dma_semaphore, #tpu.memory_space<semaphore_mem>>) src(%arg7 : memref<128x128xbf16, #tpu.memory_space<any>>) dst(%arg18 : memref<128x128xbf16, #tpu.memory_space<vmem>>)
    %61 = arith.truncf %48 : vector<8x128xf32> to vector<8x128xbf16>
    %c0_26 = arith.constant 0 : index
    %c0_27 = arith.constant 0 : index
    %62 = vector.load %arg18[%c0_26, %c0_27] : memref<128x128xbf16, #tpu.memory_space<vmem>>, vector<128x128xbf16>
    %cst_28 = arith.constant dense<0.000000e+00> : vector<8x128xf32>
    %63 = tpu.matmul %61, %62, %cst_28 {dimension_numbers = #tpu.dot_dimension_numbers<[1], [0], [0], [1], [0, 0, 1, 1], [], []>} : vector<8x128xbf16>, vector<128x128xbf16>, vector<8x128xf32> -> vector<8x128xf32>
    %c4 = arith.constant 4 : index
    %c0_29 = arith.constant 0 : index
    %64 = vector.load %arg2[%c4, %c0_29] : memref<9x896xf32, #tpu.memory_space<vmem>>, vector<1x128xf32>
    %65 = vector.broadcast %64 : vector<1x128xf32> to vector<8x128xf32>
    %66 = arith.addf %63, %65 : vector<8x128xf32>
    %cst_30 = arith.constant 0.000000e+00 : f32
    %67 = vector.broadcast %cst_30 : f32 to vector<8x128xf32>
    %68 = arith.maximumf %66, %67 : vector<8x128xf32>
    %c0_31 = arith.constant 0 : index
    %c0_32 = arith.constant 0 : index
    %69 = vector.load %arg1[%c0_31, %c0_32] : memref<8x128xf32, #tpu.memory_space<vmem>>, vector<8x128xf32>
    %70 = arith.mulf %68, %69 : vector<8x128xf32>
    %71 = arith.addf %58, %70 : vector<8x128xf32>
    %c5_i32_33 = arith.constant 5 : i32
    %72 = tpu.memref_slice %arg23[%c5_i32_33] : memref<9x!tpu.dma_semaphore, #tpu.memory_space<semaphore_mem>> -> memref<1x!tpu.dma_semaphore, #tpu.memory_space<semaphore_mem>>
    %73 = tpu.memref_squeeze %72 : memref<1x!tpu.dma_semaphore, #tpu.memory_space<semaphore_mem>> -> memref<!tpu.dma_semaphore, #tpu.memory_space<semaphore_mem>>
    tpu.wait_dma2 semaphore(%73 : memref<!tpu.dma_semaphore, #tpu.memory_space<semaphore_mem>>) src(%arg8 : memref<128x128xbf16, #tpu.memory_space<any>>) dst(%arg19 : memref<128x128xbf16, #tpu.memory_space<vmem>>)
    %74 = arith.truncf %71 : vector<8x128xf32> to vector<8x128xbf16>
    %c0_34 = arith.constant 0 : index
    %c0_35 = arith.constant 0 : index
    %75 = vector.load %arg19[%c0_34, %c0_35] : memref<128x128xbf16, #tpu.memory_space<vmem>>, vector<128x128xbf16>
    %cst_36 = arith.constant dense<0.000000e+00> : vector<8x128xf32>
    %76 = tpu.matmul %74, %75, %cst_36 {dimension_numbers = #tpu.dot_dimension_numbers<[1], [0], [0], [1], [0, 0, 1, 1], [], []>} : vector<8x128xbf16>, vector<128x128xbf16>, vector<8x128xf32> -> vector<8x128xf32>
    %c5 = arith.constant 5 : index
    %c0_37 = arith.constant 0 : index
    %77 = vector.load %arg2[%c5, %c0_37] : memref<9x896xf32, #tpu.memory_space<vmem>>, vector<1x128xf32>
    %78 = vector.broadcast %77 : vector<1x128xf32> to vector<8x128xf32>
    %79 = arith.addf %76, %78 : vector<8x128xf32>
    %cst_38 = arith.constant 0.000000e+00 : f32
    %80 = vector.broadcast %cst_38 : f32 to vector<8x128xf32>
    %81 = arith.maximumf %79, %80 : vector<8x128xf32>
    %c6_i32_39 = arith.constant 6 : i32
    %82 = tpu.memref_slice %arg23[%c6_i32_39] : memref<9x!tpu.dma_semaphore, #tpu.memory_space<semaphore_mem>> -> memref<1x!tpu.dma_semaphore, #tpu.memory_space<semaphore_mem>>
    %83 = tpu.memref_squeeze %82 : memref<1x!tpu.dma_semaphore, #tpu.memory_space<semaphore_mem>> -> memref<!tpu.dma_semaphore, #tpu.memory_space<semaphore_mem>>
    tpu.wait_dma2 semaphore(%83 : memref<!tpu.dma_semaphore, #tpu.memory_space<semaphore_mem>>) src(%arg9 : memref<128x256xbf16, #tpu.memory_space<any>>) dst(%arg20 : memref<128x256xbf16, #tpu.memory_space<vmem>>)
    %84 = arith.truncf %81 : vector<8x128xf32> to vector<8x128xbf16>
    %c0_40 = arith.constant 0 : index
    %c0_41 = arith.constant 0 : index
    %85 = vector.load %arg20[%c0_40, %c0_41] : memref<128x256xbf16, #tpu.memory_space<vmem>>, vector<128x256xbf16>
    %cst_42 = arith.constant dense<0.000000e+00> : vector<8x256xf32>
    %86 = tpu.matmul %84, %85, %cst_42 {dimension_numbers = #tpu.dot_dimension_numbers<[1], [0], [0], [1], [0, 0, 1, 1], [], []>} : vector<8x128xbf16>, vector<128x256xbf16>, vector<8x256xf32> -> vector<8x256xf32>
    %c6 = arith.constant 6 : index
    %c0_43 = arith.constant 0 : index
    %87 = vector.load %arg2[%c6, %c0_43] : memref<9x896xf32, #tpu.memory_space<vmem>>, vector<1x256xf32>
    %88 = vector.broadcast %87 : vector<1x256xf32> to vector<8x256xf32>
    %89 = arith.addf %86, %88 : vector<8x256xf32>
    %cst_44 = arith.constant 0.000000e+00 : f32
    %90 = vector.broadcast %cst_44 : f32 to vector<8x256xf32>
    %91 = arith.maximumf %89, %90 : vector<8x256xf32>
    %c7_i32_45 = arith.constant 7 : i32
    %92 = tpu.memref_slice %arg23[%c7_i32_45] : memref<9x!tpu.dma_semaphore, #tpu.memory_space<semaphore_mem>> -> memref<1x!tpu.dma_semaphore, #tpu.memory_space<semaphore_mem>>
    %93 = tpu.memref_squeeze %92 : memref<1x!tpu.dma_semaphore, #tpu.memory_space<semaphore_mem>> -> memref<!tpu.dma_semaphore, #tpu.memory_space<semaphore_mem>>
    tpu.wait_dma2 semaphore(%93 : memref<!tpu.dma_semaphore, #tpu.memory_space<semaphore_mem>>) src(%arg10 : memref<256x512xbf16, #tpu.memory_space<any>>) dst(%arg21 : memref<256x512xbf16, #tpu.memory_space<vmem>>)
    %94 = arith.truncf %91 : vector<8x256xf32> to vector<8x256xbf16>
    %c0_46 = arith.constant 0 : index
    %c0_47 = arith.constant 0 : index
    %95 = vector.load %arg21[%c0_46, %c0_47] : memref<256x512xbf16, #tpu.memory_space<vmem>>, vector<256x512xbf16>
    %cst_48 = arith.constant dense<0.000000e+00> : vector<8x512xf32>
    %96 = tpu.matmul %94, %95, %cst_48 {dimension_numbers = #tpu.dot_dimension_numbers<[1], [0], [0], [1], [0, 0, 1, 1], [], []>} : vector<8x256xbf16>, vector<256x512xbf16>, vector<8x512xf32> -> vector<8x512xf32>
    %c7 = arith.constant 7 : index
    %c0_49 = arith.constant 0 : index
    %97 = vector.load %arg2[%c7, %c0_49] : memref<9x896xf32, #tpu.memory_space<vmem>>, vector<1x512xf32>
    %98 = vector.broadcast %97 : vector<1x512xf32> to vector<8x512xf32>
    %99 = arith.addf %96, %98 : vector<8x512xf32>
    %cst_50 = arith.constant 0.000000e+00 : f32
    %100 = vector.broadcast %cst_50 : f32 to vector<8x512xf32>
    %101 = arith.maximumf %99, %100 : vector<8x512xf32>
    %c8_i32_51 = arith.constant 8 : i32
    %102 = tpu.memref_slice %arg23[%c8_i32_51] : memref<9x!tpu.dma_semaphore, #tpu.memory_space<semaphore_mem>> -> memref<1x!tpu.dma_semaphore, #tpu.memory_space<semaphore_mem>>
    %103 = tpu.memref_squeeze %102 : memref<1x!tpu.dma_semaphore, #tpu.memory_space<semaphore_mem>> -> memref<!tpu.dma_semaphore, #tpu.memory_space<semaphore_mem>>
    tpu.wait_dma2 semaphore(%103 : memref<!tpu.dma_semaphore, #tpu.memory_space<semaphore_mem>>) src(%arg11 : memref<512x896xbf16, #tpu.memory_space<any>>) dst(%arg22 : memref<512x896xbf16, #tpu.memory_space<vmem>>)
    %104 = arith.truncf %101 : vector<8x512xf32> to vector<8x512xbf16>
    %c0_52 = arith.constant 0 : index
    %c0_53 = arith.constant 0 : index
    %105 = vector.load %arg22[%c0_52, %c0_53] : memref<512x896xbf16, #tpu.memory_space<vmem>>, vector<512x896xbf16>
    %cst_54 = arith.constant dense<0.000000e+00> : vector<8x896xf32>
    %106 = tpu.matmul %104, %105, %cst_54 {dimension_numbers = #tpu.dot_dimension_numbers<[1], [0], [0], [1], [0, 0, 1, 1], [], []>} : vector<8x512xbf16>, vector<512x896xbf16>, vector<8x896xf32> -> vector<8x896xf32>
    %c8 = arith.constant 8 : index
    %c0_55 = arith.constant 0 : index
    %107 = vector.load %arg2[%c8, %c0_55] : memref<9x896xf32, #tpu.memory_space<vmem>>, vector<1x896xf32>
    %108 = vector.broadcast %107 : vector<1x896xf32> to vector<8x896xf32>
    %109 = arith.addf %106, %108 : vector<8x896xf32>
    %110 = arith.negf %109 : vector<8x896xf32>
    %111 = math.exp %110 : vector<8x896xf32>
    %cst_56 = arith.constant 1.000000e+00 : f32
    %112 = vector.broadcast %cst_56 : f32 to vector<8x896xf32>
    %113 = arith.addf %112, %111 : vector<8x896xf32>
    %114 = arith.divf %112, %113 : vector<8x896xf32>
    %c0_57 = arith.constant 0 : index
    %c0_58 = arith.constant 0 : index
    %115 = vector.load %arg12[%c0_57, %c0_58] : memref<8x896xf32, #tpu.memory_space<vmem>>, vector<8x896xf32>
    tpu.vector_store %arg12[%c0_57, %c0_58], %114 {strides = array<i32>} : memref<8x896xf32, #tpu.memory_space<vmem>>, vector<8x896xf32>,
    %116 = tpu.iota {dimensions = array<i32: 1>} : vector<8x128xi32>
    %c50_i32 = arith.constant 50 : i32
    %117 = vector.broadcast %c50_i32 : i32 to vector<8x128xi32>
    %118 = arith.cmpi slt, %116, %117 : vector<8x128xi32>
    %119 = arith.mulf %68, %68 : vector<8x128xf32>
    %120 = arith.mulf %58, %58 : vector<8x128xf32>
    %121 = arith.addf %120, %119 : vector<8x128xf32>
    %cst_59 = arith.constant 9.99999993E-9 : f32
    %122 = vector.broadcast %cst_59 : f32 to vector<8x128xf32>
    %123 = arith.addf %122, %119 : vector<8x128xf32>
    %124 = math.log %123 : vector<8x128xf32>
    %125 = arith.subf %121, %124 : vector<8x128xf32>
    %cst_60 = arith.constant 1.000000e+00 : f32
    %126 = vector.broadcast %cst_60 : f32 to vector<8x128xf32>
    %127 = arith.subf %125, %126 : vector<8x128xf32>
    %cst_61 = arith.constant 0.000000e+00 : f32
    %128 = vector.broadcast %cst_61 : f32 to vector<8x128xf32>
    %129 = arith.select %118, %127, %128 : vector<8x128xi1>, vector<8x128xf32>
    %130 = vector.shape_cast %129 : vector<8x128xf32> to vector<1x8x128xf32>
    %cst_62 = arith.constant dense<0.000000e+00> : vector<1xf32>
    %131 = vector.multi_reduction <add>, %130, %cst_62 [1, 2] : vector<1x8x128xf32> to vector<1xf32>
    %132 = vector.shape_cast %131 : vector<1xf32> to vector<1x1x1xf32>
    %133 = vector.extract %132[0, 0, 0] : f32 from vector<1x1x1xf32>
    %cst_63 = arith.constant 5.000000e-01 : f32
    %134 = arith.mulf %cst_63, %133 : f32
    %cst_64 = arith.constant 6.272000e+03 : f32
    %135 = arith.divf %134, %cst_64 : f32
    %c0_65 = arith.constant 0 : index
    %c0_66 = arith.constant 0 : index
    %136 = memref.load %arg13[%c0_65, %c0_66] : memref<1x1xf32, #tpu.memory_space<smem>>
    memref.store %135, %arg13[%c0_65, %c0_66] : memref<1x1xf32, #tpu.memory_space<smem>>
    return
  }
}

</mosaic_0001>

<bundles_post_ra>
// kernel: vae_forward.1
= control target key start
LH: loop header
LB: loop body
LE: loop exit
PB: predicated region body
PF: predicated region fallthrough
CT: control target
= control target key end

     0   :  { %19 = vsyncpa [#allocation13], 0  ;;  %s4365_s0 = inlined_call_operand.vmem [shape: f32[8,784], index: 0, kind: input, shape index: {}]   ;;  %s4366_s1 = inlined_call_operand.vmem [shape: f32[8,128], index: 1, kind: input, shape index: {}]   ;;  %s4367_s2 = inlined_call_operand.hbm [shape: f32[9,896], index: 2, kind: input, shape index: {}]   ;;  %s4368_s3 = inlined_call_operand.hbm [shape: bf16[784,512], index: 3, kind: input, shape index: {}]   ;;  %s4369_s4 = inlined_call_operand.vmem [shape: bf16[512,256], index: 4, kind: input, shape index: {}]   ;;  %s4370_s5 = inlined_call_operand.vmem [shape: bf16[256,128], index: 5, kind: input, shape index: {}]   ;;  %s4371_s6 = inlined_call_operand.vmem [shape: bf16[128,128], index: 6, kind: input, shape index: {}]   ;;  %s4372_s7 = inlined_call_operand.hbm [shape: bf16[128,128], index: 7, kind: input, shape index: {}]   ;;  %s4373_s8 = inlined_call_operand.hbm [shape: bf16[128,128], index: 8, kind: input, shape index: {}]   ;;  %s4374_s9 = inlined_call_operand.vmem [shape: bf16[128,256], index: 9, kind: input, shape index: {}]   ;;  %s4375_s10 = inlined_call_operand.hbm [shape: bf16[256,512], index: 10, kind: input, shape index: {}]   ;;  %s4376_s11 = inlined_call_operand.hbm [shape: bf16[512,896], index: 11, kind: input, shape index: {}]   ;;  %s4377_s12 = inlined_call_operand.vmem [shape: f32[8,896], index: 12, kind: output, shape index: {0}]   ;;  %s4378_s13 = inlined_call_operand.hbm [shape: f32[1,1], index: 13, kind: output, shape index: {1}]  }
   0x1   :  { %20 = vsyncpa [#allocation14], 0  ;;  %s3441_s25 = smov [#allocation12]   ;;  %s3343_s29 = scalar_lea.hbm %s4367_s2, 1792 }
   0x2   :  { %s30_s26 = sshll.u32 %s3441_s25, 4  ;;  %p3344_p0 = scmp.ne.s32.totalorder %s4367_s2, %s3343_s29  ;;  %s31_s26 = int_to_ptr.vmem [resolvable:$true] %s30_s26 }
   0x3   :  { %p3347_p1 = scmp.lt.u32.totalorder %s3343_s29, %s4367_s2 }
   0x5   :  { %p3349_p2 = pnand %p3347_p1, %p3344_p0 }
   0x7   :  { %3352 = shalt.err (!%p3349_p2)
}
   0x8   :  { %s3353_s17 = scalar_lea.vmem %s31_s26, 1792  ;;  %p3358_p4 = scmp.lt.s32.totalorder %s31_s26, %s31_s26 }
   0x9   :  { %p3354_p3 = scmp.ne.s32.totalorder %s31_s26, %s3353_s17  ;;  %p3359_p5 = scmp.lt.s32.totalorder %s3353_s17, %s3353_s17 }
   0xb   :  { %p3360_p6 = por %p3359_p5, %p3358_p4 }
   0xd   :  { %p3361_p7 = pnand %p3360_p6, %p3354_p3 }
   0xf   :  { %3364 = shalt.err (!%p3361_p7)
}
  0x10   :  { %s4379_s18 = smov 896   ;;  %s3443_s19 = smov 56  }
  0x11   :  { %36 = dma.hbm_to_vmem [thread:$0]  %s4367_s2, 1792, %s31_s26, [#allocation13], %s4379_s18, %s4379_s18, %s3443_s19  }
  0x12   :  { %3419 = dma.done.wait [#allocation13], 1792  }
  0x13   :  { %3420 = vsyncadd [#allocation13], 4294965504  ;;  %s45_s22 = sld [smem:[#allocation0]]   ;;  %s3444_s23 = smov 512  }
  0x14   :  { %57 = sst [smem:[#allocation17]] %s3444_s23  ;;  %s3445_s24 = smov 4  }
  0x15   :  { %59 = sst [smem:[#allocation17 + $0x1]] %s3444_s23  ;;  %s3446_s25 = smov 64  }
  0x16   :  { %61 = sst [smem:[#allocation17 + $0x2]] %s3445_s24  ;;  %s3447_s27 = smov 128  }
  0x17   :  { %63 = sst [smem:[#allocation17 + $0x3]] %s3446_s25  ;;  %s4382_s28 = smov 2  }
  0x18   :  { %65 = sst [smem:[#allocation17 + $0x4]] %s3447_s27  ;;  %s4381_s26 = smov 256  }
  0x19   :  { %67 = sst [smem:[#allocation17 + $0x5]] %s4382_s28  ;;  %s3057_s2 = sshll.u32 %s45_s22, 26 }
  0x1a   :  { %69 = sst [smem:[#allocation17 + $0x6]] %s4381_s26  ;;  %s3558_s29 = sadd.s32 134217728, %s3057_s2 }
  0x1b   :  { %71 = sst [smem:[#allocation17 + $0x7]] %s3446_s25  ;;  %s3450_s30 = smov [#allocation2]  }
  0x1c   :  { %73 = sst [smem:[#allocation17 + $0x8]] %s3445_s24  ;;  %s53_s14 = sshll.u32 %s3450_s30, 4  ;;  %s54_s14 = int_to_ptr.vmem [resolvable:$true] %s53_s14 }
  0x1d   :  { %s3451_s15 = smov [#allocation11]   ;;  %s3452_s16 = smov [#allocation16]  }
  0x1e   :  { %75 = dma.general %s4368_s3, 25088, %s54_s14, %s3451_s15, %s3452_s16, [#allocation17], %s3558_s29, 0  }
  0x1f   :  { %v94_v0 = vld [vmem:[%s4369_s4] sm:$0xf]  ;;  %v96_v1 = vld [vmem:[%s4369_s4 + $0x8] sm:$0xf]  ;;  %v98_v2 = vld [vmem:[%s4369_s4 + $0x4] sm:$0xf] }
  0x20   :  { %95 = vst [vmem:[#allocation3] sm:$0xf] %v94_v0  ;;  %97 = vst [vmem:[#allocation3 + $0x4] sm:$0xf] %v96_v1  ;;  %v100_v3 = vld [vmem:[%s4369_s4 + $0xc] sm:$0xff]   ;;  %v108_v6 = vld [vmem:[%s4369_s4 + $0x1c] sm:$0xff]  }
  0x21   :  { %99 = vst [vmem:[#allocation3 + $0x8] sm:$0xf] %v98_v2  ;;  %v104_v4 = vld [vmem:[%s4369_s4 + $0x18] sm:$0xf]  ;;  %v106_v5 = vld [vmem:[%s4369_s4 + $0x14] sm:$0xf] }
  0x22   :  { %101 = vst [vmem:[#allocation3 + $0xc] sm:$0xff] %v100_v3   ;;  %105 = vst [vmem:[#allocation3 + $0x14] sm:$0xf] %v104_v4  ;;  %v112_v7 = vld [vmem:[%s4369_s4 + $0x28] sm:$0xf]  ;;  %v116_v9 = vld [vmem:[%s4369_s4 + $0x2c] sm:$0xff]  }
  0x23   :  { %107 = vst [vmem:[#allocation3 + $0x18] sm:$0xf] %v106_v5  ;;  %v114_v8 = vld [vmem:[%s4369_s4 + $0x24] sm:$0xf]  ;;  %109 = vst [vmem:[#allocation3 + $0x1c] sm:$0xff] %v108_v6   ;;  %v124_v12 = vld [vmem:[%s4369_s4 + $0x3c] sm:$0xff]  }
  0x24   :  { %113 = vst [vmem:[#allocation3 + $0x24] sm:$0xf] %v112_v7  ;;  %115 = vst [vmem:[#allocation3 + $0x28] sm:$0xf] %v114_v8  ;;  %v120_v10 = vld [vmem:[%s4369_s4 + $0x38] sm:$0xf] }
  0x25   :  { %v122_v11 = vld [vmem:[%s4369_s4 + $0x34] sm:$0xf]  ;;  %117 = vst [vmem:[#allocation3 + $0x2c] sm:$0xff] %v116_v9   ;;  %121 = vst [vmem:[#allocation3 + $0x34] sm:$0xf] %v120_v10  ;;  %v132_v15 = vld [vmem:[%s4369_s4 + $0x4c] sm:$0xff]  }
  0x26   :  { %123 = vst [vmem:[#allocation3 + $0x38] sm:$0xf] %v122_v11  ;;  %v128_v13 = vld [vmem:[%s4369_s4 + $0x48] sm:$0xf]  ;;  %v130_v14 = vld [vmem:[%s4369_s4 + $0x44] sm:$0xf] }
  0x27   :  { %125 = vst [vmem:[#allocation3 + $0x3c] sm:$0xff] %v124_v12   ;;  %129 = vst [vmem:[#allocation3 + $0x44] sm:$0xf] %v128_v13  ;;  %v136_v16 = vld [vmem:[%s4369_s4 + $0x58] sm:$0xf]  ;;  %v140_v18 = vld [vmem:[%s4369_s4 + $0x5c] sm:$0xff]  }
  0x28   :  { %131 = vst [vmem:[#allocation3 + $0x48] sm:$0xf] %v130_v14  ;;  %v138_v17 = vld [vmem:[%s4369_s4 + $0x54] sm:$0xf]  ;;  %133 = vst [vmem:[#allocation3 + $0x4c] sm:$0xff] %v132_v15   ;;  %v148_v21 = vld [vmem:[%s4369_s4 + $0x6c] sm:$0xff]  }
  0x29   :  { %137 = vst [vmem:[#allocation3 + $0x54] sm:$0xf] %v136_v16  ;;  %139 = vst [vmem:[#allocation3 + $0x58] sm:$0xf] %v138_v17  ;;  %v144_v19 = vld [vmem:[%s4369_s4 + $0x68] sm:$0xf] }
  0x2a   :  { %v146_v20 = vld [vmem:[%s4369_s4 + $0x64] sm:$0xf]  ;;  %141 = vst [vmem:[#allocation3 + $0x5c] sm:$0xff] %v140_v18   ;;  %145 = vst [vmem:[#allocation3 + $0x64] sm:$0xf] %v144_v19  ;;  %v156_v24 = vld [vmem:[%s4369_s4 + $0x7c] sm:$0xff]  }
  0x2b   :  { %147 = vst [vmem:[#allocation3 + $0x68] sm:$0xf] %v146_v20  ;;  %v152_v22 = vld [vmem:[%s4369_s4 + $0x78] sm:$0xf]  ;;  %v154_v23 = vld [vmem:[%s4369_s4 + $0x74] sm:$0xf] }
  0x2c   :  { %149 = vst [vmem:[#allocation3 + $0x6c] sm:$0xff] %v148_v21   ;;  %153 = vst [vmem:[#allocation3 + $0x74] sm:$0xf] %v152_v22  ;;  %v160_v25 = vld [vmem:[%s4369_s4 + $0x88] sm:$0xf]  ;;  %v164_v27 = vld [vmem:[%s4369_s4 + $0x8c] sm:$0xff]  }
  0x2d   :  { %155 = vst [vmem:[#allocation3 + $0x78] sm:$0xf] %v154_v23  ;;  %v162_v26 = vld [vmem:[%s4369_s4 + $0x84] sm:$0xf]  ;;  %157 = vst [vmem:[#allocation3 + $0x7c] sm:$0xff] %v156_v24   ;;  %v172_v30 = vld [vmem:[%s4369_s4 + $0x9c] sm:$0xff]  }
  0x2e   :  { %161 = vst [vmem:[#allocation3 + $0x84] sm:$0xf] %v160_v25  ;;  %163 = vst [vmem:[#allocation3 + $0x88] sm:$0xf] %v162_v26  ;;  %v168_v28 = vld [vmem:[%s4369_s4 + $0x98] sm:$0xf] }
  0x2f   :  { %v170_v29 = vld [vmem:[%s4369_s4 + $0x94] sm:$0xf]  ;;  %165 = vst [vmem:[#allocation3 + $0x8c] sm:$0xff] %v164_v27   ;;  %169 = vst [vmem:[#allocation3 + $0x94] sm:$0xf] %v168_v28  ;;  %v180_v33 = vld [vmem:[%s4369_s4 + $0xac] sm:$0xff]  }
  0x30   :  { %171 = vst [vmem:[#allocation3 + $0x98] sm:$0xf] %v170_v29  ;;  %v176_v31 = vld [vmem:[%s4369_s4 + $0xa8] sm:$0xf]  ;;  %v178_v32 = vld [vmem:[%s4369_s4 + $0xa4] sm:$0xf] }
  0x31   :  { %173 = vst [vmem:[#allocation3 + $0x9c] sm:$0xff] %v172_v30   ;;  %177 = vst [vmem:[#allocation3 + $0xa4] sm:$0xf] %v176_v31  ;;  %v184_v34 = vld [vmem:[%s4369_s4 + $0xb8] sm:$0xf]  ;;  %v188_v36 = vld [vmem:[%s4369_s4 + $0xbc] sm:$0xff]  }
  0x32   :  { %179 = vst [vmem:[#allocation3 + $0xa8] sm:$0xf] %v178_v32  ;;  %v186_v35 = vld [vmem:[%s4369_s4 + $0xb4] sm:$0xf]  ;;  %181 = vst [vmem:[#allocation3 + $0xac] sm:$0xff] %v180_v33   ;;  %v196_v39 = vld [vmem:[%s4369_s4 + $0xcc] sm:$0xff]  }
  0x33   :  { %185 = vst [vmem:[#allocation3 + $0xb4] sm:$0xf] %v184_v34  ;;  %187 = vst [vmem:[#allocation3 + $0xb8] sm:$0xf] %v186_v35  ;;  %v192_v37 = vld [vmem:[%s4369_s4 + $0xc8] sm:$0xf] }
  0x34   :  { %v194_v38 = vld [vmem:[%s4369_s4 + $0xc4] sm:$0xf]  ;;  %189 = vst [vmem:[#allocation3 + $0xbc] sm:$0xff] %v188_v36   ;;  %193 = vst [vmem:[#allocation3 + $0xc4] sm:$0xf] %v192_v37  ;;  %v204_v42 = vld [vmem:[%s4369_s4 + $0xdc] sm:$0xff]  }
  0x35   :  { %195 = vst [vmem:[#allocation3 + $0xc8] sm:$0xf] %v194_v38  ;;  %v200_v40 = vld [vmem:[%s4369_s4 + $0xd8] sm:$0xf]  ;;  %v202_v41 = vld [vmem:[%s4369_s4 + $0xd4] sm:$0xf] }
  0x36   :  { %197 = vst [vmem:[#allocation3 + $0xcc] sm:$0xff] %v196_v39   ;;  %201 = vst [vmem:[#allocation3 + $0xd4] sm:$0xf] %v200_v40  ;;  %v208_v43 = vld [vmem:[%s4369_s4 + $0xe8] sm:$0xf]  ;;  %v212_v45 = vld [vmem:[%s4369_s4 + $0xec] sm:$0xff]  }
  0x37   :  { %203 = vst [vmem:[#allocation3 + $0xd8] sm:$0xf] %v202_v41  ;;  %v210_v44 = vld [vmem:[%s4369_s4 + $0xe4] sm:$0xf]  ;;  %205 = vst [vmem:[#allocation3 + $0xdc] sm:$0xff] %v204_v42   ;;  %v220_v48 = vld [vmem:[%s4369_s4 + $0xfc] sm:$0xff]  }
  0x38   :  { %209 = vst [vmem:[#allocation3 + $0xe4] sm:$0xf] %v208_v43  ;;  %211 = vst [vmem:[#allocation3 + $0xe8] sm:$0xf] %v210_v44  ;;  %v216_v46 = vld [vmem:[%s4369_s4 + $0xf8] sm:$0xf] }
  0x39   :  { %v218_v47 = vld [vmem:[%s4369_s4 + $0xf4] sm:$0xf]  ;;  %213 = vst [vmem:[#allocation3 + $0xec] sm:$0xff] %v212_v45   ;;  %217 = vst [vmem:[#allocation3 + $0xf4] sm:$0xf] %v216_v46  ;;  %v228_v51 = vld [vmem:[%s4369_s4 + $0x10c] sm:$0xff]  }
  0x3a   :  { %219 = vst [vmem:[#allocation3 + $0xf8] sm:$0xf] %v218_v47  ;;  %v224_v49 = vld [vmem:[%s4369_s4 + $0x108] sm:$0xf]  ;;  %v226_v50 = vld [vmem:[%s4369_s4 + $0x104] sm:$0xf] }
  0x3b   :  { %221 = vst [vmem:[#allocation3 + $0xfc] sm:$0xff] %v220_v48   ;;  %225 = vst [vmem:[#allocation3 + $0x104] sm:$0xf] %v224_v49  ;;  %v232_v52 = vld [vmem:[%s4369_s4 + $0x118] sm:$0xf]  ;;  %v236_v54 = vld [vmem:[%s4369_s4 + $0x11c] sm:$0xff]  }
  0x3c   :  { %227 = vst [vmem:[#allocation3 + $0x108] sm:$0xf] %v226_v50  ;;  %v234_v53 = vld [vmem:[%s4369_s4 + $0x114] sm:$0xf]  ;;  %229 = vst [vmem:[#allocation3 + $0x10c] sm:$0xff] %v228_v51   ;;  %v244_v57 = vld [vmem:[%s4369_s4 + $0x12c] sm:$0xff]  }
  0x3d   :  { %233 = vst [vmem:[#allocation3 + $0x114] sm:$0xf] %v232_v52  ;;  %235 = vst [vmem:[#allocation3 + $0x118] sm:$0xf] %v234_v53  ;;  %v240_v55 = vld [vmem:[%s4369_s4 + $0x128] sm:$0xf] }
  0x3e   :  { %v242_v56 = vld [vmem:[%s4369_s4 + $0x124] sm:$0xf]  ;;  %237 = vst [vmem:[#allocation3 + $0x11c] sm:$0xff] %v236_v54   ;;  %241 = vst [vmem:[#allocation3 + $0x124] sm:$0xf] %v240_v55  ;;  %v252_v60 = vld [vmem:[%s4369_s4 + $0x13c] sm:$0xff]  }
  0x3f   :  { %243 = vst [vmem:[#allocation3 + $0x128] sm:$0xf] %v242_v56  ;;  %v248_v58 = vld [vmem:[%s4369_s4 + $0x138] sm:$0xf]  ;;  %v250_v59 = vld [vmem:[%s4369_s4 + $0x134] sm:$0xf] }
  0x40   :  { %245 = vst [vmem:[#allocation3 + $0x12c] sm:$0xff] %v244_v57   ;;  %249 = vst [vmem:[#allocation3 + $0x134] sm:$0xf] %v248_v58  ;;  %v256_v61 = vld [vmem:[%s4369_s4 + $0x148] sm:$0xf]  ;;  %v260_v63 = vld [vmem:[%s4369_s4 + $0x14c] sm:$0xff]  }
  0x41   :  { %251 = vst [vmem:[#allocation3 + $0x138] sm:$0xf] %v250_v59  ;;  %v258_v62 = vld [vmem:[%s4369_s4 + $0x144] sm:$0xf]  ;;  %253 = vst [vmem:[#allocation3 + $0x13c] sm:$0xff] %v252_v60   ;;  %v268_v2 = vld [vmem:[%s4369_s4 + $0x15c] sm:$0xff]  }
  0x42   :  { %257 = vst [vmem:[#allocation3 + $0x144] sm:$0xf] %v256_v61  ;;  %259 = vst [vmem:[#allocation3 + $0x148] sm:$0xf] %v258_v62  ;;  %v264_v0 = vld [vmem:[%s4369_s4 + $0x158] sm:$0xf] }
  0x43   :  { %v266_v1 = vld [vmem:[%s4369_s4 + $0x154] sm:$0xf]  ;;  %261 = vst [vmem:[#allocation3 + $0x14c] sm:$0xff] %v260_v63   ;;  %265 = vst [vmem:[#allocation3 + $0x154] sm:$0xf] %v264_v0  ;;  %v276_v5 = vld [vmem:[%s4369_s4 + $0x16c] sm:$0xff]  }
  0x44   :  { %267 = vst [vmem:[#allocation3 + $0x158] sm:$0xf] %v266_v1  ;;  %v272_v3 = vld [vmem:[%s4369_s4 + $0x168] sm:$0xf]  ;;  %v274_v4 = vld [vmem:[%s4369_s4 + $0x164] sm:$0xf] }
  0x45   :  { %269 = vst [vmem:[#allocation3 + $0x15c] sm:$0xff] %v268_v2   ;;  %273 = vst [vmem:[#allocation3 + $0x164] sm:$0xf] %v272_v3  ;;  %v280_v6 = vld [vmem:[%s4369_s4 + $0x178] sm:$0xf]  ;;  %v284_v8 = vld [vmem:[%s4369_s4 + $0x17c] sm:$0xff]  }
  0x46   :  { %275 = vst [vmem:[#allocation3 + $0x168] sm:$0xf] %v274_v4  ;;  %v282_v7 = vld [vmem:[%s4369_s4 + $0x174] sm:$0xf]  ;;  %277 = vst [vmem:[#allocation3 + $0x16c] sm:$0xff] %v276_v5   ;;  %v292_v11 = vld [vmem:[%s4369_s4 + $0x18c] sm:$0xff]  }
  0x47   :  { %281 = vst [vmem:[#allocation3 + $0x174] sm:$0xf] %v280_v6  ;;  %283 = vst [vmem:[#allocation3 + $0x178] sm:$0xf] %v282_v7  ;;  %v288_v9 = vld [vmem:[%s4369_s4 + $0x188] sm:$0xf] }
  0x48   :  { %v290_v10 = vld [vmem:[%s4369_s4 + $0x184] sm:$0xf]  ;;  %285 = vst [vmem:[#allocation3 + $0x17c] sm:$0xff] %v284_v8   ;;  %289 = vst [vmem:[#allocation3 + $0x184] sm:$0xf] %v288_v9  ;;  %v300_v14 = vld [vmem:[%s4369_s4 + $0x19c] sm:$0xff]  }
  0x49   :  { %291 = vst [vmem:[#allocation3 + $0x188] sm:$0xf] %v290_v10  ;;  %v296_v12 = vld [vmem:[%s4369_s4 + $0x198] sm:$0xf]  ;;  %v298_v13 = vld [vmem:[%s4369_s4 + $0x194] sm:$0xf] }
  0x4a   :  { %293 = vst [vmem:[#allocation3 + $0x18c] sm:$0xff] %v292_v11   ;;  %297 = vst [vmem:[#allocation3 + $0x194] sm:$0xf] %v296_v12  ;;  %v304_v15 = vld [vmem:[%s4369_s4 + $0x1a8] sm:$0xf]  ;;  %v308_v17 = vld [vmem:[%s4369_s4 + $0x1ac] sm:$0xff]  }
  0x4b   :  { %299 = vst [vmem:[#allocation3 + $0x198] sm:$0xf] %v298_v13  ;;  %v306_v16 = vld [vmem:[%s4369_s4 + $0x1a4] sm:$0xf]  ;;  %301 = vst [vmem:[#allocation3 + $0x19c] sm:$0xff] %v300_v14   ;;  %v316_v20 = vld [vmem:[%s4369_s4 + $0x1bc] sm:$0xff]  }
  0x4c   :  { %305 = vst [vmem:[#allocation3 + $0x1a4] sm:$0xf] %v304_v15  ;;  %307 = vst [vmem:[#allocation3 + $0x1a8] sm:$0xf] %v306_v16  ;;  %v312_v18 = vld [vmem:[%s4369_s4 + $0x1b8] sm:$0xf] }
  0x4d   :  { %v314_v19 = vld [vmem:[%s4369_s4 + $0x1b4] sm:$0xf]  ;;  %309 = vst [vmem:[#allocation3 + $0x1ac] sm:$0xff] %v308_v17   ;;  %313 = vst [vmem:[#allocation3 + $0x1b4] sm:$0xf] %v312_v18  ;;  %v324_v23 = vld [vmem:[%s4369_s4 + $0x1cc] sm:$0xff]  }
  0x4e   :  { %315 = vst [vmem:[#allocation3 + $0x1b8] sm:$0xf] %v314_v19  ;;  %v320_v21 = vld [vmem:[%s4369_s4 + $0x1c8] sm:$0xf]  ;;  %v322_v22 = vld [vmem:[%s4369_s4 + $0x1c4] sm:$0xf] }
  0x4f   :  { %317 = vst [vmem:[#allocation3 + $0x1bc] sm:$0xff] %v316_v20   ;;  %321 = vst [vmem:[#allocation3 + $0x1c4] sm:$0xf] %v320_v21  ;;  %v328_v24 = vld [vmem:[%s4369_s4 + $0x1d8] sm:$0xf]  ;;  %v332_v26 = vld [vmem:[%s4369_s4 + $0x1dc] sm:$0xff]  }
  0x50   :  { %323 = vst [vmem:[#allocation3 + $0x1c8] sm:$0xf] %v322_v22  ;;  %v330_v25 = vld [vmem:[%s4369_s4 + $0x1d4] sm:$0xf]  ;;  %325 = vst [vmem:[#allocation3 + $0x1cc] sm:$0xff] %v324_v23   ;;  %v340_v29 = vld [vmem:[%s4369_s4 + $0x1ec] sm:$0xff]  }
  0x51   :  { %329 = vst [vmem:[#allocation3 + $0x1d4] sm:$0xf] %v328_v24  ;;  %331 = vst [vmem:[#allocation3 + $0x1d8] sm:$0xf] %v330_v25  ;;  %v336_v27 = vld [vmem:[%s4369_s4 + $0x1e8] sm:$0xf] }
  0x52   :  { %v338_v28 = vld [vmem:[%s4369_s4 + $0x1e4] sm:$0xf]  ;;  %333 = vst [vmem:[#allocation3 + $0x1dc] sm:$0xff] %v332_v26   ;;  %337 = vst [vmem:[#allocation3 + $0x1e4] sm:$0xf] %v336_v27 }
  0x53   :  { %339 = vst [vmem:[#allocation3 + $0x1e8] sm:$0xf] %v338_v28  ;;  %v344_v30 = vld [vmem:[%s4369_s4 + $0x1f8] sm:$0xf]  ;;  %v346_v31 = vld [vmem:[%s4369_s4 + $0x1f4] sm:$0xf] }
  0x54   :  { %341 = vst [vmem:[#allocation3 + $0x1ec] sm:$0xff] %v340_v29   ;;  %345 = vst [vmem:[#allocation3 + $0x1f4] sm:$0xf] %v344_v30  ;;  %v348_v32 = vld [vmem:[%s4369_s4 + $0x1fc] sm:$0xf] }
  0x55   :  { %347 = vst [vmem:[#allocation3 + $0x1f8] sm:$0xf] %v346_v31  ;;  %349 = vst [vmem:[#allocation3 + $0x1fc] sm:$0xf] %v348_v32 }
  0x56   :  { %636 = vsyncadd [#allocation11 + $0x1], 8192  ;;  %v3860_v33 = vld [vmem:[%s4370_s5] sm:$0xff]  ;;  %v3865_v34 = vld [vmem:[%s4370_s5 + $0x8] sm:$0xff] }
  0x57   :  { %v3870_v35 = vld [vmem:[%s4370_s5 + $0x10] sm:$0xff]  ;;  %v3875_v36 = vld [vmem:[%s4370_s5 + $0x18] sm:$0xff]  ;;  %v3880_v37 = vld [vmem:[%s4370_s5 + $0x20] sm:$0xff] }
  0x58   :  { %v3885_v38 = vld [vmem:[%s4370_s5 + $0x28] sm:$0xff]  ;;  %v3890_v39 = vld [vmem:[%s4370_s5 + $0x30] sm:$0xff]  ;;  %v3895_v40 = vld [vmem:[%s4370_s5 + $0x38] sm:$0xff] }
  0x59   :  { %v3900_v41 = vld [vmem:[%s4370_s5 + $0x40] sm:$0xff]  ;;  %v3905_v42 = vld [vmem:[%s4370_s5 + $0x48] sm:$0xff]  ;;  %v3910_v43 = vld [vmem:[%s4370_s5 + $0x50] sm:$0xff] }
  0x5a   :  { %v3915_v44 = vld [vmem:[%s4370_s5 + $0x58] sm:$0xff]  ;;  %v3920_v45 = vld [vmem:[%s4370_s5 + $0x60] sm:$0xff]  ;;  %v3925_v46 = vld [vmem:[%s4370_s5 + $0x68] sm:$0xff] }
  0x5b   :  { %v3930_v47 = vld [vmem:[%s4370_s5 + $0x70] sm:$0xff]  ;;  %v3935_v48 = vld [vmem:[%s4370_s5 + $0x78] sm:$0xff] }
  0x5c   :  { %709 = vsyncadd [#allocation11 + $0x2], 2048  ;;  %v3940_v49 = vld [vmem:[%s4371_s6] sm:$0xff]  ;;  %v3945_v50 = vld [vmem:[%s4371_s6 + $0x8] sm:$0xff] }
  0x5d   :  { %v3950_v51 = vld [vmem:[%s4371_s6 + $0x10] sm:$0xff]  ;;  %v3955_v52 = vld [vmem:[%s4371_s6 + $0x18] sm:$0xff]  ;;  %v3960_v53 = vld [vmem:[%s4371_s6 + $0x20] sm:$0xff] }
  0x5e   :  { %v3965_v54 = vld [vmem:[%s4371_s6 + $0x28] sm:$0xff]  ;;  %v3970_v55 = vld [vmem:[%s4371_s6 + $0x30] sm:$0xff]  ;;  %v3975_v56 = vld [vmem:[%s4371_s6 + $0x38] sm:$0xff] }
  0x5f   :  { %766 = vsyncadd [#allocation11 + $0x3], 1024  ;;  %v809_v57 = vld [vmem:[%s4374_s9] sm:$0xf]  ;;  %s3453_s28 = smov [#allocation6]   ;;  %s3454_s21 = smov [#allocation7]  }
  0x60   :  { %s775_s20 = sshll.u32 %s3453_s28, 4  ;;  %s787_s22 = sshll.u32 %s3454_s21, 4  ;;  %810 = vst [vmem:[#allocation8] sm:$0xf] %v809_v57  ;;  %v811_v58 = vld [vmem:[%s4374_s9 + $0x8] sm:$0xf]  ;;  %s776_s20 = int_to_ptr.vmem [resolvable:$true] %s775_s20  ;;  %s3986_s22 = int_to_ptr.vmem [resolvable:$true] %s787_s22 }
  0x61   :  { %v813_v59 = vld [vmem:[%s4374_s9 + $0x4] sm:$0xf]  ;;  %812 = vst [vmem:[#allocation8 + $0x4] sm:$0xf] %v811_v58  ;;  %v815_v60 = vld [vmem:[%s4374_s9 + $0xc] sm:$0xff]   ;;  %s3365_s19 = scalar_lea.hbm %s4372_s7, 1024 }
  0x62   :  { %814 = vst [vmem:[#allocation8 + $0x8] sm:$0xf] %v813_v59  ;;  %v819_v61 = vld [vmem:[%s4374_s9 + $0x18] sm:$0xf]  ;;  %v821_v62 = vld [vmem:[%s4374_s9 + $0x14] sm:$0xf]  ;;  %p3366_p8 = scmp.ne.s32.totalorder %s4372_s7, %s3365_s19  ;;  %p3369_p9 = scmp.lt.u32.totalorder %s3365_s19, %s4372_s7 }
  0x64   :  { %p3371_p10 = pnand %p3369_p9, %p3366_p8 }
  0x66   :  { %3374 = shalt.err (!%p3371_p10)  }
  0x67   :  { %s3375_s5 = scalar_lea.vmem %s776_s20, 1024  ;;  %p3380_p12 = scmp.lt.s32.totalorder %s776_s20, %s776_s20 }
  0x68   :  { %p3376_p11 = scmp.ne.s32.totalorder %s776_s20, %s3375_s5  ;;  %p3381_p13 = scmp.lt.s32.totalorder %s3375_s5, %s3375_s5 }
  0x6a   :  { %p3382_p0 = por %p3381_p13, %p3380_p12 }
  0x6c   :  { %p3383_p1 = pnand %p3382_p0, %p3376_p11 }
  0x6e   :  { %3386 = shalt.err (!%p3383_p1)  }
  0x6f   :  { %778 = dma.hbm_to_vmem [thread:$0]  %s4372_s7, 1024, %s776_s20, [#allocation11 + $0x4]  ;;  %816 = vst [vmem:[#allocation8 + $0xc] sm:$0xff] %v815_v60   ;;  %820 = vst [vmem:[#allocation8 + $0x14] sm:$0xf] %v819_v61  ;;  %v823_v63 = vld [vmem:[%s4374_s9 + $0x1c] sm:$0xff]  }
  0x70   :  { %822 = vst [vmem:[#allocation8 + $0x18] sm:$0xf] %v821_v62  ;;  %v827_v0 = vld [vmem:[%s4374_s9 + $0x28] sm:$0xf]  ;;  %v831_v1 = vld [vmem:[%s4374_s9 + $0x2c] sm:$0xff]   ;;  %s3387_s28 = scalar_lea.hbm %s4373_s8, 1024 }
  0x71   :  { %p3388_p2 = scmp.ne.s32.totalorder %s4373_s8, %s3387_s28  ;;  %p3391_p3 = scmp.lt.u32.totalorder %s3387_s28, %s4373_s8 }
  0x73   :  { %p3393_p4 = pnand %p3391_p3, %p3388_p2 }
  0x75   :  { %3396 = shalt.err (!%p3393_p4)  }
  0x76   :  { %s3397_s2 = scalar_lea.vmem %s3986_s22, 1024  ;;  %p3402_p6 = scmp.lt.s32.totalorder %s3986_s22, %s3986_s22 }
  0x77   :  { %p3398_p5 = scmp.ne.s32.totalorder %s3986_s22, %s3397_s2  ;;  %p3403_p7 = scmp.lt.s32.totalorder %s3397_s2, %s3397_s2 }
  0x79   :  { %p3404_p8 = por %p3403_p7, %p3402_p6 }
  0x7b   :  { %p3405_p9 = pnand %p3404_p8, %p3398_p5 }
  0x7d   :  { %3408 = shalt.err (!%p3405_p9)  }
  0x7e   :  { %790 = dma.hbm_to_vmem [thread:$0]  %s4373_s8, 1024, %s3986_s22, [#allocation11 + $0x5]  ;;  %824 = vst [vmem:[#allocation8 + $0x1c] sm:$0xff] %v823_v63   ;;  %828 = vst [vmem:[#allocation8 + $0x24] sm:$0xf] %v827_v0  ;;  %v839_v5 = vld [vmem:[%s4374_s9 + $0x3c] sm:$0xff]  }
  0x7f   :  { %v829_v2 = vld [vmem:[%s4374_s9 + $0x24] sm:$0xf]  ;;  %832 = vst [vmem:[#allocation8 + $0x2c] sm:$0xff] %v831_v1   ;;  %v835_v3 = vld [vmem:[%s4374_s9 + $0x38] sm:$0xf]  ;;  %840 = vst [vmem:[#allocation8 + $0x3c] sm:$0xff] %v839_v5  }
  0x80   :  { %830 = vst [vmem:[#allocation8 + $0x28] sm:$0xf] %v829_v2  ;;  %836 = vst [vmem:[#allocation8 + $0x34] sm:$0xf] %v835_v3  ;;  %v837_v4 = vld [vmem:[%s4374_s9 + $0x34] sm:$0xf] }
  0x81   :  { %v843_v6 = vld [vmem:[%s4374_s9 + $0x48] sm:$0xf]  ;;  %838 = vst [vmem:[#allocation8 + $0x38] sm:$0xf] %v837_v4  ;;  %v845_v7 = vld [vmem:[%s4374_s9 + $0x44] sm:$0xf] }
  0x82   :  { %844 = vst [vmem:[#allocation8 + $0x44] sm:$0xf] %v843_v6  ;;  %v847_v8 = vld [vmem:[%s4374_s9 + $0x4c] sm:$0xff]   ;;  %v851_v9 = vld [vmem:[%s4374_s9 + $0x58] sm:$0xf]  ;;  %v855_v11 = vld [vmem:[%s4374_s9 + $0x5c] sm:$0xff]  }
  0x83   :  { %846 = vst [vmem:[#allocation8 + $0x48] sm:$0xf] %v845_v7  ;;  %848 = vst [vmem:[#allocation8 + $0x4c] sm:$0xff] %v847_v8   ;;  %v853_v10 = vld [vmem:[%s4374_s9 + $0x54] sm:$0xf]  ;;  %v863_v14 = vld [vmem:[%s4374_s9 + $0x6c] sm:$0xff]  }
  0x84   :  { %852 = vst [vmem:[#allocation8 + $0x54] sm:$0xf] %v851_v9  ;;  %v859_v12 = vld [vmem:[%s4374_s9 + $0x68] sm:$0xf]  ;;  %854 = vst [vmem:[#allocation8 + $0x58] sm:$0xf] %v853_v10 }
  0x85   :  { %856 = vst [vmem:[#allocation8 + $0x5c] sm:$0xff] %v855_v11   ;;  %860 = vst [vmem:[#allocation8 + $0x64] sm:$0xf] %v859_v12  ;;  %v861_v13 = vld [vmem:[%s4374_s9 + $0x64] sm:$0xf] }
  0x86   :  { %v867_v15 = vld [vmem:[%s4374_s9 + $0x78] sm:$0xf]  ;;  %862 = vst [vmem:[#allocation8 + $0x68] sm:$0xf] %v861_v13  ;;  %864 = vst [vmem:[#allocation8 + $0x6c] sm:$0xff] %v863_v14  }
  0x87   :  { %868 = vst [vmem:[#allocation8 + $0x74] sm:$0xf] %v867_v15  ;;  %v869_v16 = vld [vmem:[%s4374_s9 + $0x74] sm:$0xf]  ;;  %v871_v17 = vld [vmem:[%s4374_s9 + $0x7c] sm:$0xf] }
  0x88   :  { %870 = vst [vmem:[#allocation8 + $0x78] sm:$0xf] %v869_v16  ;;  %872 = vst [vmem:[#allocation8 + $0x7c] sm:$0xf] %v871_v17 }
  0x89   :  { %967 = vsyncadd [#allocation11 + $0x6], 2048  ;;  %984 = sst [smem:[#allocation29]] %s3444_s23  ;;  %s3455_s20 = smov [#allocation9]  }
  0x8a   :  { %s980_s21 = sshll.u32 %s3455_s20, 4  ;;  %986 = sst [smem:[#allocation29 + $0x1]] %s3444_s23  ;;  %s981_s21 = int_to_ptr.vmem [resolvable:$true] %s980_s21 }
  0x8b   :  { %988 = sst [smem:[#allocation29 + $0x2]] %s3445_s24  ;;  %s4384_s4 = smov 2  }
  0x8c   :  { %990 = sst [smem:[#allocation29 + $0x3]] %s3446_s25  ;;  %s4385_s9 = smov 256  }
  0x8d   :  { %992 = sst [smem:[#allocation29 + $0x4]] %s3447_s27  ;;  %s3456_s2 = smov [#allocation11 + $0x7]  }
  0x8e   :  { %994 = sst [smem:[#allocation29 + $0x5]] %s4384_s4  ;;  %s3457_s5 = smov [#allocation28]  }
  0x8f   :  { %996 = sst [smem:[#allocation29 + $0x6]] %s4385_s9  ;;  %s4386_s23 = smov 896  }
  0x90   :  { %998 = sst [smem:[#allocation29 + $0x7]] %s3446_s25  ;;  %s3458_s3 = smov [#allocation10]  }
  0x91   :  { %1000 = sst [smem:[#allocation29 + $0x8]] %s3445_s24  ;;  %s1015_s14 = sshll.u32 %s3458_s3, 4  ;;  %s1016_s14 = int_to_ptr.vmem [resolvable:$true] %s1015_s14 }
  0x92   :  { %1002 = dma.general %s4375_s10, 8192, %s981_s21, %s3456_s2, %s3457_s5, [#allocation29], %s3558_s29, 0  }
  0x93   :  { %1019 = sst [smem:[#allocation31]] %s4386_s23  ;;  %s3459_s15 = smov 7  }
  0x94   :  { %1021 = sst [smem:[#allocation31 + $0x1]] %s4386_s23  ;;  %s3460_s16 = smov 448  }
  0x95   :  { %1023 = sst [smem:[#allocation31 + $0x2]] %s3459_s15  ;;  %s3461_s10 = smov [#allocation11 + $0x8]  }
  0x96   :  { %1025 = sst [smem:[#allocation31 + $0x3]] %s3446_s25  ;;  %s3462_s18 = smov [#allocation30]  }
  0x97   :  { %1027 = sst [smem:[#allocation31 + $0x4]] %s3447_s27 }
  0x98   :  { %1029 = sst [smem:[#allocation31 + $0x5]] %s4384_s4 }
  0x99   :  { %1031 = sst [smem:[#allocation31 + $0x6]] %s3460_s16 }
  0x9a   :  { %1033 = sst [smem:[#allocation31 + $0x7]] %s3446_s25 }
  0x9b   :  { %1035 = sst [smem:[#allocation31 + $0x8]] %s3445_s24 }
  0x9c   :  { %1037 = dma.general %s4376_s11, 28672, %s1016_s14, %s3461_s10, %s3462_s18, [#allocation31], %s3558_s29, 0  }
  0x9d   :  { %v4110_v18 = vld [vmem:[%s4365_s0] sm:$0xff]  ;;  %v1039_v19 = vld [vmem:[%s4365_s0 + $0x8] sm:$0xff]  ;;  %v4118_v20 = vld [vmem:[%s4365_s0 + $0x10] sm:$0xff] }
  0x9e   :  { %v4123_v21 = vld [vmem:[%s4365_s0 + $0x18] sm:$0xff]  ;;  %v4128_v22 = vld [vmem:[%s4365_s0 + $0x20] sm:$0xff]  ;;  %v4133_v23 = vld [vmem:[%s4365_s0 + $0x28] sm:$0xff] }
  0x9f   :  { %v4138_v24 = vld [vmem:[%s4365_s0 + $0x30] sm:$0xff] }
  0xa0   :  { %3421 = dma.done.wait [#allocation11], 25088 }
  0xa1   :  { %3422 = vsyncadd [#allocation11], 4294942208  ;;  %v1050_v25 = vpack.c.bf16 %v1039_v19, %v1039_v19  ;;  %v1057_v26 = vld [vmem:[#allocation2 + $0x8] sm:$0xff]  ;;  %v1059_v27 = vld [vmem:[#allocation2 + $0x18] sm:$0xff]  ;;  %vm1274_vm0 = vcmask 130048  }
  0xa2   :  { %v1056_v28 = vld [vmem:[#allocation2] sm:$0xff]  ;;  %1278 = vmatprep.subr.bf16.mxu0 %v1057_v26  ;;  %1442 = vmatprep.subr.bf16.mxu1 %v1059_v27  ;;  %v1058_v29 = vld [vmem:[#allocation2 + $0x10] sm:$0xff]  ;;  %v1061_v30 = vld [vmem:[#allocation2 + $0x28] sm:$0xff] }
  0xa3   :  { %1310 = vmatprep.mubr.bf16.mxu0 %v1050_v25  ;;  %1474 = vmatprep.mubr.bf16.mxu1 %v1050_v25  ;;  %v1063_v31 = vld [vmem:[#allocation2 + $0x38] sm:$0xff]  ;;  %v1060_v32 = vld [vmem:[#allocation2 + $0x20] sm:$0xff]  ;;  %v1062_v57 = vld [vmem:[#allocation2 + $0x30] sm:$0xff] }
  0xa4   :  { %1279 = vmatpush1.bf16.msra.mxu0 %v1056_v28  ;;  %1443 = vmatpush1.bf16.msra.mxu1 %v1058_v29  ;;  %v1065_v58 = vld [vmem:[#allocation2 + $0x48] sm:$0xff]  ;;  %v1067_v59 = vld [vmem:[#allocation2 + $0x58] sm:$0xff]  ;;  %v1064_v60 = vld [vmem:[#allocation2 + $0x40] sm:$0xff] }
  0xa5   :  { %1280 = vmatprep.subr.bf16.mxu0 %v1061_v30  ;;  %1444 = vmatprep.subr.bf16.mxu1 %v1063_v31  ;;  %v1066_v61 = vld [vmem:[#allocation2 + $0x50] sm:$0xff]  ;;  %v1069_v62 = vld [vmem:[#allocation2 + $0x68] sm:$0xff]  ;;  %v1071_v63 = vld [vmem:[#allocation2 + $0x78] sm:$0xff] }
  0xa6   :  { %v1068_v0 = vld [vmem:[#allocation2 + $0x60] sm:$0xff]  ;;  %v1070_v1 = vld [vmem:[#allocation2 + $0x70] sm:$0xff]  ;;  %v1073_v2 = vld [vmem:[#allocation2 + $0x88] sm:$0xff] }
  0xa7   :  { %v1075_v3 = vld [vmem:[#allocation2 + $0x98] sm:$0xff]  ;;  %v1072_v4 = vld [vmem:[#allocation2 + $0x80] sm:$0xff]  ;;  %v1074_v5 = vld [vmem:[#allocation2 + $0x90] sm:$0xff] }
  0xa8   :  { %1281 = vmatpush1.bf16.msra.mxu0 %v1060_v32  ;;  %1445 = vmatpush1.bf16.msra.mxu1 %v1062_v57  ;;  %v1077_v6 = vld [vmem:[#allocation2 + $0xa8] sm:$0xff]  ;;  %v1079_v7 = vld [vmem:[#allocation2 + $0xb8] sm:$0xff]  ;;  %v1076_v8 = vld [vmem:[#allocation2 + $0xa0] sm:$0xff] }
  0xa9   :  { %1282 = vmatprep.subr.bf16.mxu0 %v1065_v58  ;;  %1446 = vmatprep.subr.bf16.mxu1 %v1067_v59  ;;  %v1078_v9 = vld [vmem:[#allocation2 + $0xb0] sm:$0xff]  ;;  %v1081_v10 = vld [vmem:[#allocation2 + $0xc8] sm:$0xff]  ;;  %v1083_v11 = vld [vmem:[#allocation2 + $0xd8] sm:$0xff] }
  0xaa   :  { %v1080_v12 = vld [vmem:[#allocation2 + $0xc0] sm:$0xff]  ;;  %v1082_v13 = vld [vmem:[#allocation2 + $0xd0] sm:$0xff]  ;;  %v1085_v14 = vld [vmem:[#allocation2 + $0xe8] sm:$0xff] }
  0xab   :  { %v1087_v15 = vld [vmem:[#allocation2 + $0xf8] sm:$0xff]  ;;  %v1084_v16 = vld [vmem:[#allocation2 + $0xe0] sm:$0xff]  ;;  %v1086_v17 = vld [vmem:[#allocation2 + $0xf0] sm:$0xff] }
  0xac   :  { %1283 = vmatpush1.bf16.msra.mxu0 %v1064_v60  ;;  %1447 = vmatpush1.bf16.msra.mxu1 %v1066_v61  ;;  %v1089_v19 = vld [vmem:[#allocation2 + $0x108] sm:$0xff]  ;;  %v1091_v25 = vld [vmem:[#allocation2 + $0x118] sm:$0xff]  ;;  %v1088_v26 = vld [vmem:[#allocation2 + $0x100] sm:$0xff] }
  0xad   :  { %1284 = vmatprep.subr.bf16.mxu0 %v1069_v62  ;;  %1448 = vmatprep.subr.bf16.mxu1 %v1071_v63  ;;  %v1090_v27 = vld [vmem:[#allocation2 + $0x110] sm:$0xff]  ;;  %v1093_v28 = vld [vmem:[#allocation2 + $0x128] sm:$0xff]  ;;  %v1095_v29 = vld [vmem:[#allocation2 + $0x138] sm:$0xff] }
  0xae   :  { %v1092_v30 = vld [vmem:[#allocation2 + $0x120] sm:$0xff]  ;;  %v1094_v31 = vld [vmem:[#allocation2 + $0x130] sm:$0xff]  ;;  %v1097_v32 = vld [vmem:[#allocation2 + $0x148] sm:$0xff] }
  0xaf   :  { %v1099_v57 = vld [vmem:[#allocation2 + $0x158] sm:$0xff]  ;;  %v1096_v58 = vld [vmem:[#allocation2 + $0x140] sm:$0xff]  ;;  %v1098_v59 = vld [vmem:[#allocation2 + $0x150] sm:$0xff] }
  0xb0   :  { %1285 = vmatpush1.bf16.msra.mxu0 %v1068_v0  ;;  %1449 = vmatpush1.bf16.msra.mxu1 %v1070_v1  ;;  %v1101_v60 = vld [vmem:[#allocation2 + $0x168] sm:$0xff]  ;;  %v1103_v61 = vld [vmem:[#allocation2 + $0x178] sm:$0xff]  ;;  %v1100_v62 = vld [vmem:[#allocation2 + $0x160] sm:$0xff] }
  0xb1   :  { %1286 = vmatprep.subr.bf16.mxu0 %v1073_v2  ;;  %1450 = vmatprep.subr.bf16.mxu1 %v1075_v3  ;;  %v1102_v63 = vld [vmem:[#allocation2 + $0x170] sm:$0xff]  ;;  %v1105_v0 = vld [vmem:[#allocation2 + $0x188] sm:$0xff]  ;;  %v1107_v1 = vld [vmem:[#allocation2 + $0x198] sm:$0xff] }
  0xb2   :  { %v1104_v2 = vld [vmem:[#allocation2 + $0x180] sm:$0xff]  ;;  %v1106_v3 = vld [vmem:[#allocation2 + $0x190] sm:$0xff] }
  0xb4   :  { %1287 = vmatpush1.bf16.msra.mxu0 %v1072_v4  ;;  %1451 = vmatpush1.bf16.msra.mxu1 %v1074_v5  ;;  %v1109_v4 = vld [vmem:[#allocation2 + $0x1a8] sm:$0xff]  ;;  %v1111_v5 = vld [vmem:[#allocation2 + $0x1b8] sm:$0xff] }
  0xb5   :  { %1288 = vmatprep.subr.bf16.mxu0 %v1077_v6  ;;  %1452 = vmatprep.subr.bf16.mxu1 %v1079_v7  ;;  %v1108_v6 = vld [vmem:[#allocation2 + $0x1a0] sm:$0xff]  ;;  %v1110_v7 = vld [vmem:[#allocation2 + $0x1b0] sm:$0xff] }
  0xb8   :  { %1289 = vmatpush1.bf16.msra.mxu0 %v1076_v8  ;;  %1453 = vmatpush1.bf16.msra.mxu1 %v1078_v9  ;;  %v1113_v8 = vld [vmem:[#allocation2 + $0x1c8] sm:$0xff]  ;;  %v1115_v9 = vld [vmem:[#allocation2 + $0x1d8] sm:$0xff] }
  0xb9   :  { %1290 = vmatprep.subr.bf16.mxu0 %v1081_v10  ;;  %1454 = vmatprep.subr.bf16.mxu1 %v1083_v11  ;;  %v1112_v10 = vld [vmem:[#allocation2 + $0x1c0] sm:$0xff]  ;;  %v1114_v11 = vld [vmem:[#allocation2 + $0x1d0] sm:$0xff] }
  0xbc   :  { %1291 = vmatpush1.bf16.msra.mxu0 %v1080_v12  ;;  %1455 = vmatpush1.bf16.msra.mxu1 %v1082_v13  ;;  %v1117_v12 = vld [vmem:[#allocation2 + $0x1e8] sm:$0xff]  ;;  %v1119_v13 = vld [vmem:[#allocation2 + $0x1f8] sm:$0xff] }
  0xbd   :  { %1292 = vmatprep.subr.bf16.mxu0 %v1085_v14  ;;  %1456 = vmatprep.subr.bf16.mxu1 %v1087_v15  ;;  %v1116_v14 = vld [vmem:[#allocation2 + $0x1e0] sm:$0xff]  ;;  %v1118_v15 = vld [vmem:[#allocation2 + $0x1f0] sm:$0xff] }
  0xc0   :  { %1293 = vmatpush1.bf16.msra.mxu0 %v1084_v16  ;;  %1457 = vmatpush1.bf16.msra.mxu1 %v1086_v17  ;;  %v1121_v16 = vld [vmem:[#allocation2 + $0x208] sm:$0xff]  ;;  %v1123_v17 = vld [vmem:[#allocation2 + $0x218] sm:$0xff] }
  0xc1   :  { %1294 = vmatprep.subr.bf16.mxu0 %v1089_v19  ;;  %1458 = vmatprep.subr.bf16.mxu1 %v1091_v25  ;;  %v1049_v19 = vpack.c.bf16 %v4110_v18, %v4110_v18  ;;  %v1120_v25 = vld [vmem:[#allocation2 + $0x200] sm:$0xff]  ;;  %v1129_v18 = vld [vmem:[#allocation2 + $0x248] sm:$0xff] }
  0xc4   :  { %1295 = vmatpush1.bf16.msra.mxu0 %v1088_v26  ;;  %1459 = vmatpush1.bf16.msra.mxu1 %v1090_v27  ;;  %v1122_v26 = vld [vmem:[#allocation2 + $0x210] sm:$0xff]  ;;  %v1125_v27 = vld [vmem:[#allocation2 + $0x228] sm:$0xff] }
  0xc5   :  { %1296 = vmatprep.subr.bf16.mxu0 %v1093_v28  ;;  %1460 = vmatprep.subr.bf16.mxu1 %v1095_v29  ;;  %v1127_v28 = vld [vmem:[#allocation2 + $0x238] sm:$0xff]  ;;  %v1052_v29 = vpack.c.bf16 %v4123_v21, %v4123_v21 }
  0xc6   :  { %v1135_v21 = vld [vmem:[#allocation2 + $0x278] sm:$0xff] }
  0xc8   :  { %1297 = vmatpush1.bf16.msra.mxu0 %v1092_v30  ;;  %1461 = vmatpush1.bf16.msra.mxu1 %v1094_v31  ;;  %v1124_v30 = vld [vmem:[#allocation2 + $0x220] sm:$0xff]  ;;  %v1126_v31 = vld [vmem:[#allocation2 + $0x230] sm:$0xff] }
  0xc9   :  { %1298 = vmatprep.subr.bf16.mxu0 %v1097_v32  ;;  %1462 = vmatprep.subr.bf16.mxu1 %v1099_v57  ;;  %v1131_v32 = vld [vmem:[#allocation2 + $0x258] sm:$0xff]  ;;  %v1128_v57 = vld [vmem:[#allocation2 + $0x240] sm:$0xff] }
  0xcc   :  { %1299 = vmatpush1.bf16.msra.mxu0 %v1096_v58  ;;  %1463 = vmatpush1.bf16.msra.mxu1 %v1098_v59  ;;  %v1130_v58 = vld [vmem:[#allocation2 + $0x250] sm:$0xff]  ;;  %v1133_v59 = vld [vmem:[#allocation2 + $0x268] sm:$0xff] }
  0xcd   :  { %1300 = vmatprep.subr.bf16.mxu0 %v1101_v60  ;;  %1464 = vmatprep.subr.bf16.mxu1 %v1103_v61  ;;  %v1132_v60 = vld [vmem:[#allocation2 + $0x260] sm:$0xff]  ;;  %v1134_v61 = vld [vmem:[#allocation2 + $0x270] sm:$0xff] }
  0xd0   :  { %1301 = vmatpush1.bf16.msra.mxu0 %v1100_v62  ;;  %1465 = vmatpush1.bf16.msra.mxu1 %v1102_v63  ;;  %v1137_v62 = vld [vmem:[#allocation2 + $0x288] sm:$0xff]  ;;  %v1139_v63 = vld [vmem:[#allocation2 + $0x298] sm:$0xff] }
  0xd1   :  { %1302 = vmatprep.subr.bf16.mxu0 %v1105_v0  ;;  %1466 = vmatprep.subr.bf16.mxu1 %v1107_v1  ;;  %v1136_v0 = vld [vmem:[#allocation2 + $0x280] sm:$0xff]  ;;  %v1138_v1 = vld [vmem:[#allocation2 + $0x290] sm:$0xff] }
  0xd4   :  { %1303 = vmatpush1.bf16.msra.mxu0 %v1104_v2  ;;  %1467 = vmatpush1.bf16.msra.mxu1 %v1106_v3  ;;  %v1141_v2 = vld [vmem:[#allocation2 + $0x2a8] sm:$0xff]  ;;  %v1143_v3 = vld [vmem:[#allocation2 + $0x2b8] sm:$0xff] }
  0xd5   :  { %1304 = vmatprep.subr.bf16.mxu0 %v1109_v4  ;;  %1468 = vmatprep.subr.bf16.mxu1 %v1111_v5  ;;  %v1140_v4 = vld [vmem:[#allocation2 + $0x2a0] sm:$0xff]  ;;  %v1142_v5 = vld [vmem:[#allocation2 + $0x2b0] sm:$0xff] }
  0xd8   :  { %1305 = vmatpush1.bf16.msra.mxu0 %v1108_v6  ;;  %1469 = vmatpush1.bf16.msra.mxu1 %v1110_v7  ;;  %v1145_v6 = vld [vmem:[#allocation2 + $0x2c8] sm:$0xff]  ;;  %v1147_v7 = vld [vmem:[#allocation2 + $0x2d8] sm:$0xff] }
  0xd9   :  { %1306 = vmatprep.subr.bf16.mxu0 %v1113_v8  ;;  %1470 = vmatprep.subr.bf16.mxu1 %v1115_v9  ;;  %v1144_v8 = vld [vmem:[#allocation2 + $0x2c0] sm:$0xff]  ;;  %v1146_v9 = vld [vmem:[#allocation2 + $0x2d0] sm:$0xff] }
  0xdc   :  { %1307 = vmatpush1.bf16.msra.mxu0 %v1112_v10  ;;  %1471 = vmatpush1.bf16.msra.mxu1 %v1114_v11  ;;  %v1149_v10 = vld [vmem:[#allocation2 + $0x2e8] sm:$0xff]  ;;  %v1151_v11 = vld [vmem:[#allocation2 + $0x2f8] sm:$0xff] }
  0xdd   :  { %1308 = vmatprep.subr.bf16.mxu0 %v1117_v12  ;;  %1472 = vmatprep.subr.bf16.mxu1 %v1119_v13  ;;  %v1148_v12 = vld [vmem:[#allocation2 + $0x2e0] sm:$0xff]  ;;  %v1150_v13 = vld [vmem:[#allocation2 + $0x2f0] sm:$0xff] }
  0xe0   :  { %1309 = vmatpush1.bf16.msra.mxu0 %v1116_v14  ;;  %1473 = vmatpush1.bf16.msra.mxu1 %v1118_v15  ;;  %v1153_v14 = vld [vmem:[#allocation2 + $0x308] sm:$0xff]  ;;  %v1155_v15 = vld [vmem:[#allocation2 + $0x318] sm:$0xff] }
  0xe1   :  { %1319 = vmatprep.subr.bf16.mxu0 %v1121_v16  ;;  %1483 = vmatprep.subr.bf16.mxu1 %v1123_v17  ;;  %v1152_v16 = vld [vmem:[#allocation2 + $0x300] sm:$0xff]  ;;  %v1154_v17 = vld [vmem:[#allocation2 + $0x310] sm:$0xff] }
  0xe3   :  { %1311 = vmatmul.mubr.bf16.vlgmr.msra.gmra.mrb[0].mxu0 %v1049_v19  ;;  %1475 = vmatmul.mubr.bf16.vlgmr.msra.gmra.mrb[0].mxu1 %v1049_v19  ;;  %v1157_v19 = vld [vmem:[#allocation2 + $0x328] sm:$0xff] }
  0xe4   :  { %1320 = vmatpush1.bf16.msra.mxu0 %v1120_v25  ;;  %1484 = vmatpush1.bf16.msra.mxu1 %v1122_v26  ;;  %v1159_v25 = vld [vmem:[#allocation2 + $0x338] sm:$0xff]  ;;  %v1156_v26 = vld [vmem:[#allocation2 + $0x320] sm:$0xff] }
  0xe5   :  { %1321 = vmatprep.subr.bf16.mxu0 %v1125_v27  ;;  %1485 = vmatprep.subr.bf16.mxu1 %v1127_v28  ;;  %v1158_v27 = vld [vmem:[#allocation2 + $0x330] sm:$0xff]  ;;  %v1161_v28 = vld [vmem:[#allocation2 + $0x348] sm:$0xff] }
  0xe6   :  { %1351 = vmatprep.mubr.bf16.mxu0 %v1052_v29  ;;  %1515 = vmatprep.mubr.bf16.mxu1 %v1052_v29  ;;  %v1163_v29 = vld [vmem:[#allocation2 + $0x358] sm:$0xff] }
  0xe8   :  { %1322 = vmatpush1.bf16.msra.mxu0 %v1124_v30  ;;  %1486 = vmatpush1.bf16.msra.mxu1 %v1126_v31  ;;  %v1160_v30 = vld [vmem:[#allocation2 + $0x340] sm:$0xff]  ;;  %v1162_v31 = vld [vmem:[#allocation2 + $0x350] sm:$0xff] }
  0xe9   :  { %1323 = vmatprep.subr.bf16.mxu0 %v1129_v18  ;;  %1487 = vmatprep.subr.bf16.mxu1 %v1131_v32  ;;  %v1165_v18 = vld [vmem:[#allocation2 + $0x368] sm:$0xff]  ;;  %v1167_v32 = vld [vmem:[#allocation2 + $0x378] sm:$0xff] }
  0xec   :  { %1324 = vmatpush1.bf16.msra.mxu0 %v1128_v57  ;;  %1488 = vmatpush1.bf16.msra.mxu1 %v1130_v58  ;;  %v1164_v57 = vld [vmem:[#allocation2 + $0x360] sm:$0xff]  ;;  %v1166_v58 = vld [vmem:[#allocation2 + $0x370] sm:$0xff] }
  0xed   :  { %1325 = vmatprep.subr.bf16.mxu0 %v1133_v59  ;;  %1489 = vmatprep.subr.bf16.mxu1 %v1135_v21  ;;  %v1169_v59 = vld [vmem:[#allocation2 + $0x388] sm:$0xff]  ;;  %v1171_v21 = vld [vmem:[#allocation2 + $0x398] sm:$0xff] }
  0xf0   :  { %1326 = vmatpush1.bf16.msra.mxu0 %v1132_v60  ;;  %1490 = vmatpush1.bf16.msra.mxu1 %v1134_v61  ;;  %v1168_v60 = vld [vmem:[#allocation2 + $0x380] sm:$0xff]  ;;  %v1170_v61 = vld [vmem:[#allocation2 + $0x390] sm:$0xff] }
  0xf1   :  { %1327 = vmatprep.subr.bf16.mxu0 %v1137_v62  ;;  %1491 = vmatprep.subr.bf16.mxu1 %v1139_v63  ;;  %v1173_v62 = vld [vmem:[#allocation2 + $0x3a8] sm:$0xff]  ;;  %v1175_v63 = vld [vmem:[#allocation2 + $0x3b8] sm:$0xff] }
  0xf4   :  { %1328 = vmatpush1.bf16.msra.mxu0 %v1136_v0  ;;  %1492 = vmatpush1.bf16.msra.mxu1 %v1138_v1  ;;  %v1172_v0 = vld [vmem:[#allocation2 + $0x3a0] sm:$0xff]  ;;  %v1174_v1 = vld [vmem:[#allocation2 + $0x3b0] sm:$0xff] }
  0xf5   :  { %1329 = vmatprep.subr.bf16.mxu0 %v1141_v2  ;;  %1493 = vmatprep.subr.bf16.mxu1 %v1143_v3  ;;  %v1177_v2 = vld [vmem:[#allocation2 + $0x3c8] sm:$0xff]  ;;  %v1179_v3 = vld [vmem:[#allocation2 + $0x3d8] sm:$0xff] }
  0xf8   :  { %1330 = vmatpush1.bf16.msra.mxu0 %v1140_v4  ;;  %1494 = vmatpush1.bf16.msra.mxu1 %v1142_v5  ;;  %v1176_v4 = vld [vmem:[#allocation2 + $0x3c0] sm:$0xff]  ;;  %v1178_v5 = vld [vmem:[#allocation2 + $0x3d0] sm:$0xff] }
  0xf9   :  { %1331 = vmatprep.subr.bf16.mxu0 %v1145_v6  ;;  %1495 = vmatprep.subr.bf16.mxu1 %v1147_v7  ;;  %v1181_v6 = vld [vmem:[#allocation2 + $0x3e8] sm:$0xff]  ;;  %v1183_v7 = vld [vmem:[#allocation2 + $0x3f8] sm:$0xff] }
  0xfc   :  { %1332 = vmatpush1.bf16.msra.mxu0 %v1144_v8  ;;  %1496 = vmatpush1.bf16.msra.mxu1 %v1146_v9  ;;  %v1180_v8 = vld [vmem:[#allocation2 + $0x3e0] sm:$0xff]  ;;  %v1182_v9 = vld [vmem:[#allocation2 + $0x3f0] sm:$0xff] }
  0xfd   :  { %1333 = vmatprep.subr.bf16.mxu0 %v1149_v10  ;;  %1497 = vmatprep.subr.bf16.mxu1 %v1151_v11  ;;  %v1185_v10 = vld [vmem:[#allocation2 + $0x408] sm:$0xff]  ;;  %v1187_v11 = vld [vmem:[#allocation2 + $0x418] sm:$0xff] }
 0x100   :  { %1334 = vmatpush1.bf16.msra.mxu0 %v1148_v12  ;;  %1498 = vmatpush1.bf16.msra.mxu1 %v1150_v13  ;;  %v1051_v12 = vpack.c.bf16 %v4118_v20, %v4118_v20  ;;  %v1184_v13 = vld [vmem:[#allocation2 + $0x400] sm:$0xff]  ;;  %v1193_v20 = vld [vmem:[#allocation2 + $0x448] sm:$0xff] }
 0x101   :  { %1335 = vmatprep.subr.bf16.mxu0 %v1153_v14  ;;  %1499 = vmatprep.subr.bf16.mxu1 %v1155_v15  ;;  %v1186_v14 = vld [vmem:[#allocation2 + $0x410] sm:$0xff]  ;;  %v1189_v15 = vld [vmem:[#allocation2 + $0x428] sm:$0xff] }
 0x104   :  { %1336 = vmatpush1.bf16.msra.mxu0 %v1152_v16  ;;  %1500 = vmatpush1.bf16.msra.mxu1 %v1154_v17  ;;  %v1191_v16 = vld [vmem:[#allocation2 + $0x438] sm:$0xff]  ;;  %v1054_v17 = vpack.c.bf16 %v4133_v23, %v4133_v23 }
 0x105   :  { %1337 = vmatprep.subr.bf16.mxu0 %v1157_v19  ;;  %1501 = vmatprep.subr.bf16.mxu1 %v1159_v25  ;;  %v1188_v19 = vld [vmem:[#allocation2 + $0x420] sm:$0xff]  ;;  %v1190_v25 = vld [vmem:[#allocation2 + $0x430] sm:$0xff]  ;;  %v1199_v23 = vld [vmem:[#allocation2 + $0x478] sm:$0xff] }
 0x108   :  { %1338 = vmatpush1.bf16.msra.mxu0 %v1156_v26  ;;  %1502 = vmatpush1.bf16.msra.mxu1 %v1158_v27  ;;  %v1195_v26 = vld [vmem:[#allocation2 + $0x458] sm:$0xff]  ;;  %v1192_v27 = vld [vmem:[#allocation2 + $0x440] sm:$0xff] }
 0x109   :  { %1339 = vmatprep.subr.bf16.mxu0 %v1161_v28  ;;  %1503 = vmatprep.subr.bf16.mxu1 %v1163_v29  ;;  %v1194_v28 = vld [vmem:[#allocation2 + $0x450] sm:$0xff]  ;;  %v1197_v29 = vld [vmem:[#allocation2 + $0x468] sm:$0xff] }
 0x10c   :  { %1340 = vmatpush1.bf16.msra.mxu0 %v1160_v30  ;;  %1504 = vmatpush1.bf16.msra.mxu1 %v1162_v31  ;;  %v1196_v30 = vld [vmem:[#allocation2 + $0x460] sm:$0xff]  ;;  %v1198_v31 = vld [vmem:[#allocation2 + $0x470] sm:$0xff] }
 0x10d   :  { %1341 = vmatprep.subr.bf16.mxu0 %v1165_v18  ;;  %1505 = vmatprep.subr.bf16.mxu1 %v1167_v32  ;;  %v1201_v18 = vld [vmem:[#allocation2 + $0x488] sm:$0xff]  ;;  %v1203_v32 = vld [vmem:[#allocation2 + $0x498] sm:$0xff] }
 0x110   :  { %1342 = vmatpush1.bf16.msra.mxu0 %v1164_v57  ;;  %1506 = vmatpush1.bf16.msra.mxu1 %v1166_v58  ;;  %v1200_v57 = vld [vmem:[#allocation2 + $0x480] sm:$0xff]  ;;  %v1202_v58 = vld [vmem:[#allocation2 + $0x490] sm:$0xff] }
 0x111   :  { %1343 = vmatprep.subr.bf16.mxu0 %v1169_v59  ;;  %1507 = vmatprep.subr.bf16.mxu1 %v1171_v21  ;;  %v1205_v59 = vld [vmem:[#allocation2 + $0x4a8] sm:$0xff]  ;;  %v1207_v21 = vld [vmem:[#allocation2 + $0x4b8] sm:$0xff] }
 0x114   :  { %1344 = vmatpush1.bf16.msra.mxu0 %v1168_v60  ;;  %1508 = vmatpush1.bf16.msra.mxu1 %v1170_v61  ;;  %v1204_v60 = vld [vmem:[#allocation2 + $0x4a0] sm:$0xff]  ;;  %v1206_v61 = vld [vmem:[#allocation2 + $0x4b0] sm:$0xff] }
 0x115   :  { %1345 = vmatprep.subr.bf16.mxu0 %v1173_v62  ;;  %1509 = vmatprep.subr.bf16.mxu1 %v1175_v63  ;;  %v1209_v62 = vld [vmem:[#allocation2 + $0x4c8] sm:$0xff]  ;;  %v1211_v63 = vld [vmem:[#allocation2 + $0x4d8] sm:$0xff] }
 0x118   :  { %1346 = vmatpush1.bf16.msra.mxu0 %v1172_v0  ;;  %1510 = vmatpush1.bf16.msra.mxu1 %v1174_v1  ;;  %v1208_v0 = vld [vmem:[#allocation2 + $0x4c0] sm:$0xff]  ;;  %v1210_v1 = vld [vmem:[#allocation2 + $0x4d0] sm:$0xff] }
 0x119   :  { %1347 = vmatprep.subr.bf16.mxu0 %v1177_v2  ;;  %1511 = vmatprep.subr.bf16.mxu1 %v1179_v3  ;;  %v1213_v2 = vld [vmem:[#allocation2 + $0x4e8] sm:$0xff]  ;;  %v1215_v3 = vld [vmem:[#allocation2 + $0x4f8] sm:$0xff] }
 0x11c   :  { %1348 = vmatpush1.bf16.msra.mxu0 %v1176_v4  ;;  %1512 = vmatpush1.bf16.msra.mxu1 %v1178_v5  ;;  %v1212_v4 = vld [vmem:[#allocation2 + $0x4e0] sm:$0xff]  ;;  %v1214_v5 = vld [vmem:[#allocation2 + $0x4f0] sm:$0xff] }
 0x11d   :  { %1349 = vmatprep.subr.bf16.mxu0 %v1181_v6  ;;  %1513 = vmatprep.subr.bf16.mxu1 %v1183_v7  ;;  %v1217_v6 = vld [vmem:[#allocation2 + $0x508] sm:$0xff]  ;;  %v1219_v7 = vld [vmem:[#allocation2 + $0x518] sm:$0xff] }
 0x120   :  { %1350 = vmatpush1.bf16.msra.mxu0 %v1180_v8  ;;  %1514 = vmatpush1.bf16.msra.mxu1 %v1182_v9  ;;  %v1216_v8 = vld [vmem:[#allocation2 + $0x500] sm:$0xff]  ;;  %v1218_v9 = vld [vmem:[#allocation2 + $0x510] sm:$0xff] }
 0x121   :  { %1360 = vmatprep.subr.bf16.mxu0 %v1185_v10  ;;  %1524 = vmatprep.subr.bf16.mxu1 %v1187_v11  ;;  %v1221_v10 = vld [vmem:[#allocation2 + $0x528] sm:$0xff]  ;;  %v1223_v11 = vld [vmem:[#allocation2 + $0x538] sm:$0xff] }
 0x123   :  { %1352 = vmatmul.mubr.bf16.vlgmr.msra.gmra.mrb[0].mxu0 %v1051_v12  ;;  %1516 = vmatmul.mubr.bf16.vlgmr.msra.gmra.mrb[0].mxu1 %v1051_v12  ;;  %v1220_v12 = vld [vmem:[#allocation2 + $0x520] sm:$0xff] }
 0x124   :  { %1361 = vmatpush1.bf16.msra.mxu0 %v1184_v13  ;;  %1525 = vmatpush1.bf16.msra.mxu1 %v1186_v14  ;;  %v1222_v13 = vld [vmem:[#allocation2 + $0x530] sm:$0xff]  ;;  %v1225_v14 = vld [vmem:[#allocation2 + $0x548] sm:$0xff] }
 0x125   :  { %1362 = vmatprep.subr.bf16.mxu0 %v1189_v15  ;;  %1526 = vmatprep.subr.bf16.mxu1 %v1191_v16  ;;  %v1227_v15 = vld [vmem:[#allocation2 + $0x558] sm:$0xff]  ;;  %v1224_v16 = vld [vmem:[#allocation2 + $0x540] sm:$0xff] }
 0x126   :  { %1392 = vmatprep.mubr.bf16.mxu0 %v1054_v17  ;;  %1556 = vmatprep.mubr.bf16.mxu1 %v1054_v17  ;;  %v1226_v17 = vld [vmem:[#allocation2 + $0x550] sm:$0xff] }
 0x128   :  { %1363 = vmatpush1.bf16.msra.mxu0 %v1188_v19  ;;  %1527 = vmatpush1.bf16.msra.mxu1 %v1190_v25  ;;  %v1229_v19 = vld [vmem:[#allocation2 + $0x568] sm:$0xff]  ;;  %v1231_v25 = vld [vmem:[#allocation2 + $0x578] sm:$0xff] }
 0x129   :  { %1364 = vmatprep.subr.bf16.mxu0 %v1193_v20  ;;  %1528 = vmatprep.subr.bf16.mxu1 %v1195_v26  ;;  %v1228_v20 = vld [vmem:[#allocation2 + $0x560] sm:$0xff]  ;;  %v1230_v26 = vld [vmem:[#allocation2 + $0x570] sm:$0xff] }
 0x12c   :  { %1365 = vmatpush1.bf16.msra.mxu0 %v1192_v27  ;;  %1529 = vmatpush1.bf16.msra.mxu1 %v1194_v28  ;;  %v1233_v27 = vld [vmem:[#allocation2 + $0x588] sm:$0xff]  ;;  %v1235_v28 = vld [vmem:[#allocation2 + $0x598] sm:$0xff] }
 0x12d   :  { %1366 = vmatprep.subr.bf16.mxu0 %v1197_v29  ;;  %1530 = vmatprep.subr.bf16.mxu1 %v1199_v23  ;;  %v1232_v29 = vld [vmem:[#allocation2 + $0x580] sm:$0xff]  ;;  %v1234_v23 = vld [vmem:[#allocation2 + $0x590] sm:$0xff] }
 0x130   :  { %1367 = vmatpush1.bf16.msra.mxu0 %v1196_v30  ;;  %1531 = vmatpush1.bf16.msra.mxu1 %v1198_v31  ;;  %v1237_v30 = vld [vmem:[#allocation2 + $0x5a8] sm:$0xff]  ;;  %v1239_v31 = vld [vmem:[#allocation2 + $0x5b8] sm:$0xff] }
 0x131   :  { %1368 = vmatprep.subr.bf16.mxu0 %v1201_v18  ;;  %1532 = vmatprep.subr.bf16.mxu1 %v1203_v32  ;;  %v1236_v18 = vld [vmem:[#allocation2 + $0x5a0] sm:$0xff]  ;;  %v1238_v32 = vld [vmem:[#allocation2 + $0x5b0] sm:$0xff] }
 0x134   :  { %1369 = vmatpush1.bf16.msra.mxu0 %v1200_v57  ;;  %1533 = vmatpush1.bf16.msra.mxu1 %v1202_v58  ;;  %v1241_v57 = vld [vmem:[#allocation2 + $0x5c8] sm:$0xff]  ;;  %v1243_v58 = vld [vmem:[#allocation2 + $0x5d8] sm:$0xff] }
 0x135   :  { %1370 = vmatprep.subr.bf16.mxu0 %v1205_v59  ;;  %1534 = vmatprep.subr.bf16.mxu1 %v1207_v21  ;;  %v1240_v59 = vld [vmem:[#allocation2 + $0x5c0] sm:$0xff]  ;;  %v1242_v21 = vld [vmem:[#allocation2 + $0x5d0] sm:$0xff] }
 0x138   :  { %1371 = vmatpush1.bf16.msra.mxu0 %v1204_v60  ;;  %1535 = vmatpush1.bf16.msra.mxu1 %v1206_v61  ;;  %v1245_v60 = vld [vmem:[#allocation2 + $0x5e8] sm:$0xff]  ;;  %v1247_v61 = vld [vmem:[#allocation2 + $0x5f8] sm:$0xff] }
 0x139   :  { %1372 = vmatprep.subr.bf16.mxu0 %v1209_v62  ;;  %1536 = vmatprep.subr.bf16.mxu1 %v1211_v63  ;;  %v1244_v62 = vld [vmem:[#allocation2 + $0x5e0] sm:$0xff]  ;;  %v1246_v63 = vld [vmem:[#allocation2 + $0x5f0] sm:$0xff] }
 0x13c   :  { %1373 = vmatpush1.bf16.msra.mxu0 %v1208_v0  ;;  %1537 = vmatpush1.bf16.msra.mxu1 %v1210_v1  ;;  %v1249_v0 = vld [vmem:[#allocation2 + $0x608] sm:$0xff]  ;;  %v1053_v1 = vpack.c.bf16 %v4128_v22, %v4128_v22  ;;  %v1254_v22 = vlaneseq }
 0x13d   :  { %1374 = vmatprep.subr.bf16.mxu0 %v1213_v2  ;;  %1538 = vmatprep.subr.bf16.mxu1 %v1215_v3  ;;  %v1248_v2 = vld [vmem:[#allocation2 + $0x600] sm:$0xff]  ;;  %v1251_v3 = vld [vmem:[#allocation2 + $0x618] sm:$0xff] }
 0x140   :  { %1375 = vmatpush1.bf16.msra.mxu0 %v1212_v4  ;;  %1539 = vmatpush1.bf16.msra.mxu1 %v1214_v5  ;;  %v3463_v4 = vmov 0   ;;  %v1055_v5 = vpack.c.bf16 %v4138_v24, %v4138_v24 }
 0x141   :  { %1376 = vmatprep.subr.bf16.mxu0 %v1217_v6  ;;  %1540 = vmatprep.subr.bf16.mxu1 %v1219_v7  ;;  %v1250_v6 = vld [vmem:[#allocation2 + $0x610] sm:$0xff] }
 0x144   :  { %1377 = vmatpush1.bf16.msra.mxu0 %v1216_v8  ;;  %1541 = vmatpush1.bf16.msra.mxu1 %v1218_v9 }
 0x145   :  { %1378 = vmatprep.subr.bf16.mxu0 %v1221_v10  ;;  %1542 = vmatprep.subr.bf16.mxu1 %v1223_v11  ;;  %v4155_v10 = vshrl.u32 %v1254_v22, 7 }
 0x147   :  { %v4161_v24 = vsub.s32 1, %v4155_v10 }
 0x148   :  { %1379 = vmatpush1.bf16.msra.mxu0 %v1220_v12  ;;  %1543 = vmatpush1.bf16.msra.mxu1 %v1222_v13  ;;  %v4158_v12 = vsub.s32 0, %v4155_v10  ;;  %v1252_v13 = vld [vmem:[#allocation12] ss:$8 sm:$0xf] }
 0x149   :  { %1380 = vmatprep.subr.bf16.mxu0 %v1225_v14  ;;  %1544 = vmatprep.subr.bf16.mxu1 %v1227_v15  ;;  %v1261_v15 = vrot.slane %v1252_v13, %v4161_v24 }
 0x14a   :  { %v1257_v14 = vrot.slane %v1252_v13, %v4158_v12 }
 0x14c   :  { %1381 = vmatpush1.bf16.msra.mxu0 %v1224_v16  ;;  %1545 = vmatpush1.bf16.msra.mxu1 %v1226_v17  ;;  %v4166_v16 = vsub.s32 2, %v4155_v10  ;;  %v4169_v17 = vsub.s32 3, %v4155_v10 }
 0x14d   :  { %1382 = vmatprep.subr.bf16.mxu0 %v1229_v19  ;;  %1546 = vmatprep.subr.bf16.mxu1 %v1231_v25 }
 0x150   :  { %1383 = vmatpush1.bf16.msra.mxu0 %v1228_v20  ;;  %1547 = vmatpush1.bf16.msra.mxu1 %v1230_v26 }
 0x151   :  { %1384 = vmatprep.subr.bf16.mxu0 %v1233_v27  ;;  %1548 = vmatprep.subr.bf16.mxu1 %v1235_v28  ;;  %v1265_v28 = vrot.slane %v1252_v13, %v4166_v16 }
 0x154   :  { %1385 = vmatpush1.bf16.msra.mxu0 %v1232_v29  ;;  %1549 = vmatpush1.bf16.msra.mxu1 %v1234_v23 }
 0x155   :  { %1386 = vmatprep.subr.bf16.mxu0 %v1237_v30  ;;  %1550 = vmatprep.subr.bf16.mxu1 %v1239_v31  ;;  %v1269_v30 = vrot.slane %v1252_v13, %v4169_v17 }
 0x158   :  { %1387 = vmatpush1.bf16.msra.mxu0 %v1236_v18  ;;  %1551 = vmatpush1.bf16.msra.mxu1 %v1238_v32 }
 0x159   :  { %1388 = vmatprep.subr.bf16.mxu0 %v1241_v57  ;;  %1552 = vmatprep.subr.bf16.mxu1 %v1243_v58 }
 0x15c   :  { %1389 = vmatpush1.bf16.msra.mxu0 %v1240_v59  ;;  %1553 = vmatpush1.bf16.msra.mxu1 %v1242_v21 }
 0x15d   :  { %1390 = vmatprep.subr.bf16.mxu0 %v1245_v60  ;;  %1554 = vmatprep.subr.bf16.mxu1 %v1247_v61 }
 0x160   :  { %1391 = vmatpush1.bf16.msra.mxu0 %v1244_v62  ;;  %1555 = vmatpush1.bf16.msra.mxu1 %v1246_v63 }
 0x161   :  { %1401 = vmatprep.subr.bf16.mxu0 %v1249_v0 }
 0x163   :  { %1393 = vmatmul.mubr.bf16.vlgmr.msra.gmra.mrb[0].mxu0 %v1053_v1  ;;  %1557 = vmatmul.mubr.bf16.vlgmr.msra.gmra.mrb[0].mxu1 %v1053_v1 }
 0x164   :  { %1402 = vmatpush1.bf16.msra.mxu0 %v1248_v2  ;;  %1433 = vmatprep.mubr.bf16.mxu0 %v3463_v4 }
 0x165   :  { %1565 = vmatprep.subr.bf16.mxu0 %v1251_v3 }
 0x16f   :  { %3063 = vmatmul.mubr.msk.bf16.vlgmr.msra.gmra.mrb[0].mxu0 %vm1274_vm0, %v1055_v5 }
 0x170   :  { %1566 = vmatpush1.bf16.msra.mxu0 %v1250_v6  ;;  %1597 = vmatprep.mubr.bf16.mxu0 %v3463_v4 }
 0x177   :  { %3064 = vmatmul.mubr.msk.bf16.vlgmr.msra.gmra.mrb[4].mxu0 %vm1274_vm0, %v1055_v5 }
 0x236   :  { %v1558_v7 = vpop.f32.mrb[0].mxu1 }
 0x237   :  { %v1560_v8 = vpop.f32.mrb[1].mxu1  ;;  %v3237_v18 = vadd.f32 %v1558_v7, %v1265_v28 }
 0x238   :  { %v1562_v9 = vpop.f32.mrb[2].mxu1  ;;  %v3239_v32 = vadd.f32 %v1560_v8, %v1269_v30 }
 0x239   :  { %v1563_v11 = vpop.f32.mrb[3].mxu1 }
 0x242   :  { %v1435_v19 = vpop.f32.mrb[0].mxu0 }
 0x243   :  { %v4171_v25 = vadd.f32 %v1435_v19, %v1257_v14  ;;  %v1437_v20 = vpop.f32.mrb[1].mxu0 }
 0x244   :  { %v3236_v26 = vadd.f32 %v1437_v20, %v1261_v15  ;;  %v1439_v27 = vpop.f32.mrb[2].mxu0 }
 0x245   :  { %v1606_v29 = vmax.f32 %v4171_v25, 0.0  ;;  %v1440_v23 = vpop.f32.mrb[3].mxu0 }
 0x246   :  { %v1607_v31 = vmax.f32 %v3236_v26, 0.0 }
 0x24a   :  { %v1599_v57 = vpop.f32.mrb[4].mxu0 }
 0x24b   :  { %v4176_v58 = vadd.f32 %v3237_v18, %v1599_v57  ;;  %v1601_v59 = vpop.f32.mrb[5].mxu0 }
 0x24c   :  { %v4178_v21 = vadd.f32 %v3239_v32, %v1601_v59  ;;  %v1603_v60 = vpop.f32.mrb[6].mxu0 }
 0x24d   :  { %v1608_v61 = vmax.f32 %v4176_v58, 0.0  ;;  %v1604_v62 = vpop.f32.mrb[7].mxu0 }
 0x24e   :  { %v1609_v63 = vmax.f32 %v4178_v21, 0.0 }
 0x24f   :  { %3423 = dma.done.wait [#allocation11 + $0x1], 8192 }
 0x250   :  { %3424 = vsyncadd [#allocation11 + $0x1], 4294959104  ;;  %v1615_v0 = vpack.c.bf16 %v1607_v31, %v1607_v31  ;;  %v1619_v1 = vld [vmem:[#allocation3 + $0x8] sm:$0xff]  ;;  %v1618_v2 = vld [vmem:[#allocation3] sm:$0xff]  ;;  %3082 = vmatprep.subr.bf16.mxu1 %v3900_v41 }
 0x251   :  { %v1621_v3 = vld [vmem:[#allocation3 + $0x18] sm:$0xff]  ;;  %1695 = vmatprep.subr.bf16.mxu0 %v1619_v1  ;;  %v1620_v5 = vld [vmem:[#allocation3 + $0x10] sm:$0xff]  ;;  %v1623_v6 = vld [vmem:[#allocation3 + $0x28] sm:$0xff] }
 0x252   :  { %1727 = vmatprep.mubr.bf16.mxu0 %v1615_v0  ;;  %1696 = vmatpush1.bf16.msra.mxu0 %v1618_v2  ;;  %v1622_v7 = vld [vmem:[#allocation3 + $0x20] sm:$0xff]  ;;  %v1625_v8 = vld [vmem:[#allocation3 + $0x38] sm:$0xff]  ;;  %v1624_v9 = vld [vmem:[#allocation3 + $0x30] sm:$0xff] }
 0x253   :  { %1697 = vmatprep.subr.bf16.mxu0 %v1621_v3  ;;  %v1627_v11 = vld [vmem:[#allocation3 + $0x48] sm:$0xff]  ;;  %v1626_v13 = vld [vmem:[#allocation3 + $0x40] sm:$0xff]  ;;  %v1629_v14 = vld [vmem:[#allocation3 + $0x58] sm:$0xff] }
 0x254   :  { %v1628_v15 = vld [vmem:[#allocation3 + $0x50] sm:$0xff]  ;;  %v1631_v19 = vld [vmem:[#allocation3 + $0x68] sm:$0xff]  ;;  %v1630_v20 = vld [vmem:[#allocation3 + $0x60] sm:$0xff] }
 0x255   :  { %v1633_v26 = vld [vmem:[#allocation3 + $0x78] sm:$0xff]  ;;  %v1632_v27 = vld [vmem:[#allocation3 + $0x70] sm:$0xff]  ;;  %v1635_v28 = vld [vmem:[#allocation3 + $0x88] sm:$0xff] }
 0x256   :  { %1698 = vmatpush1.bf16.msra.mxu0 %v1620_v5  ;;  %v1634_v23 = vld [vmem:[#allocation3 + $0x80] sm:$0xff]  ;;  %v1637_v30 = vld [vmem:[#allocation3 + $0x98] sm:$0xff]  ;;  %v1636_v31 = vld [vmem:[#allocation3 + $0x90] sm:$0xff] }
 0x257   :  { %1699 = vmatprep.subr.bf16.mxu0 %v1623_v6  ;;  %v1639_v18 = vld [vmem:[#allocation3 + $0xa8] sm:$0xff]  ;;  %v1638_v32 = vld [vmem:[#allocation3 + $0xa0] sm:$0xff]  ;;  %v1641_v57 = vld [vmem:[#allocation3 + $0xb8] sm:$0xff] }
 0x258   :  { %v1640_v59 = vld [vmem:[#allocation3 + $0xb0] sm:$0xff]  ;;  %v1643_v60 = vld [vmem:[#allocation3 + $0xc8] sm:$0xff]  ;;  %v1642_v62 = vld [vmem:[#allocation3 + $0xc0] sm:$0xff] }
 0x259   :  { %v1645_v0 = vld [vmem:[#allocation3 + $0xd8] sm:$0xff]  ;;  %v1644_v1 = vld [vmem:[#allocation3 + $0xd0] sm:$0xff]  ;;  %v1647_v2 = vld [vmem:[#allocation3 + $0xe8] sm:$0xff] }
 0x25a   :  { %1700 = vmatpush1.bf16.msra.mxu0 %v1622_v7  ;;  %v1646_v3 = vld [vmem:[#allocation3 + $0xe0] sm:$0xff]  ;;  %v1649_v5 = vld [vmem:[#allocation3 + $0xf8] sm:$0xff]  ;;  %v1648_v6 = vld [vmem:[#allocation3 + $0xf0] sm:$0xff] }
 0x25b   :  { %1701 = vmatprep.subr.bf16.mxu0 %v1625_v8  ;;  %v1651_v7 = vld [vmem:[#allocation3 + $0x108] sm:$0xff]  ;;  %v1614_v8 = vpack.c.bf16 %v1606_v29, %v1606_v29  ;;  %v1657_v25 = vld [vmem:[#allocation3 + $0x138] sm:$0xff]  ;;  %v1656_v29 = vld [vmem:[#allocation3 + $0x130] sm:$0xff] }
 0x25c   :  { %v1658_v21 = vld [vmem:[#allocation3 + $0x140] sm:$0xff] }
 0x25e   :  { %1702 = vmatpush1.bf16.msra.mxu0 %v1624_v9  ;;  %v1617_v9 = vpack.c.bf16 %v1609_v63, %v1609_v63  ;;  %v1661_v63 = vld [vmem:[#allocation3 + $0x158] sm:$0xff] }
 0x25f   :  { %1703 = vmatprep.subr.bf16.mxu0 %v1627_v11  ;;  %v1650_v11 = vld [vmem:[#allocation3 + $0x100] sm:$0xff] }
 0x262   :  { %1704 = vmatpush1.bf16.msra.mxu0 %v1626_v13  ;;  %v1653_v13 = vld [vmem:[#allocation3 + $0x118] sm:$0xff] }
 0x263   :  { %1705 = vmatprep.subr.bf16.mxu0 %v1629_v14  ;;  %v1652_v14 = vld [vmem:[#allocation3 + $0x110] sm:$0xff] }
 0x266   :  { %1706 = vmatpush1.bf16.msra.mxu0 %v1628_v15  ;;  %v1655_v15 = vld [vmem:[#allocation3 + $0x128] sm:$0xff] }
 0x267   :  { %1707 = vmatprep.subr.bf16.mxu0 %v1631_v19  ;;  %v1654_v19 = vld [vmem:[#allocation3 + $0x120] sm:$0xff] }
 0x26a   :  { %1708 = vmatpush1.bf16.msra.mxu0 %v1630_v20  ;;  %v1659_v20 = vld [vmem:[#allocation3 + $0x148] sm:$0xff] }
 0x26b   :  { %1709 = vmatprep.subr.bf16.mxu0 %v1633_v26  ;;  %v1660_v26 = vld [vmem:[#allocation3 + $0x150] sm:$0xff] }
 0x26e   :  { %1710 = vmatpush1.bf16.msra.mxu0 %v1632_v27  ;;  %v1663_v27 = vld [vmem:[#allocation3 + $0x168] sm:$0xff] }
 0x26f   :  { %1711 = vmatprep.subr.bf16.mxu0 %v1635_v28  ;;  %v1662_v28 = vld [vmem:[#allocation3 + $0x160] sm:$0xff] }
 0x272   :  { %1712 = vmatpush1.bf16.msra.mxu0 %v1634_v23  ;;  %v1665_v23 = vld [vmem:[#allocation3 + $0x178] sm:$0xff] }
 0x273   :  { %1713 = vmatprep.subr.bf16.mxu0 %v1637_v30  ;;  %v1664_v30 = vld [vmem:[#allocation3 + $0x170] sm:$0xff] }
 0x276   :  { %1714 = vmatpush1.bf16.msra.mxu0 %v1636_v31  ;;  %v1667_v31 = vld [vmem:[#allocation3 + $0x188] sm:$0xff] }
 0x277   :  { %1715 = vmatprep.subr.bf16.mxu0 %v1639_v18  ;;  %v1666_v18 = vld [vmem:[#allocation3 + $0x180] sm:$0xff] }
 0x27a   :  { %1716 = vmatpush1.bf16.msra.mxu0 %v1638_v32  ;;  %v1669_v32 = vld [vmem:[#allocation3 + $0x198] sm:$0xff] }
 0x27b   :  { %1717 = vmatprep.subr.bf16.mxu0 %v1641_v57  ;;  %v1668_v57 = vld [vmem:[#allocation3 + $0x190] sm:$0xff] }
 0x27e   :  { %1718 = vmatpush1.bf16.msra.mxu0 %v1640_v59  ;;  %v1671_v59 = vld [vmem:[#allocation3 + $0x1a8] sm:$0xff] }
 0x27f   :  { %1719 = vmatprep.subr.bf16.mxu0 %v1643_v60  ;;  %v1670_v60 = vld [vmem:[#allocation3 + $0x1a0] sm:$0xff] }
 0x282   :  { %1720 = vmatpush1.bf16.msra.mxu0 %v1642_v62  ;;  %v1673_v62 = vld [vmem:[#allocation3 + $0x1b8] sm:$0xff] }
 0x283   :  { %1721 = vmatprep.subr.bf16.mxu0 %v1645_v0  ;;  %v1672_v0 = vld [vmem:[#allocation3 + $0x1b0] sm:$0xff] }
 0x286   :  { %1722 = vmatpush1.bf16.msra.mxu0 %v1644_v1  ;;  %v1675_v1 = vld [vmem:[#allocation3 + $0x1c8] sm:$0xff] }
 0x287   :  { %1723 = vmatprep.subr.bf16.mxu0 %v1647_v2  ;;  %v1674_v2 = vld [vmem:[#allocation3 + $0x1c0] sm:$0xff] }
 0x28a   :  { %1724 = vmatpush1.bf16.msra.mxu0 %v1646_v3  ;;  %v1677_v3 = vld [vmem:[#allocation3 + $0x1d8] sm:$0xff] }
 0x28b   :  { %1725 = vmatprep.subr.bf16.mxu0 %v1649_v5  ;;  %v1676_v5 = vld [vmem:[#allocation3 + $0x1d0] sm:$0xff] }
 0x28e   :  { %1726 = vmatpush1.bf16.msra.mxu0 %v1648_v6  ;;  %v1679_v6 = vld [vmem:[#allocation3 + $0x1e8] sm:$0xff] }
 0x28f   :  { %1736 = vmatprep.subr.bf16.mxu0 %v1651_v7  ;;  %v1678_v7 = vld [vmem:[#allocation3 + $0x1e0] sm:$0xff] }
 0x291   :  { %1728 = vmatmul.mubr.bf16.vlgmr.msra.gmra.mrb[8].mxu0 %v1614_v8  ;;  %v1681_v8 = vld [vmem:[#allocation3 + $0x1f8] sm:$0xff] }
 0x292   :  { %1737 = vmatpush1.bf16.msra.mxu0 %v1650_v11  ;;  %1768 = vmatprep.mubr.bf16.mxu0 %v1617_v9  ;;  %v1680_v9 = vld [vmem:[#allocation3 + $0x1f0] sm:$0xff]  ;;  %v1616_v11 = vpack.c.bf16 %v1608_v61, %v1608_v61 }
 0x293   :  { %1738 = vmatprep.subr.bf16.mxu0 %v1653_v13  ;;  %v1683_v13 = vld [vmem:[#allocation12 + $0x1] ss:$8 sm:$0x3] }
 0x296   :  { %1739 = vmatpush1.bf16.msra.mxu0 %v1652_v14  ;;  %v1688_v14 = vrot.slane %v1683_v13, %v4158_v12 }
 0x297   :  { %1740 = vmatprep.subr.bf16.mxu0 %v1655_v15  ;;  %v1692_v15 = vrot.slane %v1683_v13, %v4161_v24 }
 0x29a   :  { %1741 = vmatpush1.bf16.msra.mxu0 %v1654_v19 }
 0x29b   :  { %1742 = vmatprep.subr.bf16.mxu0 %v1657_v25 }
 0x29e   :  { %1743 = vmatpush1.bf16.msra.mxu0 %v1656_v29 }
 0x29f   :  { %1744 = vmatprep.subr.bf16.mxu0 %v1659_v20 }
 0x2a2   :  { %1745 = vmatpush1.bf16.msra.mxu0 %v1658_v21 }
 0x2a3   :  { %1746 = vmatprep.subr.bf16.mxu0 %v1661_v63 }
 0x2a6   :  { %1747 = vmatpush1.bf16.msra.mxu0 %v1660_v26 }
 0x2a7   :  { %1748 = vmatprep.subr.bf16.mxu0 %v1663_v27 }
 0x2aa   :  { %1749 = vmatpush1.bf16.msra.mxu0 %v1662_v28 }
 0x2ab   :  { %1750 = vmatprep.subr.bf16.mxu0 %v1665_v23 }
 0x2ae   :  { %1751 = vmatpush1.bf16.msra.mxu0 %v1664_v30 }
 0x2af   :  { %1752 = vmatprep.subr.bf16.mxu0 %v1667_v31 }
 0x2b2   :  { %1753 = vmatpush1.bf16.msra.mxu0 %v1666_v18 }
 0x2b3   :  { %1754 = vmatprep.subr.bf16.mxu0 %v1669_v32 }
 0x2b6   :  { %1755 = vmatpush1.bf16.msra.mxu0 %v1668_v57 }
 0x2b7   :  { %1756 = vmatprep.subr.bf16.mxu0 %v1671_v59 }
 0x2ba   :  { %1757 = vmatpush1.bf16.msra.mxu0 %v1670_v60 }
 0x2bb   :  { %1758 = vmatprep.subr.bf16.mxu0 %v1673_v62 }
 0x2be   :  { %1759 = vmatpush1.bf16.msra.mxu0 %v1672_v0 }
 0x2bf   :  { %1760 = vmatprep.subr.bf16.mxu0 %v1675_v1 }
 0x2c2   :  { %1761 = vmatpush1.bf16.msra.mxu0 %v1674_v2 }
 0x2c3   :  { %1762 = vmatprep.subr.bf16.mxu0 %v1677_v3 }
 0x2c6   :  { %1763 = vmatpush1.bf16.msra.mxu0 %v1676_v5 }
 0x2c7   :  { %1764 = vmatprep.subr.bf16.mxu0 %v1679_v6 }
 0x2ca   :  { %1765 = vmatpush1.bf16.msra.mxu0 %v1678_v7 }
 0x2cb   :  { %1766 = vmatprep.subr.bf16.mxu0 %v1681_v8 }
 0x2ce   :  { %1767 = vmatpush1.bf16.msra.mxu0 %v1680_v9 }
 0x2d1   :  { %1769 = vmatmul.mubr.bf16.vlgmr.msra.gmra.mrb[8].mxu0 %v1616_v11 }
 0x3a4   :  { %v1770_v19 = vpop.f32.mrb[8].mxu0 }
 0x3a5   :  { %v3241_v25 = vadd.f32 %v1770_v19, %v1688_v14  ;;  %v1772_v29 = vpop.f32.mrb[9].mxu0 }
 0x3a6   :  { %v3242_v20 = vadd.f32 %v1772_v29, %v1692_v15  ;;  %v1774_v21 = vpop.f32.mrb[10].mxu0 }
 0x3a7   :  { %v1777_v63 = vmax.f32 %v3241_v25, 0.0  ;;  %v1775_v26 = vpop.f32.mrb[11].mxu0 }
 0x3a8   :  { %v1778_v27 = vmax.f32 %v3242_v20, 0.0 }
 0x3aa   :  { %v1784_v58 = vpack.c.bf16 %v1778_v27, %v1778_v27 }
 0x3ab   :  { %3425 = dma.done.wait [#allocation11 + $0x2], 2048 }
 0x3ac   :  { %3426 = vsyncadd [#allocation11 + $0x2], 4294965248  ;;  %3083 = vmatpush3.bf16.msra.mxu1 %v3860_v33  ;;  %1834 = vmatprep.mubr.bf16.mxu1 %v1784_v58  ;;  %v1783_v33 = vpack.c.bf16 %v1777_v63, %v1777_v63 }
 0x3ad   :  { %3084 = vmatprep.subr.bf16.mxu1 %v3905_v42 }
 0x3b0   :  { %3085 = vmatpush3.bf16.msra.mxu1 %v3865_v34 }
 0x3b1   :  { %3086 = vmatprep.subr.bf16.mxu1 %v3910_v43 }
 0x3b4   :  { %3087 = vmatpush3.bf16.msra.mxu1 %v3870_v35  ;;  %v1801_v35 = vld [vmem:[#allocation12 + $0x2] ss:$0 sm:$0xff] }
 0x3b5   :  { %3088 = vmatprep.subr.bf16.mxu1 %v3915_v44 }
 0x3b8   :  { %3089 = vmatpush3.bf16.msra.mxu1 %v3875_v36 }
 0x3b9   :  { %3090 = vmatprep.subr.bf16.mxu1 %v3920_v45 }
 0x3bc   :  { %3091 = vmatpush3.bf16.msra.mxu1 %v3880_v37 }
 0x3bd   :  { %3092 = vmatprep.subr.bf16.mxu1 %v3925_v46 }
 0x3c0   :  { %3093 = vmatpush3.bf16.msra.mxu1 %v3885_v38 }
 0x3c1   :  { %3094 = vmatprep.subr.bf16.mxu1 %v3930_v47 }
 0x3c4   :  { %3095 = vmatpush3.bf16.msra.mxu1 %v3890_v39 }
 0x3c5   :  { %3096 = vmatprep.subr.bf16.mxu1 %v3935_v48 }
 0x3c8   :  { %3097 = vmatpush3.bf16.msra.mxu1 %v3895_v40 }
 0x3cb   :  { %1835 = vmatmul.mubr.bf16.vlgmr.msra.gmra.mrb[4].mxu1 %v1783_v33 }
 0x49e   :  { %v3098_v34 = vpop.f32.mrb[4].mxu1 }
 0x49f   :  { %v3099_v36 = vpop.f32.mrb[5].mxu1 }
 0x4a0   :  { %v3100_v41 = vadd.f32 %v3099_v36, %v3098_v34  ;;  %v3101_v42 = vpop.f32.mrb[6].mxu1 }
 0x4a1   :  { %v3102_v37 = vpop.f32.mrb[7].mxu1 }
 0x4a2   :  { %v1837_v43 = vadd.f32 %v3100_v41, %v1801_v35 }
 0x4a4   :  { %v1842_v44 = vmax.f32 %v1837_v43, 0.0 }
 0x4a5   :  { %3427 = dma.done.wait [#allocation11 + $0x3], 1024 }
 0x4a6   :  { %3428 = vsyncadd [#allocation11 + $0x3], 4294966272  ;;  %v3464_v38 = vmov 0.0   ;;  %vm3465_vm1 = vmmov 0   ;;  %v1847_v39 = vpack.c.bf16 %v1842_v44, %v1842_v44  ;;  %v1856_v40 = vld [vmem:[#allocation12 + $0x3] ss:$0 sm:$0xff] }
 0x4a7   :  { %3175 = vmatprep.subr.bf16.mxu1 %v3464_v38  ;;  %3191 = vmatprep.mubr.msk.bf16.mxu1 %vm3465_vm1, %v3464_v38 }
 0x4a8   :  { %3176 = vmatpush3.bf16.msra.mxu1 %v3940_v49 }
 0x4a9   :  { %3177 = vmatprep.subr.bf16.mxu1 %v3464_v38 }
 0x4ac   :  { %3178 = vmatpush3.bf16.msra.mxu1 %v3945_v50 }
 0x4ad   :  { %3179 = vmatprep.subr.bf16.mxu1 %v3464_v38 }
 0x4b0   :  { %3180 = vmatpush3.bf16.msra.mxu1 %v3950_v51 }
 0x4b1   :  { %3181 = vmatprep.subr.bf16.mxu1 %v3464_v38 }
 0x4b4   :  { %3182 = vmatpush3.bf16.msra.mxu1 %v3955_v52 }
 0x4b5   :  { %3183 = vmatprep.subr.bf16.mxu1 %v3464_v38 }
 0x4b8   :  { %3184 = vmatpush3.bf16.msra.mxu1 %v3960_v53 }
 0x4b9   :  { %3185 = vmatprep.subr.bf16.mxu1 %v3464_v38 }
 0x4bc   :  { %3186 = vmatpush3.bf16.msra.mxu1 %v3965_v54 }
 0x4bd   :  { %3187 = vmatprep.subr.bf16.mxu1 %v3464_v38 }
 0x4c0   :  { %3188 = vmatpush3.bf16.msra.mxu1 %v3970_v55 }
 0x4c1   :  { %3189 = vmatprep.subr.bf16.mxu1 %v3464_v38 }
 0x4c4   :  { %3190 = vmatpush3.bf16.msra.mxu1 %v3975_v56 }
 0x4c7   :  { %3192 = vmatmul.mubr.bf16.vlgmr.msra.gmra.mrb[8].mxu1 %v1847_v39 }
 0x59a   :  { %v1891_v45 = vpop.f32.mrb[8].mxu1 }
 0x59b   :  { %v1892_v46 = vadd.f32 %v1891_v45, %v1856_v40  ;;  %v3193_v47 = vpop.f32.mrb[9].mxu1 }
 0x59c   :  { %v1894_v48 = vpop.f32.mrb[10].mxu1 }
 0x59d   :  { %v4227_v49 = vmax.f32 %v1892_v46, 0.0  ;;  %v3194_v50 = vpop.f32.mrb[11].mxu1 }
 0x59e   :  { %3429 = dma.done.wait [#allocation11 + $0x4], 1024 }
 0x59f   :  { %3430 = vsyncadd [#allocation11 + $0x4], 4294966272  ;;  %3195 = vmatprep.subr.bf16.mxu1 %v3464_v38  ;;  %3211 = vmatprep.mubr.msk.bf16.mxu1 %vm3465_vm1, %v3464_v38  ;;  %v1900_v51 = vld [vmem:[#allocation6] sm:$0xff]  ;;  %v1901_v52 = vld [vmem:[#allocation6 + $0x8] sm:$0xff] }
 0x5a0   :  { %3196 = vmatpush3.bf16.msra.mxu1 %v1900_v51  ;;  %v1902_v53 = vld [vmem:[#allocation6 + $0x10] sm:$0xff]  ;;  %v1903_v54 = vld [vmem:[#allocation6 + $0x18] sm:$0xff]  ;;  %v1904_v55 = vld [vmem:[#allocation6 + $0x20] sm:$0xff] }
 0x5a1   :  { %3197 = vmatprep.subr.bf16.mxu1 %v3464_v38  ;;  %v1905_v56 = vld [vmem:[#allocation6 + $0x28] sm:$0xff]  ;;  %v1906_v61 = vld [vmem:[#allocation6 + $0x30] sm:$0xff]  ;;  %v1907_v28 = vld [vmem:[#allocation6 + $0x38] sm:$0xff] }
 0x5a2   :  { %v1908_v23 = vld [vmem:[#allocation12 + $0x4] ss:$0 sm:$0xff] }
 0x5a3   :  { %v1950_v32 = vld [vmem:[%s4366_s1] sm:$0xff] }
 0x5a4   :  { %3198 = vmatpush3.bf16.msra.mxu1 %v1901_v52 }
 0x5a5   :  { %3199 = vmatprep.subr.bf16.mxu1 %v3464_v38 }
 0x5a8   :  { %3200 = vmatpush3.bf16.msra.mxu1 %v1902_v53 }
 0x5a9   :  { %3201 = vmatprep.subr.bf16.mxu1 %v3464_v38 }
 0x5ac   :  { %3202 = vmatpush3.bf16.msra.mxu1 %v1903_v54 }
 0x5ad   :  { %3203 = vmatprep.subr.bf16.mxu1 %v3464_v38 }
 0x5b0   :  { %3204 = vmatpush3.bf16.msra.mxu1 %v1904_v55 }
 0x5b1   :  { %3205 = vmatprep.subr.bf16.mxu1 %v3464_v38 }
 0x5b4   :  { %3206 = vmatpush3.bf16.msra.mxu1 %v1905_v56 }
 0x5b5   :  { %3207 = vmatprep.subr.bf16.mxu1 %v3464_v38 }
 0x5b8   :  { %3208 = vmatpush3.bf16.msra.mxu1 %v1906_v61 }
 0x5b9   :  { %3209 = vmatprep.subr.bf16.mxu1 %v3464_v38 }
 0x5bc   :  { %3210 = vmatpush3.bf16.msra.mxu1 %v1907_v28 }
 0x5bf   :  { %3212 = vmatmul.mubr.bf16.vlgmr.msra.gmra.mrb[12].mxu1 %v1847_v39 }
 0x692   :  { %v1943_v30 = vpop.f32.mrb[12].mxu1 }
 0x693   :  { %v1944_v31 = vadd.f32 %v1943_v30, %v1908_v23  ;;  %v3213_v18 = vpop.f32.mrb[13].mxu1 }
 0x694   :  { %v1946_v57 = vpop.f32.mrb[14].mxu1 }
 0x695   :  { %v4242_v59 = vmax.f32 %v1944_v31, 0.0  ;;  %v3214_v60 = vpop.f32.mrb[15].mxu1 }
 0x697   :  { %v1951_v62 = vmul.f32 %v1950_v32, %v4242_v59 }
 0x699   :  { %v1952_v0 = vadd.f32 %v1951_v62, %v4227_v49 }
 0x69a   :  { %3431 = dma.done.wait [#allocation11 + $0x5], 1024 }
 0x69b   :  { %3432 = vsyncadd [#allocation11 + $0x5], 4294966272  ;;  %3215 = vmatprep.subr.bf16.mxu1 %v3464_v38  ;;  %3231 = vmatprep.mubr.msk.bf16.mxu1 %vm3465_vm1, %v3464_v38  ;;  %v1956_v1 = vld [vmem:[#allocation7] sm:$0xff]  ;;  %v1957_v2 = vld [vmem:[#allocation7 + $0x8] sm:$0xff]  ;;  %v1955_v11 = vpack.c.bf16 %v1952_v0, %v1952_v0 }
 0x69c   :  { %3216 = vmatpush3.bf16.msra.mxu1 %v1956_v1  ;;  %v1958_v3 = vld [vmem:[#allocation7 + $0x10] sm:$0xff]  ;;  %v1959_v5 = vld [vmem:[#allocation7 + $0x18] sm:$0xff]  ;;  %v1960_v6 = vld [vmem:[#allocation7 + $0x20] sm:$0xff] }
 0x69d   :  { %3217 = vmatprep.subr.bf16.mxu1 %v3464_v38  ;;  %v1961_v7 = vld [vmem:[#allocation7 + $0x28] sm:$0xff]  ;;  %v1962_v8 = vld [vmem:[#allocation7 + $0x30] sm:$0xff]  ;;  %v1963_v9 = vld [vmem:[#allocation7 + $0x38] sm:$0xff] }
 0x69e   :  { %v1964_v13 = vld [vmem:[#allocation12 + $0x5] ss:$0 sm:$0xff] }
 0x6a0   :  { %3218 = vmatpush3.bf16.msra.mxu1 %v1957_v2 }
 0x6a1   :  { %3219 = vmatprep.subr.bf16.mxu1 %v3464_v38 }
 0x6a4   :  { %3220 = vmatpush3.bf16.msra.mxu1 %v1958_v3 }
 0x6a5   :  { %3221 = vmatprep.subr.bf16.mxu1 %v3464_v38 }
 0x6a8   :  { %3222 = vmatpush3.bf16.msra.mxu1 %v1959_v5 }
 0x6a9   :  { %3223 = vmatprep.subr.bf16.mxu1 %v3464_v38 }
 0x6ac   :  { %3224 = vmatpush3.bf16.msra.mxu1 %v1960_v6 }
 0x6ad   :  { %3225 = vmatprep.subr.bf16.mxu1 %v3464_v38 }
 0x6b0   :  { %3226 = vmatpush3.bf16.msra.mxu1 %v1961_v7 }
 0x6b1   :  { %3227 = vmatprep.subr.bf16.mxu1 %v3464_v38 }
 0x6b4   :  { %3228 = vmatpush3.bf16.msra.mxu1 %v1962_v8 }
 0x6b5   :  { %3229 = vmatprep.subr.bf16.mxu1 %v3464_v38 }
 0x6b8   :  { %3230 = vmatpush3.bf16.msra.mxu1 %v1963_v9 }
 0x6bb   :  { %3232 = vmatmul.mubr.bf16.vlgmr.msra.gmra.mrb[16].mxu1 %v1955_v11 }
 0x78e   :  { %v1999_v14 = vpop.f32.mrb[16].mxu1 }
 0x78f   :  { %v2000_v15 = vadd.f32 %v1999_v14, %v1964_v13  ;;  %v3233_v19 = vpop.f32.mrb[17].mxu1 }
 0x790   :  { %v2002_v25 = vpop.f32.mrb[18].mxu1 }
 0x791   :  { %v2005_v29 = vmax.f32 %v2000_v15, 0.0  ;;  %v3234_v20 = vpop.f32.mrb[19].mxu1 }
 0x792   :  { %3433 = dma.done.wait [#allocation11 + $0x6], 2048 }
 0x793   :  { %3434 = vsyncadd [#allocation11 + $0x6], 4294965248  ;;  %2071 = vmatprep.mubr.bf16.mxu0 %v3463_v4  ;;  %v2011_v21 = vld [vmem:[#allocation8 + $0x8] sm:$0xff]  ;;  %v2010_v63 = vld [vmem:[#allocation8] sm:$0xff]  ;;  %v2009_v39 = vpack.c.bf16 %v2005_v29, %v2005_v29 }
 0x794   :  { %v2013_v26 = vld [vmem:[#allocation8 + $0x18] sm:$0xff]  ;;  %2039 = vmatprep.subr.bf16.mxu0 %v2011_v21  ;;  %v2012_v27 = vld [vmem:[#allocation8 + $0x10] sm:$0xff]  ;;  %v2015_v58 = vld [vmem:[#allocation8 + $0x28] sm:$0xff] }
 0x795   :  { %2040 = vmatpush1.bf16.msra.mxu0 %v2010_v63  ;;  %v2014_v33 = vld [vmem:[#allocation8 + $0x20] sm:$0xff]  ;;  %v2017_v34 = vld [vmem:[#allocation8 + $0x38] sm:$0xff]  ;;  %v2016_v35 = vld [vmem:[#allocation8 + $0x30] sm:$0xff] }
 0x796   :  { %2041 = vmatprep.subr.bf16.mxu0 %v2013_v26  ;;  %v2019_v36 = vld [vmem:[#allocation8 + $0x48] sm:$0xff]  ;;  %v2018_v41 = vld [vmem:[#allocation8 + $0x40] sm:$0xff]  ;;  %v2021_v4 = vld [vmem:[#allocation8 + $0x58] sm:$0xff] }
 0x797   :  { %v2020_v42 = vld [vmem:[#allocation8 + $0x50] sm:$0xff]  ;;  %v2023_v37 = vld [vmem:[#allocation8 + $0x68] sm:$0xff]  ;;  %v2022_v43 = vld [vmem:[#allocation8 + $0x60] sm:$0xff] }
 0x798   :  { %v2025_v44 = vld [vmem:[#allocation8 + $0x78] sm:$0xff]  ;;  %v2024_v38 = vld [vmem:[#allocation8 + $0x70] sm:$0xff]  ;;  %v2027_v40 = vld [vmem:[#allocation12 + $0x6] ss:$8 sm:$0x3] }
 0x799   :  { %2042 = vmatpush1.bf16.msra.mxu0 %v2012_v27  ;;  %v2032_v45 = vrot.slane %v2027_v40, %v4158_v12  ;;  %v2036_v46 = vrot.slane %v2027_v40, %v4161_v24 }
 0x79a   :  { %2043 = vmatprep.subr.bf16.mxu0 %v2015_v58 }
 0x79d   :  { %2044 = vmatpush1.bf16.msra.mxu0 %v2014_v33 }
 0x79e   :  { %2045 = vmatprep.subr.bf16.mxu0 %v2017_v34 }
 0x7a1   :  { %2046 = vmatpush1.bf16.msra.mxu0 %v2016_v35 }
 0x7a2   :  { %2047 = vmatprep.subr.bf16.mxu0 %v2019_v36 }
 0x7a5   :  { %2048 = vmatpush1.bf16.msra.mxu0 %v2018_v41 }
 0x7a6   :  { %2049 = vmatprep.subr.bf16.mxu0 %v2021_v4 }
 0x7a9   :  { %2050 = vmatpush1.bf16.msra.mxu0 %v2020_v42 }
 0x7aa   :  { %2051 = vmatprep.subr.bf16.mxu0 %v2023_v37 }
 0x7ad   :  { %2052 = vmatpush1.bf16.msra.mxu0 %v2022_v43 }
 0x7ae   :  { %2053 = vmatprep.subr.bf16.mxu0 %v2025_v44 }
 0x7b1   :  { %2054 = vmatpush1.bf16.msra.mxu0 %v2024_v38 }
 0x7b4   :  { %2072 = vmatmul.mubr.bf16.vlgmr.msra.gmra.mrb[12].mxu0 %v2009_v39 }
 0x887   :  { %v2073_v47 = vpop.f32.mrb[12].mxu0 }
 0x888   :  { %v4259_v48 = vadd.f32 %v2073_v47, %v2032_v45  ;;  %v2075_v50 = vpop.f32.mrb[13].mxu0 }
 0x889   :  { %v2076_v51 = vadd.f32 %v2075_v50, %v2036_v46  ;;  %v2077_v52 = vpop.f32.mrb[14].mxu0 }
 0x88a   :  { %v2080_v53 = vmax.f32 %v4259_v48, 0.0  ;;  %v2078_v54 = vpop.f32.mrb[15].mxu0 }
 0x88b   :  { %v2081_v55 = vmax.f32 %v2076_v51, 0.0 }
 0x88c   :  { %3435 = dma.done.wait [#allocation11 + $0x7], 8192 }
 0x88d   :  { %3436 = vsyncadd [#allocation11 + $0x7], 4294959104  ;;  %v2086_v56 = vpack.c.bf16 %v2081_v55, %v2081_v55  ;;  %v2088_v61 = vld [vmem:[#allocation9 + $0x8] sm:$0xff]  ;;  %v2090_v28 = vld [vmem:[#allocation9 + $0x18] sm:$0xff] }
 0x88e   :  { %v2087_v23 = vld [vmem:[#allocation9] sm:$0xff]  ;;  %2174 = vmatprep.subr.bf16.mxu1 %v2088_v61  ;;  %2215 = vmatprep.subr.bf16.mxu0 %v2090_v28  ;;  %v2089_v30 = vld [vmem:[#allocation9 + $0x10] sm:$0xff]  ;;  %v2092_v31 = vld [vmem:[#allocation9 + $0x28] sm:$0xff] }
 0x88f   :  { %2206 = vmatprep.mubr.bf16.mxu1 %v2086_v56  ;;  %2247 = vmatprep.mubr.bf16.mxu0 %v2086_v56  ;;  %v2094_v18 = vld [vmem:[#allocation9 + $0x38] sm:$0xff]  ;;  %v2091_v32 = vld [vmem:[#allocation9 + $0x20] sm:$0xff]  ;;  %v2093_v57 = vld [vmem:[#allocation9 + $0x30] sm:$0xff] }
 0x890   :  { %2175 = vmatpush1.bf16.msra.mxu1 %v2087_v23  ;;  %2216 = vmatpush1.bf16.msra.mxu0 %v2089_v30  ;;  %v2096_v60 = vld [vmem:[#allocation9 + $0x48] sm:$0xff]  ;;  %v2098_v62 = vld [vmem:[#allocation9 + $0x58] sm:$0xff]  ;;  %v2095_v0 = vld [vmem:[#allocation9 + $0x40] sm:$0xff] }
 0x891   :  { %2176 = vmatprep.subr.bf16.mxu1 %v2092_v31  ;;  %2217 = vmatprep.subr.bf16.mxu0 %v2094_v18  ;;  %v2097_v1 = vld [vmem:[#allocation9 + $0x50] sm:$0xff]  ;;  %v2100_v2 = vld [vmem:[#allocation9 + $0x68] sm:$0xff]  ;;  %v2102_v3 = vld [vmem:[#allocation9 + $0x78] sm:$0xff] }
 0x892   :  { %v2099_v5 = vld [vmem:[#allocation9 + $0x60] sm:$0xff]  ;;  %v2101_v6 = vld [vmem:[#allocation9 + $0x70] sm:$0xff]  ;;  %v2104_v7 = vld [vmem:[#allocation9 + $0x88] sm:$0xff] }
 0x893   :  { %v2106_v8 = vld [vmem:[#allocation9 + $0x98] sm:$0xff]  ;;  %v2103_v9 = vld [vmem:[#allocation9 + $0x80] sm:$0xff]  ;;  %v2105_v11 = vld [vmem:[#allocation9 + $0x90] sm:$0xff] }
 0x894   :  { %2177 = vmatpush1.bf16.msra.mxu1 %v2091_v32  ;;  %2218 = vmatpush1.bf16.msra.mxu0 %v2093_v57  ;;  %v2108_v13 = vld [vmem:[#allocation9 + $0xa8] sm:$0xff]  ;;  %v2110_v14 = vld [vmem:[#allocation9 + $0xb8] sm:$0xff]  ;;  %v2107_v15 = vld [vmem:[#allocation9 + $0xa0] sm:$0xff] }
 0x895   :  { %2178 = vmatprep.subr.bf16.mxu1 %v2096_v60  ;;  %2219 = vmatprep.subr.bf16.mxu0 %v2098_v62  ;;  %v2109_v19 = vld [vmem:[#allocation9 + $0xb0] sm:$0xff]  ;;  %v2112_v25 = vld [vmem:[#allocation9 + $0xc8] sm:$0xff]  ;;  %v2114_v29 = vld [vmem:[#allocation9 + $0xd8] sm:$0xff] }
 0x896   :  { %v2111_v20 = vld [vmem:[#allocation9 + $0xc0] sm:$0xff]  ;;  %v2113_v21 = vld [vmem:[#allocation9 + $0xd0] sm:$0xff]  ;;  %v2116_v63 = vld [vmem:[#allocation9 + $0xe8] sm:$0xff] }
 0x897   :  { %v2118_v26 = vld [vmem:[#allocation9 + $0xf8] sm:$0xff]  ;;  %v2115_v27 = vld [vmem:[#allocation9 + $0xe0] sm:$0xff]  ;;  %v2117_v58 = vld [vmem:[#allocation9 + $0xf0] sm:$0xff] }
 0x898   :  { %2179 = vmatpush1.bf16.msra.mxu1 %v2095_v0  ;;  %2220 = vmatpush1.bf16.msra.mxu0 %v2097_v1  ;;  %v2120_v33 = vld [vmem:[#allocation9 + $0x108] sm:$0xff]  ;;  %v2122_v34 = vld [vmem:[#allocation9 + $0x118] sm:$0xff]  ;;  %v2119_v35 = vld [vmem:[#allocation9 + $0x100] sm:$0xff]  ;;  %v2085_v0 = vpack.c.bf16 %v2080_v53, %v2080_v53 }
 0x899   :  { %2180 = vmatprep.subr.bf16.mxu1 %v2100_v2  ;;  %2221 = vmatprep.subr.bf16.mxu0 %v2102_v3  ;;  %v2121_v36 = vld [vmem:[#allocation9 + $0x110] sm:$0xff]  ;;  %v2124_v41 = vld [vmem:[#allocation9 + $0x128] sm:$0xff]  ;;  %v2126_v4 = vld [vmem:[#allocation9 + $0x138] sm:$0xff] }
 0x89a   :  { %v2123_v42 = vld [vmem:[#allocation9 + $0x120] sm:$0xff]  ;;  %v2125_v37 = vld [vmem:[#allocation9 + $0x130] sm:$0xff]  ;;  %v2128_v43 = vld [vmem:[#allocation9 + $0x148] sm:$0xff] }
 0x89b   :  { %v2130_v44 = vld [vmem:[#allocation9 + $0x158] sm:$0xff]  ;;  %v2127_v38 = vld [vmem:[#allocation9 + $0x140] sm:$0xff]  ;;  %v2129_v39 = vld [vmem:[#allocation9 + $0x150] sm:$0xff] }
 0x89c   :  { %2181 = vmatpush1.bf16.msra.mxu1 %v2099_v5  ;;  %2222 = vmatpush1.bf16.msra.mxu0 %v2101_v6  ;;  %v2132_v40 = vld [vmem:[#allocation9 + $0x168] sm:$0xff]  ;;  %v2134_v45 = vld [vmem:[#allocation9 + $0x178] sm:$0xff]  ;;  %v2131_v46 = vld [vmem:[#allocation9 + $0x160] sm:$0xff] }
 0x89d   :  { %2182 = vmatprep.subr.bf16.mxu1 %v2104_v7  ;;  %2223 = vmatprep.subr.bf16.mxu0 %v2106_v8  ;;  %v2133_v47 = vld [vmem:[#allocation9 + $0x170] sm:$0xff]  ;;  %v2136_v50 = vld [vmem:[#allocation9 + $0x188] sm:$0xff]  ;;  %v2138_v51 = vld [vmem:[#allocation9 + $0x198] sm:$0xff] }
 0x89e   :  { %v2135_v52 = vld [vmem:[#allocation9 + $0x180] sm:$0xff]  ;;  %v2137_v54 = vld [vmem:[#allocation9 + $0x190] sm:$0xff]  ;;  %v2140_v55 = vld [vmem:[#allocation9 + $0x1a8] sm:$0xff] }
 0x89f   :  { %v2142_v56 = vld [vmem:[#allocation9 + $0x1b8] sm:$0xff]  ;;  %v2139_v61 = vld [vmem:[#allocation9 + $0x1a0] sm:$0xff]  ;;  %v2141_v28 = vld [vmem:[#allocation9 + $0x1b0] sm:$0xff] }
 0x8a0   :  { %2183 = vmatpush1.bf16.msra.mxu1 %v2103_v9  ;;  %2224 = vmatpush1.bf16.msra.mxu0 %v2105_v11  ;;  %v2144_v23 = vld [vmem:[#allocation9 + $0x1c8] sm:$0xff]  ;;  %v2146_v30 = vld [vmem:[#allocation9 + $0x1d8] sm:$0xff]  ;;  %v2143_v31 = vld [vmem:[#allocation9 + $0x1c0] sm:$0xff] }
 0x8a1   :  { %2184 = vmatprep.subr.bf16.mxu1 %v2108_v13  ;;  %2225 = vmatprep.subr.bf16.mxu0 %v2110_v14  ;;  %v2145_v18 = vld [vmem:[#allocation9 + $0x1d0] sm:$0xff]  ;;  %v2148_v32 = vld [vmem:[#allocation9 + $0x1e8] sm:$0xff]  ;;  %v2150_v57 = vld [vmem:[#allocation9 + $0x1f8] sm:$0xff] }
 0x8a2   :  { %v2147_v60 = vld [vmem:[#allocation9 + $0x1e0] sm:$0xff]  ;;  %v2149_v62 = vld [vmem:[#allocation9 + $0x1f0] sm:$0xff] }
 0x8a3   :  { %v2152_v1 = vld [vmem:[#allocation12 + $0x7] ss:$8 sm:$0xf] }
 0x8a4   :  { %2185 = vmatpush1.bf16.msra.mxu1 %v2107_v15  ;;  %2226 = vmatpush1.bf16.msra.mxu0 %v2109_v19  ;;  %v2157_v2 = vrot.slane %v2152_v1, %v4158_v12  ;;  %v2165_v3 = vrot.slane %v2152_v1, %v4166_v16  ;;  %v2161_v5 = vrot.slane %v2152_v1, %v4161_v24 }
 0x8a5   :  { %2186 = vmatprep.subr.bf16.mxu1 %v2112_v25  ;;  %2227 = vmatprep.subr.bf16.mxu0 %v2114_v29  ;;  %v2169_v6 = vrot.slane %v2152_v1, %v4169_v17 }
 0x8a8   :  { %2187 = vmatpush1.bf16.msra.mxu1 %v2111_v20  ;;  %2228 = vmatpush1.bf16.msra.mxu0 %v2113_v21 }
 0x8a9   :  { %2188 = vmatprep.subr.bf16.mxu1 %v2116_v63  ;;  %2229 = vmatprep.subr.bf16.mxu0 %v2118_v26 }
 0x8ac   :  { %2189 = vmatpush1.bf16.msra.mxu1 %v2115_v27  ;;  %2230 = vmatpush1.bf16.msra.mxu0 %v2117_v58 }
 0x8ad   :  { %2190 = vmatprep.subr.bf16.mxu1 %v2120_v33  ;;  %2231 = vmatprep.subr.bf16.mxu0 %v2122_v34 }
 0x8b0   :  { %2191 = vmatpush1.bf16.msra.mxu1 %v2119_v35  ;;  %2232 = vmatpush1.bf16.msra.mxu0 %v2121_v36 }
 0x8b1   :  { %2192 = vmatprep.subr.bf16.mxu1 %v2124_v41  ;;  %2233 = vmatprep.subr.bf16.mxu0 %v2126_v4 }
 0x8b4   :  { %2193 = vmatpush1.bf16.msra.mxu1 %v2123_v42  ;;  %2234 = vmatpush1.bf16.msra.mxu0 %v2125_v37 }
 0x8b5   :  { %2194 = vmatprep.subr.bf16.mxu1 %v2128_v43  ;;  %2235 = vmatprep.subr.bf16.mxu0 %v2130_v44 }
 0x8b8   :  { %2195 = vmatpush1.bf16.msra.mxu1 %v2127_v38  ;;  %2236 = vmatpush1.bf16.msra.mxu0 %v2129_v39 }
 0x8b9   :  { %2196 = vmatprep.subr.bf16.mxu1 %v2132_v40  ;;  %2237 = vmatprep.subr.bf16.mxu0 %v2134_v45 }
 0x8bc   :  { %2197 = vmatpush1.bf16.msra.mxu1 %v2131_v46  ;;  %2238 = vmatpush1.bf16.msra.mxu0 %v2133_v47 }
 0x8bd   :  { %2198 = vmatprep.subr.bf16.mxu1 %v2136_v50  ;;  %2239 = vmatprep.subr.bf16.mxu0 %v2138_v51 }
 0x8c0   :  { %2199 = vmatpush1.bf16.msra.mxu1 %v2135_v52  ;;  %2240 = vmatpush1.bf16.msra.mxu0 %v2137_v54 }
 0x8c1   :  { %2200 = vmatprep.subr.bf16.mxu1 %v2140_v55  ;;  %2241 = vmatprep.subr.bf16.mxu0 %v2142_v56 }
 0x8c4   :  { %2201 = vmatpush1.bf16.msra.mxu1 %v2139_v61  ;;  %2242 = vmatpush1.bf16.msra.mxu0 %v2141_v28 }
 0x8c5   :  { %2202 = vmatprep.subr.bf16.mxu1 %v2144_v23  ;;  %2243 = vmatprep.subr.bf16.mxu0 %v2146_v30 }
 0x8c8   :  { %2203 = vmatpush1.bf16.msra.mxu1 %v2143_v31  ;;  %2244 = vmatpush1.bf16.msra.mxu0 %v2145_v18 }
 0x8c9   :  { %2204 = vmatprep.subr.bf16.mxu1 %v2148_v32  ;;  %2245 = vmatprep.subr.bf16.mxu0 %v2150_v57 }
 0x8cc   :  { %2205 = vmatpush1.bf16.msra.mxu1 %v2147_v60  ;;  %2246 = vmatpush1.bf16.msra.mxu0 %v2149_v62 }
 0x8cf   :  { %2207 = vmatmul.mubr.bf16.vlgmr.msra.gmra.mrb[20].mxu1 %v2085_v0  ;;  %2248 = vmatmul.mubr.bf16.vlgmr.msra.gmra.mrb[16].mxu0 %v2085_v0 }
 0x9a2   :  { %v2208_v7 = vpop.f32.mrb[20].mxu1  ;;  %v2249_v8 = vpop.f32.mrb[16].mxu0 }
 0x9a3   :  { %v4269_v9 = vadd.f32 %v2208_v7, %v2157_v2  ;;  %v4271_v48 = vadd.f32 %v2249_v8, %v2165_v3  ;;  %v2210_v53 = vpop.f32.mrb[21].mxu1  ;;  %v2251_v11 = vpop.f32.mrb[17].mxu0 }
 0x9a4   :  { %v2211_v13 = vadd.f32 %v2210_v53, %v2161_v5  ;;  %v4273_v14 = vadd.f32 %v2251_v11, %v2169_v6  ;;  %v2212_v15 = vpop.f32.mrb[22].mxu1  ;;  %v2253_v19 = vpop.f32.mrb[18].mxu0 }
 0x9a5   :  { %v2256_v25 = vmax.f32 %v4269_v9, 0.0  ;;  %v2258_v29 = vmax.f32 %v4271_v48, 0.0  ;;  %v2213_v20 = vpop.f32.mrb[23].mxu1  ;;  %v2254_v21 = vpop.f32.mrb[19].mxu0 }
 0x9a6   :  { %v2257_v63 = vmax.f32 %v2211_v13, 0.0  ;;  %v2259_v26 = vmax.f32 %v4273_v14, 0.0 }
 0x9a7   :  { %3437 = dma.done.wait [#allocation11 + $0x8], 28672 }
 0x9a8   :  { %3438 = vsyncadd [#allocation11 + $0x8], 4294938624  ;;  %v4278_v27 = vpack.c.bf16 %v2257_v63, %v2257_v63  ;;  %v2268_v58 = vld [vmem:[#allocation10 + $0x8] sm:$0xff]  ;;  %v2270_v33 = vld [vmem:[#allocation10 + $0x18] sm:$0xff]  ;;  %s3409_s26 = scalar_lea.hbm %s4378_s13, 16 }
 0x9a9   :  { %v2267_v34 = vld [vmem:[#allocation10] sm:$0xff]  ;;  %2531 = vmatprep.subr.bf16.mxu1 %v2268_v58  ;;  %2613 = vmatprep.subr.bf16.mxu0 %v2270_v33  ;;  %v2269_v35 = vld [vmem:[#allocation10 + $0x10] sm:$0xff]  ;;  %v2274_v4 = vld [vmem:[#allocation10 + $0x38] sm:$0xff]  ;;  %p3410_p10 = scmp.ne.s32.totalorder %s4378_s13, %s3409_s26  ;;  %p3413_p11 = scmp.lt.u32.totalorder %s3409_s26, %s4378_s13 }
 0x9aa   :  { %2563 = vmatprep.mubr.bf16.mxu1 %v4278_v27  ;;  %2645 = vmatprep.mubr.bf16.mxu0 %v4278_v27  ;;  %v2275_v36 = vld [vmem:[#allocation10 + $0x40] sm:$0xff]  ;;  %v2277_v41 = vld [vmem:[#allocation10 + $0x50] sm:$0xff]  ;;  %v2276_v42 = vld [vmem:[#allocation10 + $0x48] sm:$0xff] }
 0x9ab   :  { %2532 = vmatpush1.bf16.msra.mxu1 %v2267_v34  ;;  %2614 = vmatpush1.bf16.msra.mxu0 %v2269_v35  ;;  %v2282_v37 = vld [vmem:[#allocation10 + $0x78] sm:$0xff]  ;;  %v2284_v43 = vld [vmem:[#allocation10 + $0x88] sm:$0xff]  ;;  %v2281_v44 = vld [vmem:[#allocation10 + $0x70] sm:$0xff]  ;;  %p3415_p12 = pnand %p3413_p11, %p3410_p10 }
 0x9ac   :  { %2533 = vmatprep.subr.bf16.mxu1 %v2275_v36  ;;  %2615 = vmatprep.subr.bf16.mxu0 %v2277_v41  ;;  %v2283_v38 = vld [vmem:[#allocation10 + $0x80] sm:$0xff]  ;;  %v2289_v39 = vld [vmem:[#allocation10 + $0xb0] sm:$0xff]  ;;  %v2288_v45 = vld [vmem:[#allocation10 + $0xa8] sm:$0xff] }
 0x9ad   :  { %v2291_v40 = vld [vmem:[#allocation10 + $0xc0] sm:$0xff]  ;;  %v2290_v46 = vld [vmem:[#allocation10 + $0xb8] sm:$0xff]  ;;  %v2296_v47 = vld [vmem:[#allocation10 + $0xe8] sm:$0xff] }
 0x9ae   :  { %v2298_v50 = vld [vmem:[#allocation10 + $0xf8] sm:$0xff]  ;;  %v2295_v51 = vld [vmem:[#allocation10 + $0xe0] sm:$0xff]  ;;  %v2297_v52 = vld [vmem:[#allocation10 + $0xf0] sm:$0xff] }
 0x9af   :  { %2534 = vmatpush1.bf16.msra.mxu1 %v2274_v4  ;;  %2616 = vmatpush1.bf16.msra.mxu0 %v2276_v42  ;;  %v2303_v54 = vld [vmem:[#allocation10 + $0x120] sm:$0xff]  ;;  %v2305_v55 = vld [vmem:[#allocation10 + $0x130] sm:$0xff]  ;;  %v2302_v56 = vld [vmem:[#allocation10 + $0x118] sm:$0xff] }
 0x9b0   :  { %2535 = vmatprep.subr.bf16.mxu1 %v2282_v37  ;;  %2617 = vmatprep.subr.bf16.mxu0 %v2284_v43  ;;  %v2304_v61 = vld [vmem:[#allocation10 + $0x128] sm:$0xff]  ;;  %v2310_v28 = vld [vmem:[#allocation10 + $0x158] sm:$0xff]  ;;  %v2309_v30 = vld [vmem:[#allocation10 + $0x150] sm:$0xff] }
 0x9b1   :  { %v2312_v23 = vld [vmem:[#allocation10 + $0x168] sm:$0xff]  ;;  %v2311_v31 = vld [vmem:[#allocation10 + $0x160] sm:$0xff]  ;;  %v2317_v18 = vld [vmem:[#allocation10 + $0x190] sm:$0xff] }
 0x9b2   :  { %v2319_v32 = vld [vmem:[#allocation10 + $0x1a0] sm:$0xff]  ;;  %v2316_v57 = vld [vmem:[#allocation10 + $0x188] sm:$0xff]  ;;  %v2318_v60 = vld [vmem:[#allocation10 + $0x198] sm:$0xff] }
 0x9b3   :  { %2536 = vmatpush1.bf16.msra.mxu1 %v2281_v44  ;;  %2618 = vmatpush1.bf16.msra.mxu0 %v2283_v38  ;;  %v2324_v62 = vld [vmem:[#allocation10 + $0x1c8] sm:$0xff]  ;;  %v2326_v0 = vld [vmem:[#allocation10 + $0x1d8] sm:$0xff]  ;;  %v2323_v1 = vld [vmem:[#allocation10 + $0x1c0] sm:$0xff] }
 0x9b4   :  { %2537 = vmatprep.subr.bf16.mxu1 %v2289_v39  ;;  %2619 = vmatprep.subr.bf16.mxu0 %v2291_v40  ;;  %v2325_v2 = vld [vmem:[#allocation10 + $0x1d0] sm:$0xff]  ;;  %v2331_v3 = vld [vmem:[#allocation10 + $0x200] sm:$0xff]  ;;  %v2330_v6 = vld [vmem:[#allocation10 + $0x1f8] sm:$0xff] }
 0x9b5   :  { %v2333_v5 = vld [vmem:[#allocation10 + $0x210] sm:$0xff]  ;;  %v2332_v7 = vld [vmem:[#allocation10 + $0x208] sm:$0xff]  ;;  %v2338_v8 = vld [vmem:[#allocation10 + $0x238] sm:$0xff] }
 0x9b6   :  { %v2340_v53 = vld [vmem:[#allocation10 + $0x248] sm:$0xff]  ;;  %v2337_v11 = vld [vmem:[#allocation10 + $0x230] sm:$0xff]  ;;  %v2339_v13 = vld [vmem:[#allocation10 + $0x240] sm:$0xff] }
 0x9b7   :  { %2538 = vmatpush1.bf16.msra.mxu1 %v2288_v45  ;;  %2620 = vmatpush1.bf16.msra.mxu0 %v2290_v46  ;;  %v2345_v15 = vld [vmem:[#allocation10 + $0x270] sm:$0xff]  ;;  %v2347_v19 = vld [vmem:[#allocation10 + $0x280] sm:$0xff]  ;;  %v2344_v20 = vld [vmem:[#allocation10 + $0x268] sm:$0xff] }
 0x9b8   :  { %2539 = vmatprep.subr.bf16.mxu1 %v2296_v47  ;;  %2621 = vmatprep.subr.bf16.mxu0 %v2298_v50  ;;  %v2346_v21 = vld [vmem:[#allocation10 + $0x278] sm:$0xff]  ;;  %v2352_v63 = vld [vmem:[#allocation10 + $0x2a8] sm:$0xff]  ;;  %v2351_v33 = vld [vmem:[#allocation10 + $0x2a0] sm:$0xff]  ;;  %v4285_v50 = vpack.c.bf16 %v2256_v25, %v2256_v25 }
 0x9b9   :  { %v2354_v58 = vld [vmem:[#allocation10 + $0x2b8] sm:$0xff]  ;;  %v2353_v34 = vld [vmem:[#allocation10 + $0x2b0] sm:$0xff]  ;;  %v2359_v35 = vld [vmem:[#allocation10 + $0x2e0] sm:$0xff] }
 0x9ba   :  { %v2361_v36 = vld [vmem:[#allocation10 + $0x2f0] sm:$0xff]  ;;  %v2358_v41 = vld [vmem:[#allocation10 + $0x2d8] sm:$0xff]  ;;  %v2360_v4 = vld [vmem:[#allocation10 + $0x2e8] sm:$0xff] }
 0x9bb   :  { %2540 = vmatpush1.bf16.msra.mxu1 %v2295_v51  ;;  %2622 = vmatpush1.bf16.msra.mxu0 %v2297_v52  ;;  %v2366_v42 = vld [vmem:[#allocation10 + $0x318] sm:$0xff]  ;;  %v2368_v37 = vld [vmem:[#allocation10 + $0x328] sm:$0xff]  ;;  %v2365_v43 = vld [vmem:[#allocation10 + $0x310] sm:$0xff] }
 0x9bc   :  { %2541 = vmatprep.subr.bf16.mxu1 %v2303_v54  ;;  %2623 = vmatprep.subr.bf16.mxu0 %v2305_v55  ;;  %v2367_v44 = vld [vmem:[#allocation10 + $0x320] sm:$0xff]  ;;  %v2373_v38 = vld [vmem:[#allocation10 + $0x350] sm:$0xff]  ;;  %v2372_v40 = vld [vmem:[#allocation10 + $0x348] sm:$0xff] }
 0x9bd   :  { %v2375_v39 = vld [vmem:[#allocation10 + $0x360] sm:$0xff]  ;;  %v2374_v45 = vld [vmem:[#allocation10 + $0x358] sm:$0xff]  ;;  %v2380_v46 = vld [vmem:[#allocation10 + $0x388] sm:$0xff] }
 0x9be   :  { %v2382_v47 = vld [vmem:[#allocation10 + $0x398] sm:$0xff]  ;;  %v2379_v51 = vld [vmem:[#allocation10 + $0x380] sm:$0xff]  ;;  %v2381_v52 = vld [vmem:[#allocation10 + $0x390] sm:$0xff] }
 0x9bf   :  { %2542 = vmatpush1.bf16.msra.mxu1 %v2302_v56  ;;  %2624 = vmatpush1.bf16.msra.mxu0 %v2304_v61  ;;  %v2387_v54 = vld [vmem:[#allocation10 + $0x3c0] sm:$0xff]  ;;  %v2389_v55 = vld [vmem:[#allocation10 + $0x3d0] sm:$0xff]  ;;  %v4290_v56 = vpack.c.bf16 %v2259_v26, %v2259_v26  ;;  %v2386_v9 = vld [vmem:[#allocation10 + $0x3b8] sm:$0xff] }
 0x9c0   :  { %2543 = vmatprep.subr.bf16.mxu1 %v2310_v28  ;;  %2625 = vmatprep.subr.bf16.mxu0 %v2312_v23  ;;  %v2388_v25 = vld [vmem:[#allocation10 + $0x3c8] sm:$0xff]  ;;  %v2394_v61 = vld [vmem:[#allocation10 + $0x3f8] sm:$0xff]  ;;  %v2393_v14 = vld [vmem:[#allocation10 + $0x3f0] sm:$0xff] }
 0x9c1   :  { %v2396_v28 = vld [vmem:[#allocation10 + $0x408] sm:$0xff]  ;;  %v2395_v26 = vld [vmem:[#allocation10 + $0x400] sm:$0xff]  ;;  %v2401_v23 = vld [vmem:[#allocation10 + $0x430] sm:$0xff] }
 0x9c2   :  { %v2278_v48 = vld [vmem:[#allocation10 + $0x58] sm:$0xff] }
 0x9c3   :  { %2544 = vmatpush1.bf16.msra.mxu1 %v2309_v30  ;;  %2626 = vmatpush1.bf16.msra.mxu0 %v2311_v31  ;;  %v2403_v30 = vld [vmem:[#allocation10 + $0x440] sm:$0xff]  ;;  %v2400_v31 = vld [vmem:[#allocation10 + $0x428] sm:$0xff] }
 0x9c4   :  { %2545 = vmatprep.subr.bf16.mxu1 %v2317_v18  ;;  %2627 = vmatprep.subr.bf16.mxu0 %v2319_v32  ;;  %v2402_v18 = vld [vmem:[#allocation10 + $0x438] sm:$0xff]  ;;  %v2408_v32 = vld [vmem:[#allocation10 + $0x468] sm:$0xff] }
 0x9c7   :  { %2546 = vmatpush1.bf16.msra.mxu1 %v2316_v57  ;;  %2628 = vmatpush1.bf16.msra.mxu0 %v2318_v60  ;;  %v2410_v57 = vld [vmem:[#allocation10 + $0x478] sm:$0xff]  ;;  %v2407_v60 = vld [vmem:[#allocation10 + $0x460] sm:$0xff] }
 0x9c8   :  { %2547 = vmatprep.subr.bf16.mxu1 %v2324_v62  ;;  %2629 = vmatprep.subr.bf16.mxu0 %v2326_v0  ;;  %v2409_v62 = vld [vmem:[#allocation10 + $0x470] sm:$0xff]  ;;  %v2415_v0 = vld [vmem:[#allocation10 + $0x4a0] sm:$0xff] }
 0x9cb   :  { %2548 = vmatpush1.bf16.msra.mxu1 %v2323_v1  ;;  %2630 = vmatpush1.bf16.msra.mxu0 %v2325_v2  ;;  %v2417_v1 = vld [vmem:[#allocation10 + $0x4b0] sm:$0xff]  ;;  %v2414_v2 = vld [vmem:[#allocation10 + $0x498] sm:$0xff] }
 0x9cc   :  { %2549 = vmatprep.subr.bf16.mxu1 %v2331_v3  ;;  %2631 = vmatprep.subr.bf16.mxu0 %v2333_v5  ;;  %v2416_v3 = vld [vmem:[#allocation10 + $0x4a8] sm:$0xff]  ;;  %v2422_v5 = vld [vmem:[#allocation10 + $0x4d8] sm:$0xff] }
 0x9cf   :  { %2550 = vmatpush1.bf16.msra.mxu1 %v2330_v6  ;;  %2632 = vmatpush1.bf16.msra.mxu0 %v2332_v7  ;;  %v2424_v6 = vld [vmem:[#allocation10 + $0x4e8] sm:$0xff]  ;;  %v2421_v7 = vld [vmem:[#allocation10 + $0x4d0] sm:$0xff] }
 0x9d0   :  { %2551 = vmatprep.subr.bf16.mxu1 %v2338_v8  ;;  %2633 = vmatprep.subr.bf16.mxu0 %v2340_v53  ;;  %v2423_v8 = vld [vmem:[#allocation10 + $0x4e0] sm:$0xff]  ;;  %v2429_v53 = vld [vmem:[#allocation10 + $0x510] sm:$0xff] }
 0x9d3   :  { %2552 = vmatpush1.bf16.msra.mxu1 %v2337_v11  ;;  %2634 = vmatpush1.bf16.msra.mxu0 %v2339_v13  ;;  %v2431_v11 = vld [vmem:[#allocation10 + $0x520] sm:$0xff]  ;;  %v2428_v13 = vld [vmem:[#allocation10 + $0x508] sm:$0xff] }
 0x9d4   :  { %2553 = vmatprep.subr.bf16.mxu1 %v2345_v15  ;;  %2635 = vmatprep.subr.bf16.mxu0 %v2347_v19  ;;  %v2430_v15 = vld [vmem:[#allocation10 + $0x518] sm:$0xff]  ;;  %v2436_v19 = vld [vmem:[#allocation10 + $0x548] sm:$0xff] }
 0x9d7   :  { %2554 = vmatpush1.bf16.msra.mxu1 %v2344_v20  ;;  %2636 = vmatpush1.bf16.msra.mxu0 %v2346_v21  ;;  %v2438_v20 = vld [vmem:[#allocation10 + $0x558] sm:$0xff]  ;;  %v2435_v21 = vld [vmem:[#allocation10 + $0x540] sm:$0xff] }
 0x9d8   :  { %2555 = vmatprep.subr.bf16.mxu1 %v2352_v63  ;;  %2637 = vmatprep.subr.bf16.mxu0 %v2354_v58  ;;  %v2437_v63 = vld [vmem:[#allocation10 + $0x550] sm:$0xff]  ;;  %v2443_v58 = vld [vmem:[#allocation10 + $0x580] sm:$0xff] }
 0x9db   :  { %2556 = vmatpush1.bf16.msra.mxu1 %v2351_v33  ;;  %2638 = vmatpush1.bf16.msra.mxu0 %v2353_v34  ;;  %v2445_v33 = vld [vmem:[#allocation10 + $0x590] sm:$0xff]  ;;  %v2442_v34 = vld [vmem:[#allocation10 + $0x578] sm:$0xff] }
 0x9dc   :  { %2557 = vmatprep.subr.bf16.mxu1 %v2359_v35  ;;  %2639 = vmatprep.subr.bf16.mxu0 %v2361_v36  ;;  %v2444_v35 = vld [vmem:[#allocation10 + $0x588] sm:$0xff]  ;;  %v2450_v36 = vld [vmem:[#allocation10 + $0x5b8] sm:$0xff] }
 0x9df   :  { %2558 = vmatpush1.bf16.msra.mxu1 %v2358_v41  ;;  %2640 = vmatpush1.bf16.msra.mxu0 %v2360_v4  ;;  %v2452_v41 = vld [vmem:[#allocation10 + $0x5c8] sm:$0xff]  ;;  %v2449_v4 = vld [vmem:[#allocation10 + $0x5b0] sm:$0xff] }
 0x9e0   :  { %2559 = vmatprep.subr.bf16.mxu1 %v2366_v42  ;;  %2641 = vmatprep.subr.bf16.mxu0 %v2368_v37  ;;  %v2451_v42 = vld [vmem:[#allocation10 + $0x5c0] sm:$0xff]  ;;  %v2457_v37 = vld [vmem:[#allocation10 + $0x5f0] sm:$0xff] }
 0x9e3   :  { %2560 = vmatpush1.bf16.msra.mxu1 %v2365_v43  ;;  %2642 = vmatpush1.bf16.msra.mxu0 %v2367_v44  ;;  %v2459_v43 = vld [vmem:[#allocation10 + $0x600] sm:$0xff]  ;;  %v2456_v44 = vld [vmem:[#allocation10 + $0x5e8] sm:$0xff] }
 0x9e4   :  { %2561 = vmatprep.subr.bf16.mxu1 %v2373_v38  ;;  %2643 = vmatprep.subr.bf16.mxu0 %v2375_v39  ;;  %v2458_v38 = vld [vmem:[#allocation10 + $0x5f8] sm:$0xff]  ;;  %v2464_v39 = vld [vmem:[#allocation10 + $0x628] sm:$0xff] }
 0x9e7   :  { %2562 = vmatpush1.bf16.msra.mxu1 %v2372_v40  ;;  %2644 = vmatpush1.bf16.msra.mxu0 %v2374_v45  ;;  %v2466_v40 = vld [vmem:[#allocation10 + $0x638] sm:$0xff]  ;;  %v2463_v45 = vld [vmem:[#allocation10 + $0x620] sm:$0xff] }
 0x9e8   :  { %2572 = vmatprep.subr.bf16.mxu1 %v2380_v46  ;;  %2654 = vmatprep.subr.bf16.mxu0 %v2382_v47  ;;  %v2465_v46 = vld [vmem:[#allocation10 + $0x630] sm:$0xff]  ;;  %v2471_v47 = vld [vmem:[#allocation10 + $0x660] sm:$0xff] }
 0x9ea   :  { %2564 = vmatmul.mubr.bf16.vlgmr.msra.gmra.mrb[24].mxu1 %v4285_v50  ;;  %2646 = vmatmul.mubr.bf16.vlgmr.msra.gmra.mrb[20].mxu0 %v4285_v50 }
 0x9eb   :  { %2573 = vmatpush1.bf16.msra.mxu1 %v2379_v51  ;;  %2655 = vmatpush1.bf16.msra.mxu0 %v2381_v52  ;;  %v2473_v51 = vld [vmem:[#allocation10 + $0x670] sm:$0xff]  ;;  %v2470_v52 = vld [vmem:[#allocation10 + $0x658] sm:$0xff] }
 0x9ec   :  { %2574 = vmatprep.subr.bf16.mxu1 %v2387_v54  ;;  %2656 = vmatprep.subr.bf16.mxu0 %v2389_v55  ;;  %v2472_v54 = vld [vmem:[#allocation10 + $0x668] sm:$0xff]  ;;  %v2478_v55 = vld [vmem:[#allocation10 + $0x698] sm:$0xff] }
 0x9ed   :  { %2604 = vmatprep.mubr.bf16.mxu1 %v4290_v56  ;;  %2686 = vmatprep.mubr.bf16.mxu0 %v4290_v56 }
 0x9ef   :  { %2575 = vmatpush1.bf16.msra.mxu1 %v2386_v9  ;;  %2657 = vmatpush1.bf16.msra.mxu0 %v2388_v25  ;;  %v2480_v9 = vld [vmem:[#allocation10 + $0x6a8] sm:$0xff]  ;;  %v2477_v25 = vld [vmem:[#allocation10 + $0x690] sm:$0xff] }
 0x9f0   :  { %2576 = vmatprep.subr.bf16.mxu1 %v2394_v61  ;;  %2658 = vmatprep.subr.bf16.mxu0 %v2396_v28  ;;  %v2479_v61 = vld [vmem:[#allocation10 + $0x6a0] sm:$0xff]  ;;  %v2485_v28 = vld [vmem:[#allocation10 + $0x6d0] sm:$0xff] }
 0x9f3   :  { %2577 = vmatpush1.bf16.msra.mxu1 %v2393_v14  ;;  %2659 = vmatpush1.bf16.msra.mxu0 %v2395_v26  ;;  %v2487_v14 = vld [vmem:[#allocation10 + $0x6e0] sm:$0xff]  ;;  %v2484_v26 = vld [vmem:[#allocation10 + $0x6c8] sm:$0xff] }
 0x9f4   :  { %2578 = vmatprep.subr.bf16.mxu1 %v2401_v23  ;;  %2660 = vmatprep.subr.bf16.mxu0 %v2403_v30  ;;  %v2486_v23 = vld [vmem:[#allocation10 + $0x6d8] sm:$0xff]  ;;  %v2272_v30 = vld [vmem:[#allocation10 + $0x28] sm:$0xff] }
 0x9f7   :  { %2579 = vmatpush1.bf16.msra.mxu1 %v2400_v31  ;;  %2661 = vmatpush1.bf16.msra.mxu0 %v2402_v18  ;;  %v2329_v31 = vld [vmem:[#allocation10 + $0x1f0] sm:$0xff]  ;;  %v4299_v18 = vpack.c.bf16 %v2258_v29, %v2258_v29  ;;  %v2280_v29 = vld [vmem:[#allocation10 + $0x68] sm:$0xff] }
 0x9f8   :  { %2580 = vmatprep.subr.bf16.mxu1 %v2408_v32  ;;  %2662 = vmatprep.subr.bf16.mxu0 %v2410_v57  ;;  %v2271_v32 = vld [vmem:[#allocation10 + $0x20] sm:$0xff]  ;;  %v2273_v57 = vld [vmem:[#allocation10 + $0x30] sm:$0xff] }
 0x9fb   :  { %2581 = vmatpush1.bf16.msra.mxu1 %v2407_v60  ;;  %2663 = vmatpush1.bf16.msra.mxu0 %v2409_v62  ;;  %v2279_v60 = vld [vmem:[#allocation10 + $0x60] sm:$0xff]  ;;  %v2336_v62 = vld [vmem:[#allocation10 + $0x228] sm:$0xff] }
 0x9fc   :  { %2582 = vmatprep.subr.bf16.mxu1 %v2415_v0  ;;  %2664 = vmatprep.subr.bf16.mxu0 %v2417_v1  ;;  %v2909_v0 = vmul.f32 %v4242_v59, %v4242_v59  ;;  %v2287_v59 = vld [vmem:[#allocation10 + $0xa0] sm:$0xff] }
 0x9fe   :  { %v2912_v1 = vadd.f32 1e-08, %v2909_v0 }
 0x9ff   :  { %2583 = vmatpush1.bf16.msra.mxu1 %v2414_v2  ;;  %2665 = vmatpush1.bf16.msra.mxu0 %v2416_v3  ;;  %v2286_v2 = vld [vmem:[#allocation10 + $0x98] sm:$0xff]  ;;  %v2343_v3 = vld [vmem:[#allocation10 + $0x260] sm:$0xff] }
 0xa00   :  { %2584 = vmatprep.subr.bf16.mxu1 %v2422_v5  ;;  %2666 = vmatprep.subr.bf16.mxu0 %v2424_v6  ;;  %3313 = vlog2.f32 %v2912_v1  ;;  %v2285_v5 = vld [vmem:[#allocation10 + $0x90] sm:$0xff]  ;;  %v2420_v1 = vld [vmem:[#allocation10 + $0x4c8] sm:$0xff] }
 0xa01   :  { %v2293_v6 = vld [vmem:[#allocation10 + $0xd0] sm:$0xff] }
 0xa03   :  { %2585 = vmatpush1.bf16.msra.mxu1 %v2421_v7  ;;  %2667 = vmatpush1.bf16.msra.mxu0 %v2423_v8  ;;  %v2350_v7 = vld [vmem:[#allocation10 + $0x298] sm:$0xff]  ;;  %v2910_v8 = vmul.f32 %v4227_v49, %v4227_v49 }
 0xa04   :  { %2586 = vmatprep.subr.bf16.mxu1 %v2429_v53  ;;  %2668 = vmatprep.subr.bf16.mxu0 %v2431_v11  ;;  %v2292_v53 = vld [vmem:[#allocation10 + $0xc8] sm:$0xff]  ;;  %v2294_v11 = vld [vmem:[#allocation10 + $0xd8] sm:$0xff] }
 0xa07   :  { %2587 = vmatpush1.bf16.msra.mxu1 %v2428_v13  ;;  %2669 = vmatpush1.bf16.msra.mxu0 %v2430_v15  ;;  %v2300_v13 = vld [vmem:[#allocation10 + $0x108] sm:$0xff]  ;;  %v2911_v15 = vadd.f32 %v2910_v8, %v2909_v0  ;;  %v2363_v0 = vld [vmem:[#allocation10 + $0x300] sm:$0xff] }
 0xa08   :  { %2588 = vmatprep.subr.bf16.mxu1 %v2436_v19  ;;  %2670 = vmatprep.subr.bf16.mxu0 %v2438_v20  ;;  %v2299_v20 = vld [vmem:[#allocation10 + $0x100] sm:$0xff]  ;;  %v2376_v8 = vld [vmem:[#allocation10 + $0x368] sm:$0xff] }
 0xa0a   :  { %v3314_v19 = vpop.eup %3313 }
 0xa0b   :  { %2589 = vmatpush1.bf16.msra.mxu1 %v2435_v21  ;;  %2671 = vmatpush1.bf16.msra.mxu0 %v2437_v63  ;;  %v2301_v21 = vld [vmem:[#allocation10 + $0x110] sm:$0xff]  ;;  %v2907_v63 = vand.u32 127, %v1254_v22  ;;  %v2315_v22 = vld [vmem:[#allocation10 + $0x180] sm:$0xff] }
 0xa0c   :  { %2590 = vmatprep.subr.bf16.mxu1 %v2443_v58  ;;  %2672 = vmatprep.subr.bf16.mxu0 %v2445_v33  ;;  %v2307_v58 = vld [vmem:[#allocation10 + $0x140] sm:$0xff]  ;;  %v2364_v33 = vld [vmem:[#allocation10 + $0x308] sm:$0xff] }
 0xa0d   :  { %vm2908_vm2 = vcmp.lt.s32.totalorder %v2907_v63, 50  ;;  %v2404_v63 = vld [vmem:[#allocation10 + $0x448] sm:$0xff] }
 0xa0f   :  { %2591 = vmatpush1.bf16.msra.mxu1 %v2442_v34  ;;  %2673 = vmatpush1.bf16.msra.mxu0 %v2444_v35  ;;  %v2914_v34 = vmul.f32 0.6931472, %v3314_v19  ;;  %v2306_v35 = vld [vmem:[#allocation10 + $0x138] sm:$0xff] }
 0xa10   :  { %2592 = vmatprep.subr.bf16.mxu1 %v2450_v36  ;;  %2674 = vmatprep.subr.bf16.mxu0 %v2452_v41  ;;  %v2308_v36 = vld [vmem:[#allocation10 + $0x148] sm:$0xff]  ;;  %v2314_v41 = vld [vmem:[#allocation10 + $0x178] sm:$0xff] }
 0xa11   :  { %v2915_v49 = vsub.f32 %v2911_v15, %v2914_v34  ;;  %v2390_v15 = vld [vmem:[#allocation10 + $0x3d8] sm:$0xff] }
 0xa12   :  { %v2398_v19 = vld [vmem:[#allocation10 + $0x418] sm:$0xff] }
 0xa13   :  { %2593 = vmatpush1.bf16.msra.mxu1 %v2449_v4  ;;  %2675 = vmatpush1.bf16.msra.mxu0 %v2451_v42  ;;  %v2371_v4 = vld [vmem:[#allocation10 + $0x340] sm:$0xff]  ;;  %v3072_v42 = vadd.f32 -1.0, %v2915_v49  ;;  %v2418_v34 = vld [vmem:[#allocation10 + $0x4b8] sm:$0xff] }
 0xa14   :  { %2594 = vmatprep.subr.bf16.mxu1 %v2457_v37  ;;  %2676 = vmatprep.subr.bf16.mxu0 %v2459_v43  ;;  %v2313_v43 = vld [vmem:[#allocation10 + $0x170] sm:$0xff]  ;;  %v2426_v49 = vld [vmem:[#allocation10 + $0x4f8] sm:$0xff] }
 0xa15   :  { %v2917_v37 = vsel %vm2908_vm2, %v3072_v42, 0.0  ;;  %v2447_v42 = vld [vmem:[#allocation10 + $0x5a0] sm:$0xff] }
 0xa16   :  { %2918 = vadd.xlane.f32.xlu0 %v2917_v37  ;;  %v2446_v37 = vld [vmem:[#allocation10 + $0x598] sm:$0xff] }
 0xa17   :  { %2595 = vmatpush1.bf16.msra.mxu1 %v2456_v44  ;;  %2677 = vmatpush1.bf16.msra.mxu0 %v2458_v38  ;;  %v2321_v44 = vld [vmem:[#allocation10 + $0x1b0] sm:$0xff]  ;;  %v2378_v38 = vld [vmem:[#allocation10 + $0x378] sm:$0xff] }
 0xa18   :  { %2596 = vmatprep.subr.bf16.mxu1 %v2464_v39  ;;  %2678 = vmatprep.subr.bf16.mxu0 %v2466_v40  ;;  %v2320_v39 = vld [vmem:[#allocation10 + $0x1a8] sm:$0xff]  ;;  %v2322_v40 = vld [vmem:[#allocation10 + $0x1b8] sm:$0xff] }
 0xa1b   :  { %2597 = vmatpush1.bf16.msra.mxu1 %v2463_v45  ;;  %2679 = vmatpush1.bf16.msra.mxu0 %v2465_v46  ;;  %v2328_v45 = vld [vmem:[#allocation10 + $0x1e8] sm:$0xff]  ;;  %v2441_v46 = vld [vmem:[#allocation10 + $0x570] sm:$0xff] }
 0xa1c   :  { %2598 = vmatprep.subr.bf16.mxu1 %v2471_v47  ;;  %2680 = vmatprep.subr.bf16.mxu0 %v2473_v51  ;;  %v2327_v47 = vld [vmem:[#allocation10 + $0x1e0] sm:$0xff]  ;;  %v2385_v51 = vld [vmem:[#allocation10 + $0x3b0] sm:$0xff] }
 0xa1f   :  { %2599 = vmatpush1.bf16.msra.mxu1 %v2470_v52  ;;  %2681 = vmatpush1.bf16.msra.mxu0 %v2472_v54  ;;  %v2335_v52 = vld [vmem:[#allocation10 + $0x220] sm:$0xff]  ;;  %v2448_v54 = vld [vmem:[#allocation10 + $0x5a8] sm:$0xff] }
 0xa20   :  { %2600 = vmatprep.subr.bf16.mxu1 %v2478_v55  ;;  %2682 = vmatprep.subr.bf16.mxu0 %v2480_v9  ;;  %v2334_v55 = vld [vmem:[#allocation10 + $0x218] sm:$0xff]  ;;  %v2392_v9 = vld [vmem:[#allocation10 + $0x3e8] sm:$0xff] }
 0xa23   :  { %2601 = vmatpush1.bf16.msra.mxu1 %v2477_v25  ;;  %2683 = vmatpush1.bf16.msra.mxu0 %v2479_v61  ;;  %v2342_v25 = vld [vmem:[#allocation10 + $0x258] sm:$0xff]  ;;  %v2455_v61 = vld [vmem:[#allocation10 + $0x5e0] sm:$0xff] }
 0xa24   :  { %2602 = vmatprep.subr.bf16.mxu1 %v2485_v28  ;;  %2684 = vmatprep.subr.bf16.mxu0 %v2487_v14  ;;  %v2341_v28 = vld [vmem:[#allocation10 + $0x250] sm:$0xff]  ;;  %v2399_v14 = vld [vmem:[#allocation10 + $0x420] sm:$0xff] }
 0xa27   :  { %2603 = vmatpush1.bf16.msra.mxu1 %v2484_v26  ;;  %2685 = vmatpush1.bf16.msra.mxu0 %v2486_v23  ;;  %v2349_v26 = vld [vmem:[#allocation10 + $0x290] sm:$0xff]  ;;  %v2462_v23 = vld [vmem:[#allocation10 + $0x618] sm:$0xff] }
 0xa28   :  { %2695 = vmatprep.subr.bf16.mxu1 %v2272_v30  ;;  %3131 = vmatprep.subr.bf16.mxu0 %v2329_v31  ;;  %v2348_v30 = vld [vmem:[#allocation10 + $0x288] sm:$0xff]  ;;  %v2406_v31 = vld [vmem:[#allocation10 + $0x458] sm:$0xff] }
 0xa2a   :  { %2605 = vmatmul.mubr.bf16.vlgmr.msra.gmra.mrb[24].mxu1 %v4299_v18  ;;  %2687 = vmatmul.mubr.bf16.vlgmr.msra.gmra.mrb[20].mxu0 %v4299_v18 }
 0xa2b   :  { %2696 = vmatpush1.bf16.msra.mxu1 %v2271_v32  ;;  %3132 = vmatpush3.bf16.msra.mxu0 %v2273_v57  ;;  %v2356_v32 = vld [vmem:[#allocation10 + $0x2c8] sm:$0xff]  ;;  %v2469_v57 = vld [vmem:[#allocation10 + $0x650] sm:$0xff] }
 0xa2c   :  { %2697 = vmatprep.subr.bf16.mxu1 %v2279_v60  ;;  %3133 = vmatprep.subr.bf16.mxu0 %v2336_v62  ;;  %v2355_v60 = vld [vmem:[#allocation10 + $0x2c0] sm:$0xff]  ;;  %v2413_v62 = vld [vmem:[#allocation10 + $0x490] sm:$0xff] }
 0xa2d   :  { %2727 = vmatprep.mubr.bf16.mxu1 %v4278_v27  ;;  %2809 = vmatprep.mubr.bf16.mxu0 %v4278_v27  ;;  %v2357_v27 = vld [vmem:[#allocation10 + $0x2d0] sm:$0xff] }
 0xa2f   :  { %2698 = vmatpush1.bf16.msra.mxu1 %v2278_v48  ;;  %3134 = vmatpush3.bf16.msra.mxu0 %v2280_v29  ;;  %v2476_v48 = vld [vmem:[#allocation10 + $0x688] sm:$0xff]  ;;  %v2362_v29 = vld [vmem:[#allocation10 + $0x2f8] sm:$0xff] }
 0xa30   :  { %2699 = vmatprep.subr.bf16.mxu1 %v2286_v2  ;;  %3135 = vmatprep.subr.bf16.mxu0 %v2343_v3  ;;  %v2370_v2 = vld [vmem:[#allocation10 + $0x338] sm:$0xff]  ;;  %v2483_v3 = vld [vmem:[#allocation10 + $0x6c0] sm:$0xff] }
 0xa33   :  { %2700 = vmatpush1.bf16.msra.mxu1 %v2285_v5  ;;  %3136 = vmatpush3.bf16.msra.mxu0 %v2287_v59  ;;  %v2369_v5 = vld [vmem:[#allocation10 + $0x330] sm:$0xff]  ;;  %v2427_v59 = vld [vmem:[#allocation10 + $0x500] sm:$0xff] }
 0xa34   :  { %2701 = vmatprep.subr.bf16.mxu1 %v2293_v6  ;;  %3137 = vmatprep.subr.bf16.mxu0 %v2350_v7  ;;  %v2377_v6 = vld [vmem:[#allocation10 + $0x370] sm:$0xff]  ;;  %v2490_v7 = vld [vmem:[#allocation10 + $0x6f8] sm:$0xff] }
 0xa37   :  { %2702 = vmatpush1.bf16.msra.mxu1 %v2292_v53  ;;  %3138 = vmatpush3.bf16.msra.mxu0 %v2294_v11  ;;  %v2434_v53 = vld [vmem:[#allocation10 + $0x538] sm:$0xff]  ;;  %v2384_v11 = vld [vmem:[#allocation10 + $0x3a8] sm:$0xff] }
 0xa38   :  { %2703 = vmatprep.subr.bf16.mxu1 %v2300_v13  ;;  %3139 = vmatprep.subr.bf16.mxu0 %v2357_v27  ;;  %v2383_v13 = vld [vmem:[#allocation10 + $0x3a0] sm:$0xff] }
 0xa39   :  { %v2391_v27 = vld [vmem:[#allocation10 + $0x3e0] sm:$0xff] }
 0xa3b   :  { %2704 = vmatpush1.bf16.msra.mxu1 %v2299_v20  ;;  %3140 = vmatpush3.bf16.msra.mxu0 %v2301_v21  ;;  %v2397_v20 = vld [vmem:[#allocation10 + $0x410] sm:$0xff] }
 0xa3c   :  { %2705 = vmatprep.subr.bf16.mxu1 %v2307_v58  ;;  %3141 = vmatprep.subr.bf16.mxu0 %v2364_v33  ;;  %v2405_v21 = vld [vmem:[#allocation10 + $0x450] sm:$0xff]  ;;  %v2412_v58 = vld [vmem:[#allocation10 + $0x488] sm:$0xff]  ;;  %v2411_v33 = vld [vmem:[#allocation10 + $0x480] sm:$0xff] }
 0xa3f   :  { %2706 = vmatpush1.bf16.msra.mxu1 %v2306_v35  ;;  %3142 = vmatpush3.bf16.msra.mxu0 %v2308_v36  ;;  %v2433_v35 = vld [vmem:[#allocation10 + $0x530] sm:$0xff]  ;;  %v2432_v36 = vld [vmem:[#allocation10 + $0x528] sm:$0xff] }
 0xa40   :  { %2707 = vmatprep.subr.bf16.mxu1 %v2314_v41  ;;  %3143 = vmatprep.subr.bf16.mxu0 %v2371_v4  ;;  %v2440_v41 = vld [vmem:[#allocation10 + $0x568] sm:$0xff]  ;;  %v2439_v4 = vld [vmem:[#allocation10 + $0x560] sm:$0xff] }
 0xa43   :  { %2708 = vmatpush1.bf16.msra.mxu1 %v2313_v43  ;;  %3144 = vmatpush3.bf16.msra.mxu0 %v2315_v22  ;;  %v2454_v43 = vld [vmem:[#allocation10 + $0x5d8] sm:$0xff]  ;;  %v2453_v22 = vld [vmem:[#allocation10 + $0x5d0] sm:$0xff] }
 0xa44   :  { %2709 = vmatprep.subr.bf16.mxu1 %v2321_v44  ;;  %3145 = vmatprep.subr.bf16.mxu0 %v2378_v38  ;;  %v2461_v44 = vld [vmem:[#allocation10 + $0x610] sm:$0xff]  ;;  %v2460_v38 = vld [vmem:[#allocation10 + $0x608] sm:$0xff] }
 0xa47   :  { %2710 = vmatpush1.bf16.msra.mxu1 %v2320_v39  ;;  %3146 = vmatpush3.bf16.msra.mxu0 %v2322_v40  ;;  %v2468_v39 = vld [vmem:[#allocation10 + $0x648] sm:$0xff]  ;;  %v2467_v40 = vld [vmem:[#allocation10 + $0x640] sm:$0xff] }
 0xa48   :  { %2711 = vmatprep.subr.bf16.mxu1 %v2328_v45  ;;  %3153 = vmatprep.subr.bf16.mxu0 %v2441_v46  ;;  %v2475_v45 = vld [vmem:[#allocation10 + $0x680] sm:$0xff]  ;;  %v2474_v46 = vld [vmem:[#allocation10 + $0x678] sm:$0xff] }
 0xa4a   :  { %2810 = vmatmul.mubr.bf16.vlgmr.msra.gmra.mrb[24].mxu0 %v4285_v50 }
 0xa4b   :  { %2712 = vmatpush1.bf16.msra.mxu1 %v2327_v47  ;;  %3154 = vmatpush3.bf16.msra.mxu0 %v2385_v51  ;;  %v2482_v47 = vld [vmem:[#allocation10 + $0x6b8] sm:$0xff]  ;;  %v2481_v51 = vld [vmem:[#allocation10 + $0x6b0] sm:$0xff] }
 0xa4c   :  { %2713 = vmatprep.subr.bf16.mxu1 %v2335_v52  ;;  %3155 = vmatprep.subr.bf16.mxu0 %v2448_v54  ;;  %v2489_v52 = vld [vmem:[#allocation10 + $0x6f0] sm:$0xff]  ;;  %v2488_v54 = vld [vmem:[#allocation10 + $0x6e8] sm:$0xff] }
 0xa4d   :  { %2849 = vmatprep.mubr.bf16.mxu0 %v4290_v56 }
 0xa4f   :  { %2714 = vmatpush1.bf16.msra.mxu1 %v2334_v55  ;;  %3156 = vmatpush3.bf16.msra.mxu0 %v2392_v9 }
 0xa50   :  { %2715 = vmatprep.subr.bf16.mxu1 %v2342_v25  ;;  %3157 = vmatprep.subr.bf16.mxu0 %v2455_v61 }
 0xa53   :  { %2716 = vmatpush1.bf16.msra.mxu1 %v2341_v28  ;;  %3158 = vmatpush3.bf16.msra.mxu0 %v2399_v14 }
 0xa54   :  { %2717 = vmatprep.subr.bf16.mxu1 %v2349_v26  ;;  %3159 = vmatprep.subr.bf16.mxu0 %v2462_v23  ;;  %v2492_v23 = vld [vmem:[#allocation12 + $0x38] ss:$8 sm:$0xf] }
 0xa57   :  { %2718 = vmatpush1.bf16.msra.mxu1 %v2348_v30  ;;  %3160 = vmatpush3.bf16.msra.mxu0 %v2406_v31  ;;  %v2493_v30 = vld [vmem:[#allocation12 + $0x38] ss:$8 sm:$0xf0] }
 0xa58   :  { %2719 = vmatprep.subr.bf16.mxu1 %v2356_v32  ;;  %3161 = vmatprep.subr.bf16.mxu0 %v2469_v57  ;;  %v4316_v31 = vor.u32 %v2493_v30, %v2492_v23 }
 0xa5a   :  { %v2499_v32 = vrot.slane %v4316_v31, %v4158_v12  ;;  %v2507_v57 = vrot.slane %v4316_v31, %v4166_v16 }
 0xa5b   :  { %2720 = vmatpush1.bf16.msra.mxu1 %v2355_v60  ;;  %3162 = vmatpush3.bf16.msra.mxu0 %v2413_v62  ;;  %v2511_v60 = vrot.slane %v4316_v31, %v4169_v17 }
 0xa5c   :  { %2721 = vmatprep.subr.bf16.mxu1 %v2363_v0  ;;  %3163 = vmatprep.subr.bf16.mxu0 %v2476_v48 }
 0xa5f   :  { %2722 = vmatpush1.bf16.msra.mxu1 %v2362_v29  ;;  %3164 = vmatpush3.bf16.msra.mxu0 %v2420_v1 }
 0xa60   :  { %2723 = vmatprep.subr.bf16.mxu1 %v2370_v2  ;;  %3165 = vmatprep.subr.bf16.mxu0 %v2483_v3 }
 0xa63   :  { %2724 = vmatpush1.bf16.msra.mxu1 %v2369_v5  ;;  %3166 = vmatpush3.bf16.msra.mxu0 %v2427_v59 }
 0xa64   :  { %2725 = vmatprep.subr.bf16.mxu1 %v2377_v6  ;;  %3167 = vmatprep.subr.bf16.mxu0 %v2490_v7 }
 0xa67   :  { %2726 = vmatpush1.bf16.msra.mxu1 %v2376_v8  ;;  %3168 = vmatpush3.bf16.msra.mxu0 %v2434_v53 }
 0xa68   :  { %2736 = vmatprep.subr.bf16.mxu1 %v2384_v11 }
 0xa6a   :  { %2728 = vmatmul.mubr.bf16.vlgmr.msra.gmra.mrb[28].mxu1 %v4285_v50  ;;  %2850 = vmatmul.mubr.bf16.vlgmr.msra.gmra.mrb[28].mxu0 %v4299_v18  ;;  %v2419_v50 = vld [vmem:[#allocation10 + $0x4c0] sm:$0xff] }
 0xa6b   :  { %2737 = vmatpush1.bf16.msra.mxu1 %v2383_v13  ;;  %2768 = vmatprep.mubr.bf16.mxu1 %v4290_v56  ;;  %v2425_v56 = vld [vmem:[#allocation10 + $0x4f0] sm:$0xff] }
 0xa6c   :  { %2738 = vmatprep.subr.bf16.mxu1 %v2391_v27 }
 0xa6f   :  { %2739 = vmatpush1.bf16.msra.mxu1 %v2390_v15 }
 0xa70   :  { %2740 = vmatprep.subr.bf16.mxu1 %v2398_v19 }
 0xa73   :  { %2741 = vmatpush1.bf16.msra.mxu1 %v2397_v20 }
 0xa74   :  { %2742 = vmatprep.subr.bf16.mxu1 %v2405_v21 }
 0xa77   :  { %2743 = vmatpush1.bf16.msra.mxu1 %v2404_v63 }
 0xa78   :  { %2744 = vmatprep.subr.bf16.mxu1 %v2412_v58 }
 0xa7b   :  { %2745 = vmatpush1.bf16.msra.mxu1 %v2411_v33 }
 0xa7c   :  { %2746 = vmatprep.subr.bf16.mxu1 %v2419_v50 }
 0xa7f   :  { %2747 = vmatpush1.bf16.msra.mxu1 %v2418_v34 }
 0xa80   :  { %2748 = vmatprep.subr.bf16.mxu1 %v2426_v49 }
 0xa83   :  { %2749 = vmatpush1.bf16.msra.mxu1 %v2425_v56 }
 0xa84   :  { %2750 = vmatprep.subr.bf16.mxu1 %v2433_v35 }
 0xa87   :  { %2751 = vmatpush1.bf16.msra.mxu1 %v2432_v36 }
 0xa88   :  { %2752 = vmatprep.subr.bf16.mxu1 %v2440_v41 }
 0xa8b   :  { %2753 = vmatpush1.bf16.msra.mxu1 %v2439_v4 }
 0xa8c   :  { %2754 = vmatprep.subr.bf16.mxu1 %v2447_v42 }
 0xa8f   :  { %2755 = vmatpush1.bf16.msra.mxu1 %v2446_v37 }
 0xa90   :  { %2756 = vmatprep.subr.bf16.mxu1 %v2454_v43 }
 0xa93   :  { %2757 = vmatpush1.bf16.msra.mxu1 %v2453_v22 }
 0xa94   :  { %2758 = vmatprep.subr.bf16.mxu1 %v2461_v44 }
 0xa97   :  { %2759 = vmatpush1.bf16.msra.mxu1 %v2460_v38 }
 0xa98   :  { %2760 = vmatprep.subr.bf16.mxu1 %v2468_v39 }
 0xa9b   :  { %2761 = vmatpush1.bf16.msra.mxu1 %v2467_v40 }
 0xa9c   :  { %2762 = vmatprep.subr.bf16.mxu1 %v2475_v45 }
 0xa9f   :  { %2763 = vmatpush1.bf16.msra.mxu1 %v2474_v46 }
 0xaa0   :  { %2764 = vmatprep.subr.bf16.mxu1 %v2482_v47 }
 0xaa3   :  { %2765 = vmatpush1.bf16.msra.mxu1 %v2481_v51  ;;  %v2919_v55 = vpop.xlane.xlu0 %2918 }
 0xaa4   :  { %2766 = vmatprep.subr.bf16.mxu1 %v2489_v52  ;;  %v2920_v9 = vrot.slane %v2919_v55, 4 }
 0xaa6   :  { %v2921_v25 = vadd.f32 %v2920_v9, %v2919_v55 }
 0xaa7   :  { %2767 = vmatpush1.bf16.msra.mxu1 %v2488_v54 }
 0xaa8   :  { %v2922_v61 = vrot.slane %v2921_v25, 2 }
 0xaaa   :  { %2769 = vmatmul.mubr.bf16.vlgmr.msra.gmra.mrb[28].mxu1 %v4299_v18  ;;  %v2923_v28 = vadd.f32 %v2922_v61, %v2921_v25  ;;  %v2503_v18 = vrot.slane %v4316_v31, %v4161_v24 }
 0xaac   :  { %v2924_v14 = vrot.slane %v2923_v28, 1 }
 0xaae   :  { %v2925_v26 = vadd.f32 %v2924_v14, %v2923_v28 }
 0xab0   :  { %3285 = vpush %v2925_v26 }
 0xae1   :  { %s3286_s1 = spop %3285 }
 0xae2   :  { %s2927_s5 = smul.f32 0.5, %s3286_s1 }
 0xae4   :  { %s2930_s30 = smul.f32 0.00015943877, %s2927_s5 }
 0xae6   :  { %2932 = sst [smem:[#allocation15]] %s2930_s30 }
 0xafd   :  { %v2606_v62 = vpop.f32.mrb[24].mxu1  ;;  %v2688_v0 = vpop.f32.mrb[20].mxu0 }
 0xafe   :  { %v3243_v48 = vadd.f32 %v2606_v62, %v2499_v32  ;;  %v3245_v29 = vadd.f32 %v2688_v0, %v2507_v57  ;;  %v2608_v1 = vpop.f32.mrb[25].mxu1  ;;  %v2690_v2 = vpop.f32.mrb[21].mxu0 }
 0xaff   :  { %v3244_v3 = vadd.f32 %v2608_v1, %v2503_v18  ;;  %v3246_v5 = vadd.f32 %v2690_v2, %v2511_v60  ;;  %v2610_v59 = vpop.f32.mrb[26].mxu1  ;;  %v2692_v6 = vpop.f32.mrb[22].mxu0 }
 0xb00   :  { %v3065_v12 = vmul.f32 -1.442695, %v3243_v48  ;;  %v3067_v7 = vmul.f32 -1.442695, %v3245_v29  ;;  %v2611_v8 = vpop.f32.mrb[27].mxu1  ;;  %v2693_v16 = vpop.f32.mrb[23].mxu0 }
 0xb01   :  { %v3066_v53 = vmul.f32 -1.442695, %v3244_v3  ;;  %v3068_v11 = vmul.f32 -1.442695, %v3246_v5 }
 0xb02   :  { %3315 = vpow2.f32 %v3065_v12 }
 0xb03   :  { %3317 = vpow2.f32 %v3067_v7 }
 0xb04   :  { %3319 = vpow2.f32 %v3066_v53 }
 0xb05   :  { %3321 = vpow2.f32 %v3068_v11 }
 0xb0c   :  { %v3316_v24 = vpop.eup %3315 }
 0xb0d   :  { %v3318_v17 = vpop.eup %3317  ;;  %v2878_v13 = vadd.f32 1.0, %v3316_v24 }
 0xb0e   :  { %v3320_v27 = vpop.eup %3319  ;;  %v2880_v15 = vadd.f32 1.0, %v3318_v17 }
 0xb0f   :  { %v3322_v19 = vpop.eup %3321  ;;  %3323 = vrcp.f32 %v2878_v13  ;;  %v2879_v20 = vadd.f32 1.0, %v3320_v27 }
 0xb10   :  { %3325 = vrcp.f32 %v2880_v15  ;;  %v2881_v21 = vadd.f32 1.0, %v3322_v19 }
 0xb11   :  { %3327 = vrcp.f32 %v2879_v20 }
 0xb12   :  { %3329 = vrcp.f32 %v2881_v21 }
 0xb19   :  { %v3324_v63 = vpop.eup %3323 }
 0xb1a   :  { %v3326_v58 = vpop.eup %3325  ;;  %2899 = vst [vmem:[%s4377_s12] sm:$0xff] %v3324_v63 }
 0xb1b   :  { %v3328_v33 = vpop.eup %3327  ;;  %2901 = vst [vmem:[%s4377_s12 + $0x10] sm:$0xff] %v3326_v58 }
 0xb1c   :  { %v3330_v50 = vpop.eup %3329  ;;  %2900 = vst [vmem:[%s4377_s12 + $0x8] sm:$0xff] %v3328_v33 }
 0xb1d   :  { %3418 = shalt.err (!%p3415_p12)
}
 0xb1e   :  { %s3466_s19 = smov [#allocation15]   ;;  %2902 = vst [vmem:[%s4377_s12 + $0x18] sm:$0xff] %v3330_v50  ;;  %v3147_v34 = vpop.f32.mrb[24].mxu0  ;;  %v2522_v41 = vsub.s32 6, %v4155_v10  ;;  %v2514_v51 = vsub.s32 4, %v4155_v10  ;;  %v2518_v52 = vsub.s32 5, %v4155_v10 }
 0xb1f   :  { %2942 = dma.smem_to_hbm %s3466_s19, 16, %s4378_s13, [#allocation14]   ;;  %v3148_v49 = vpop.f32.mrb[25].mxu0 }
 0xb20   :  { %v3149_v56 = vadd.f32 %v3148_v49, %v3147_v34  ;;  %v3150_v35 = vpop.f32.mrb[26].mxu0  ;;  %v2523_v4 = vrot.slane %v4316_v31, %v2522_v41  ;;  %v2515_v54 = vrot.slane %v4316_v31, %v2514_v51  ;;  %v2519_v55 = vrot.slane %v4316_v31, %v2518_v52 }
 0xb21   :  { %v3151_v36 = vpop.f32.mrb[27].mxu0 }
 0xb22   :  { %v2812_v42 = vadd.f32 %v3149_v56, %v2523_v4 }
 0xb3d   :  { %v3169_v37 = vpop.f32.mrb[28].mxu0 }
 0xb3e   :  { %v3170_v43 = vpop.f32.mrb[29].mxu0 }
 0xb3f   :  { %v3171_v22 = vadd.f32 %v3170_v43, %v3169_v37  ;;  %v3172_v44 = vpop.f32.mrb[30].mxu0 }
 0xb40   :  { %v3173_v38 = vpop.f32.mrb[31].mxu0 }
 0xb41   :  { %v2852_v39 = vadd.f32 %v3171_v22, %v2812_v42 }
 0xb43   :  { %v3071_v40 = vmul.f32 -1.442695, %v2852_v39 }
 0xb45   :  { %3331 = vpow2.f32 %v3071_v40 }
 0xb4f   :  { %v3332_v45 = vpop.eup %3331 }
 0xb50   :  { %v2884_v46 = vadd.f32 1.0, %v3332_v45 }
 0xb52   :  { %3333 = vrcp.f32 %v2884_v46 }
 0xb5c   :  { %v3334_v47 = vpop.eup %3333 }
 0xb5d   :  { %2905 = vst [vmem:[%s4377_s12 + $0x30] sm:$0xff] %v3334_v47 }
 0xb7d   :  { %v2770_v9 = vpop.f32.mrb[28].mxu1 }
 0xb7e   :  { %v3247_v25 = vadd.f32 %v2770_v9, %v2515_v54  ;;  %v2772_v61 = vpop.f32.mrb[29].mxu1 }
 0xb7f   :  { %v3248_v28 = vadd.f32 %v2772_v61, %v2519_v55  ;;  %v2774_v14 = vpop.f32.mrb[30].mxu1 }
 0xb80   :  { %v3069_v26 = vmul.f32 -1.442695, %v3247_v25  ;;  %v2775_v23 = vpop.f32.mrb[31].mxu1 }
 0xb81   :  { %v3070_v30 = vmul.f32 -1.442695, %v3248_v28 }
 0xb82   :  { %3335 = vpow2.f32 %v3069_v26 }
 0xb83   :  { %3337 = vpow2.f32 %v3070_v30 }
 0xb8c   :  { %v3336_v32 = vpop.eup %3335 }
 0xb8d   :  { %v3338_v57 = vpop.eup %3337  ;;  %v2882_v18 = vadd.f32 1.0, %v3336_v32 }
 0xb8e   :  { %v2883_v60 = vadd.f32 1.0, %v3338_v57 }
 0xb8f   :  { %3339 = vrcp.f32 %v2882_v18 }
 0xb90   :  { %3341 = vrcp.f32 %v2883_v60 }
 0xb99   :  { %v3340_v10 = vpop.eup %3339 }
 0xb9a   :  { %v3342_v62 = vpop.eup %3341  ;;  %2903 = vst [vmem:[%s4377_s12 + $0x20] sm:$0xff] %v3340_v10 }
 0xb9b   :  { %2904 = vst [vmem:[%s4377_s12 + $0x28] sm:$0xff] %v3342_v62 }
 0xb9c   :  { %3439 = dma.done.wait [#allocation14], 16  }
 0xb9d   :  { %3440 = vsyncadd [#allocation14], 4294967280 }
 0xb9e   :  { %2948 = sfence }
 0xb9f   :  { %2949 = vsyncpa [#allocation13], 1 }
 0xba0   :  { %2950 = vsyncpa [#allocation14], 1 }
 0xba1   :  { %2951 = vsyncmov [#allocation11] }
 0xba4   :  { %s2952_s9 = vpop.sfrf %2951 }
 0xba5   :  { %p3073_p13 = scmp.ne.s32.totalorder %s2952_s9, 0 }
 0xba7   :  { %2956 = shalt.err (%p3073_p13)  }
 0xba8   :  { %2958 = vsyncmov [#allocation11 + $0x1] }
 0xbab   :  { %s2959_s0 = vpop.sfrf %2958 }
 0xbac   :  { %p3074_p0 = scmp.ne.s32.totalorder %s2959_s0, 0 }
 0xbae   :  { %2963 = shalt.err (%p3074_p0)  }
 0xbaf   :  { %2965 = vsyncmov [#allocation11 + $0x2] }
 0xbb2   :  { %s2966_s2 = vpop.sfrf %2965 }
 0xbb3   :  { %p3075_p1 = scmp.ne.s32.totalorder %s2966_s2, 0 }
 0xbb5   :  { %2970 = shalt.err (%p3075_p1)  }
 0xbb6   :  { %2972 = vsyncmov [#allocation11 + $0x3] }
 0xbb9   :  { %s2973_s1 = vpop.sfrf %2972 }
 0xbba   :  { %p3076_p2 = scmp.ne.s32.totalorder %s2973_s1, 0 }
 0xbbc   :  { %2977 = shalt.err (%p3076_p2)  }
 0xbbd   :  { %2979 = vsyncmov [#allocation11 + $0x4] }
 0xbc0   :  { %s2980_s12 = vpop.sfrf %2979 }
 0xbc1   :  { %p3077_p3 = scmp.ne.s32.totalorder %s2980_s12, 0 }
 0xbc3   :  { %2984 = shalt.err (%p3077_p3)  }
 0xbc4   :  { %2986 = vsyncmov [#allocation11 + $0x5] }
 0xbc7   :  { %s2987_s5 = vpop.sfrf %2986 }
 0xbc8   :  { %p3078_p4 = scmp.ne.s32.totalorder %s2987_s5, 0 }
 0xbca   :  { %2991 = shalt.err (%p3078_p4)  }
 0xbcb   :  { %2993 = vsyncmov [#allocation11 + $0x6] }
 0xbce   :  { %s2994_s30 = vpop.sfrf %2993 }
 0xbcf   :  { %p3079_p5 = scmp.ne.s32.totalorder %s2994_s30, 0 }
 0xbd1   :  { %2998 = shalt.err (%p3079_p5)  }
 0xbd2   :  { %3000 = vsyncmov [#allocation11 + $0x7] }
 0xbd5   :  { %s3001_s6 = vpop.sfrf %3000 }
 0xbd6   :  { %p3080_p6 = scmp.ne.s32.totalorder %s3001_s6, 0 }
 0xbd8   :  { %3005 = shalt.err (%p3080_p6)  }
 0xbd9   :  { %3007 = vsyncmov [#allocation11 + $0x8] }
 0xbdc   :  { %s3008_s23 = vpop.sfrf %3007 }
 0xbdd   :  { %p3081_p7 = scmp.ne.s32.totalorder %s3008_s23, 0 }
 0xbdf   :  { %3012 = shalt.err (%p3081_p7)  }

</bundles_post_ra>
